<compile_context>
chip_gen: v5e
topology: v5e:2x2
jax: 0.10.0
libtpu: 0.0.40
codegen_flags: <defaults>
</compile_context>

<pallas_src>
import functools
import math

import jax
import jax.numpy as jnp
from jax.experimental import pallas as pl
from jax.experimental.pallas import tpu as pltpu


# ----------------------------------------------------------------------------
# in-kernel helpers (default MXU precision, f32 accumulation)
# ----------------------------------------------------------------------------
def _dot(a, b):
    return jnp.dot(a, b, preferred_element_type=jnp.float32)


def _dot_qk(a, b):
    # (Lq, hd) x (Lk, hd) -> (Lq, Lk): contract last dim of both (no transpose op).
    return jax.lax.dot_general(a, b, (((1,), (1,)), ((), ())),
                               preferred_element_type=jnp.float32)


def _sigmoid(x):
    # exp on EUP + approx reciprocal on EUP (keeps the divide off the VPU).
    return pl.reciprocal(1.0 + jnp.exp(-x), approx=True)


def _mh_attn(q_all, k_all, v_all, key_masked, num_head, hd):
    """Multi-head masked attention on per-batch (L, D) slabs.

    masked_fill(-1e9) happens BEFORE the /sqrt(hd) scaling, matching PyTorch.
    Fully-masked rows degrade to a uniform softmax, also matching PyTorch.
    """
    scale = 1.0 / math.sqrt(hd)
    outs = []
    for h in range(num_head):                       # static unrolled loop, hd << 128
        sl = slice(h * hd, (h + 1) * hd)
        s = _dot_qk(q_all[:, sl], k_all[:, sl])     # (Lq, Lk)
        s = jnp.where(key_masked, -1e9, s) * scale
        s = s - jnp.max(s, axis=-1, keepdims=True)
        p = jnp.exp(s)
        p = p * pl.reciprocal(jnp.sum(p, axis=-1, keepdims=True), approx=True)
        outs.append(_dot(p, v_all[:, sl]))          # (Lq, hd)
    return jnp.concatenate(outs, axis=-1)           # (Lq, D)


# ----------------------------------------------------------------------------
# Kernel 1: row-tiled Linear  y = x @ W + b   (top projections only, N == D)
# ----------------------------------------------------------------------------
def _linear(x, w, b, *, max_rows=512):
    M, K = x.shape
    N = w.shape[1]
    if M <= 8:
        tm = M                                           # full extent is always legal
    else:
        # ~half of M rounded up to a multiple of 8 => grid has >=2 steps so both
        # v7x TensorCores get work; capped so double-buffered VMEM stays small.
        tm = min(max_rows, ((-(-M // 2) + 7) // 8) * 8)
    grid = (pl.cdiv(M, tm),)

    def kernel(x_ref, w_ref, b_ref, o_ref):
        o_ref[...] = (_dot(x_ref[...], w_ref[...]) + b_ref[...]).astype(o_ref.dtype)

    return pl.pallas_call(
        kernel,
        out_shape=jax.ShapeDtypeStruct((M, N), x.dtype),
        grid=grid,
        in_specs=[pl.BlockSpec((tm, K), lambda i: (i, 0)),
                  pl.BlockSpec((K, N), lambda i: (0, 0)),
                  pl.BlockSpec((1, N), lambda i: (0, 0))],
        out_specs=pl.BlockSpec((tm, N), lambda i: (i, 0)),
        compiler_params=pltpu.CompilerParams(dimension_semantics=("parallel",)),
    )(x, w, b.reshape(1, N))


# ----------------------------------------------------------------------------
# Kernel 2: whole InterModalityUpdate, fused, grid over batch.
#   per batch b:
#     v_tr = (relu(v) @ Wv3 + bv3) * v_mask ; q_tr likewise        (lane-dense 3D slab)
#     v_upd = MHA(v_q, q_k, q_v, q_mask) ; q_upd = MHA(q_q, v_k, v_v, v_mask)
#     v' = v @ Wvo[:D] + v_upd @ Wvo[D:] + bvo   (== Linear(cat(v, v_upd)))
#     q' likewise
# ----------------------------------------------------------------------------
def _inter_block(v, q, vm_col, vm_key, qm_col, qm_key, prm, *, num_head):
    B, No, D = v.shape
    Lq = q.shape[1]
    hd = D // num_head
    wv3, bv3 = prm["v_lin"]
    wq3, bq3 = prm["q_lin"]
    wvo, bvo = prm["v_output"]
    wqo, bqo = prm["q_output"]

    def kernel(v_ref, q_ref, vmc_ref, vmk_ref, qmc_ref, qmk_ref,
               wv3_ref, bv3_ref, wq3_ref, bq3_ref,
               wvov_ref, wvou_ref, bvo_ref,
               wqov_ref, wqou_ref, bqo_ref,
               vo_ref, qo_ref):
        vx = v_ref[...]                              # (No, D)
        qx = q_ref[...]                              # (Lq, D)
        v_tr = (_dot(jnp.maximum(vx, 0.0), wv3_ref[...]) + bv3_ref[...]) * vmc_ref[...]
        q_tr = (_dot(jnp.maximum(qx, 0.0), wq3_ref[...]) + bq3_ref[...]) * qmc_ref[...]
        v_k, v_q, v_v = v_tr[:, :D], v_tr[:, D:2 * D], v_tr[:, 2 * D:]
        q_k, q_q, q_v = q_tr[:, :D], q_tr[:, D:2 * D], q_tr[:, 2 * D:]
        v_masked = vmk_ref[...] == 0.0               # (1, No)
        q_masked = qmk_ref[...] == 0.0               # (1, Lq)
        v_upd = _mh_attn(v_q, q_k, q_v, q_masked, num_head, hd)   # (No, D)
        q_upd = _mh_attn(q_q, v_k, v_v, v_masked, num_head, hd)   # (Lq, D)
        vo_ref[...] = (_dot(vx, wvov_ref[...]) + _dot(v_upd, wvou_ref[...])
                       + bvo_ref[...]).astype(vo_ref.dtype)
        qo_ref[...] = (_dot(qx, wqov_ref[...]) + _dot(q_upd, wqou_ref[...])
                       + bqo_ref[...]).astype(qo_ref.dtype)

    def rep2(shape):                                 # weights/biases revisited every step
        return pl.BlockSpec(shape, lambda b: (0, 0))

    in_specs = [
        pl.BlockSpec((None, No, D), lambda b: (b, 0, 0)),
        pl.BlockSpec((None, Lq, D), lambda b: (b, 0, 0)),
        pl.BlockSpec((None, No, 1), lambda b: (b, 0, 0)),
        pl.BlockSpec((None, 1, No), lambda b: (b, 0, 0)),
        pl.BlockSpec((None, Lq, 1), lambda b: (b, 0, 0)),
        pl.BlockSpec((None, 1, Lq), lambda b: (b, 0, 0)),
        rep2((D, 3 * D)), rep2((1, 3 * D)),
        rep2((D, 3 * D)), rep2((1, 3 * D)),
        rep2((D, D)), rep2((D, D)), rep2((1, D)),
        rep2((D, D)), rep2((D, D)), rep2((1, D)),
    ]
    out_specs = [
        pl.BlockSpec((None, No, D), lambda b: (b, 0, 0)),
        pl.BlockSpec((None, Lq, D), lambda b: (b, 0, 0)),
    ]
    return pl.pallas_call(
        kernel,
        out_shape=(jax.ShapeDtypeStruct((B, No, D), v.dtype),
                   jax.ShapeDtypeStruct((B, Lq, D), q.dtype)),
        grid=(B,),
        in_specs=in_specs,
        out_specs=out_specs,
        compiler_params=pltpu.CompilerParams(dimension_semantics=("parallel",)),
    )(v, q, vm_col, vm_key, qm_col, qm_key,
      wv3, bv3.reshape(1, 3 * D), wq3, bq3.reshape(1, 3 * D),
      wvo[:D], wvo[D:], bvo.reshape(1, D),
      wqo[:D], wqo[D:], bqo.reshape(1, D))


# ----------------------------------------------------------------------------
# Kernel 3: whole DyIntraModalityUpdate, fused, grid over batch.
#   per batch b:
#     v4q_gate = sigmoid(relu(masked_mean(v)) @ Wg + bg) ; q4v_gate likewise
#     v_tr = (relu(v) @ Wv3 + bv3) * v_mask ; q_tr likewise
#     v_upd = MHA((1+q4v)*v_q, (1+q4v)*v_k, v_v, v_mask) ; q_upd symmetric
#     v' = (v + v_upd) @ Wvo + bvo       (single shared-weight matmul)
# ----------------------------------------------------------------------------
def _intra_block(v, q, vm_col, vm_key, qm_col, qm_key, prm, *, num_head):
    B, No, D = v.shape
    Lq = q.shape[1]
    hd = D // num_head
    wg_v4q, bg_v4q = prm["v4q_gate_lin"]
    wg_q4v, bg_q4v = prm["q4v_gate_lin"]
    wv3, bv3 = prm["v_lin"]
    wq3, bq3 = prm["q_lin"]
    wvo, bvo = prm["v_output"]
    wqo, bqo = prm["q_output"]

    def kernel(v_ref, q_ref, vmc_ref, vmk_ref, qmc_ref, qmk_ref,
               wgv_ref, bgv_ref, wgq_ref, bgq_ref,
               wv3_ref, bv3_ref, wq3_ref, bq3_ref,
               wvo_ref, bvo_ref, wqo_ref, bqo_ref,
               vo_ref, qo_ref):
        vx = v_ref[...]                              # (No, D)
        qx = q_ref[...]                              # (Lq, D)
        vmc = vmc_ref[...]                           # (No, 1)
        qmc = qmc_ref[...]                           # (Lq, 1)
        # Masked means -> gates, folded into this kernel (no per-batch gate launches).
        v_mean = (jnp.sum(vx * vmc, axis=0, keepdims=True)
                  / jnp.sum(vmc, axis=0, keepdims=True))          # (1, D)
        q_mean = (jnp.sum(qx * qmc, axis=0, keepdims=True)
                  / jnp.sum(qmc, axis=0, keepdims=True))          # (1, D)
        v4q_gate = _sigmoid(_dot(jnp.maximum(v_mean, 0.0), wgv_ref[...]) + bgv_ref[...])
        q4v_gate = _sigmoid(_dot(jnp.maximum(q_mean, 0.0), wgq_ref[...]) + bgq_ref[...])
        v_tr = (_dot(jnp.maximum(vx, 0.0), wv3_ref[...]) + bv3_ref[...]) * vmc
        q_tr = (_dot(jnp.maximum(qx, 0.0), wq3_ref[...]) + bq3_ref[...]) * qmc
        v_k, v_q, v_v = v_tr[:, :D], v_tr[:, D:2 * D], v_tr[:, 2 * D:]
        q_k, q_q, q_v = q_tr[:, :D], q_tr[:, D:2 * D], q_tr[:, 2 * D:]
        gv = 1.0 + q4v_gate                          # scales v's Q and K
        gq = 1.0 + v4q_gate                          # scales q's Q and K
        v_masked = vmk_ref[...] == 0.0
        q_masked = qmk_ref[...] == 0.0
        v_upd = _mh_attn(v_q * gv, v_k * gv, v_v, v_masked, num_head, hd)
        q_upd = _mh_attn(q_q * gq, q_k * gq, q_v, q_masked, num_head, hd)
        # Shared-weight output projection: one matmul on (x + upd).
        vo_ref[...] = (_dot(vx + v_upd, wvo_ref[...]) + bvo_ref[...]).astype(vo_ref.dtype)
        qo_ref[...] = (_dot(qx + q_upd, wqo_ref[...]) + bqo_ref[...]).astype(qo_ref.dtype)

    def rep2(shape):
        return pl.BlockSpec(shape, lambda b: (0, 0))

    in_specs = [
        pl.BlockSpec((None, No, D), lambda b: (b, 0, 0)),
        pl.BlockSpec((None, Lq, D), lambda b: (b, 0, 0)),
        pl.BlockSpec((None, No, 1), lambda b: (b, 0, 0)),
        pl.BlockSpec((None, 1, No), lambda b: (b, 0, 0)),
        pl.BlockSpec((None, Lq, 1), lambda b: (b, 0, 0)),
        pl.BlockSpec((None, 1, Lq), lambda b: (b, 0, 0)),
        rep2((D, D)), rep2((1, D)), rep2((D, D)), rep2((1, D)),
        rep2((D, 3 * D)), rep2((1, 3 * D)), rep2((D, 3 * D)), rep2((1, 3 * D)),
        rep2((D, D)), rep2((1, D)), rep2((D, D)), rep2((1, D)),
    ]
    out_specs = [
        pl.BlockSpec((None, No, D), lambda b: (b, 0, 0)),
        pl.BlockSpec((None, Lq, D), lambda b: (b, 0, 0)),
    ]
    return pl.pallas_call(
        kernel,
        out_shape=(jax.ShapeDtypeStruct((B, No, D), v.dtype),
                   jax.ShapeDtypeStruct((B, Lq, D), q.dtype)),
        grid=(B,),
        in_specs=in_specs,
        out_specs=out_specs,
        compiler_params=pltpu.CompilerParams(dimension_semantics=("parallel",)),
    )(v, q, vm_col, vm_key, qm_col, qm_key,
      wg_v4q, bg_v4q.reshape(1, D), wg_q4v, bg_q4v.reshape(1, D),
      wv3, bv3.reshape(1, 3 * D), wq3, bq3.reshape(1, 3 * D),
      wvo, bvo.reshape(1, D), wqo, bqo.reshape(1, D))


# ----------------------------------------------------------------------------
# SingleBlock forward: 2 top-projection calls + 2 fused calls per block.
# Weights stored as (in_features, out_features); Dropout(0.0) folded away.
# ----------------------------------------------------------------------------
def single_block_forward(params, v, q, v_mask, q_mask, *,
                         num_block, num_inter_head, num_intra_head):
    B, No, _ = v.shape
    _, Lq, _ = q.shape

    # Free (view) reshapes of the masks.
    vm_col = v_mask.reshape(B, No, 1)
    vm_key = v_mask.reshape(B, 1, No)
    qm_col = q_mask.reshape(B, Lq, 1)
    qm_key = q_mask.reshape(B, 1, Lq)

    def lin3(x, wb):
        w, b = wb
        Bx, Lx, Kx = x.shape
        return _linear(x.reshape(Bx * Lx, Kx), w, b).reshape(Bx, Lx, -1)

    # Top projections (no relu).
    v = lin3(v, params["v_lin"])
    q = lin3(q, params["q_lin"])

    for _ in range(num_block):
        v, q = _inter_block(v, q, vm_col, vm_key, qm_col, qm_key,
                            params["inter"], num_head=num_inter_head)
        v, q = _intra_block(v, q, vm_col, vm_key, qm_col, qm_key,
                            params["intra"], num_head=num_intra_head)
    return v, q


# ----------------------------------------------------------------------------
# Parameter init (PyTorch nn.Linear-style uniform) and a pure-JAX reference.
# ----------------------------------------------------------------------------
def _init_linear(key, fan_in, fan_out):
    kw, kb = jax.random.split(key)
    bound = 1.0 / math.sqrt(fan_in)
    w = jax.random.uniform(kw, (fan_in, fan_out), jnp.float32, -bound, bound)
    b = jax.random.uniform(kb, (fan_out,), jnp.float32, -bound, bound)
    return w, b


def init_single_block_params(key, v_size, q_size, output_size):
    keys = jax.random.split(key, 12)
    D = output_size
    return {
        "v_lin": _init_linear(keys[0], v_size, D),
        "q_lin": _init_linear(keys[1], q_size, D),
        "inter": {
            "v_lin": _init_linear(keys[2], D, 3 * D),
            "q_lin": _init_linear(keys[3], D, 3 * D),
            "v_output": _init_linear(keys[4], 2 * D, D),
            "q_output": _init_linear(keys[5], 2 * D, D),
        },
        "intra": {
            "v4q_gate_lin": _init_linear(keys[6], D, D),
            "q4v_gate_lin": _init_linear(keys[7], D, D),
            "v_lin": _init_linear(keys[8], D, 3 * D),
            "q_lin": _init_linear(keys[9], D, 3 * D),
            "v_output": _init_linear(keys[10], D, D),
            "q_output": _init_linear(keys[11], D, D),
        },
    }


def single_block_reference(params, v, q, v_mask, q_mask, *,
                           num_block, num_inter_head, num_intra_head):
    D = params["v_lin"][0].shape[1]
    relu = jax.nn.relu
    P = jax.lax.Precision.HIGHEST   # accurate reference; kernels use fast MXU precision

    def lin(x, wb):
        w, b = wb
        return jnp.matmul(x, w, precision=P) + b

    def mha_ref(qx, kx, vx, key_mask, num_head):
        hd = D // num_head
        outs = []
        for h in range(num_head):
            sl = slice(h * hd, (h + 1) * hd)
            s = jnp.einsum("bqd,bkd->bqk", qx[..., sl], kx[..., sl], precision=P)
            s = jnp.where(key_mask[:, None, :] == 0, -1e9, s) / math.sqrt(hd)
            p = jax.nn.softmax(s, axis=-1)
            outs.append(jnp.einsum("bqk,bkd->bqd", p, vx[..., sl], precision=P))
        return jnp.concatenate(outs, axis=-1)

    v = lin(v, params["v_lin"])
    q = lin(q, params["q_lin"])
    for _ in range(num_block):
        ip = params["inter"]
        v_tr = lin(relu(v), ip["v_lin"]) * v_mask[..., None]
        q_tr = lin(relu(q), ip["q_lin"]) * q_mask[..., None]
        v_k, v_q, v_v = jnp.split(v_tr, 3, axis=2)
        q_k, q_q, q_v = jnp.split(q_tr, 3, axis=2)
        v_upd = mha_ref(v_q, q_k, q_v, q_mask, num_inter_head)
        q_upd = mha_ref(q_q, v_k, v_v, v_mask, num_inter_head)
        v = lin(jnp.concatenate([v, v_upd], axis=2), ip["v_output"])
        q = lin(jnp.concatenate([q, q_upd], axis=2), ip["q_output"])

        tp = params["intra"]
        v_mean = (v * v_mask[..., None]).sum(1) / v_mask.sum(1, keepdims=True)
        q_mean = (q * q_mask[..., None]).sum(1) / q_mask.sum(1, keepdims=True)
        v4q_gate = jax.nn.sigmoid(lin(relu(v_mean), tp["v4q_gate_lin"]))[:, None, :]
        q4v_gate = jax.nn.sigmoid(lin(relu(q_mean), tp["q4v_gate_lin"]))[:, None, :]
        v_tr = lin(relu(v), tp["v_lin"]) * v_mask[..., None]
        q_tr = lin(relu(q), tp["q_lin"]) * q_mask[..., None]
        v_k, v_q, v_v = jnp.split(v_tr, 3, axis=2)
        q_k, q_q, q_v = jnp.split(q_tr, 3, axis=2)
        v_upd = mha_ref((1 + q4v_gate) * v_q, (1 + q4v_gate) * v_k, v_v,
                        v_mask, num_intra_head)
        q_upd = mha_ref((1 + v4q_gate) * q_q, (1 + v4q_gate) * q_k, q_v,
                        q_mask, num_intra_head)
        v = lin(v + v_upd, tp["v_output"])
        q = lin(q + q_upd, tp["q_output"])
    return v, q


if __name__ == "__main__":
    key = jax.random.PRNGKey(0)
    k_params, kv, kq = jax.random.split(key, 3)

    # Small shapes consistent with the module: batch=2, num_obj=8, max_len=8, hidden=32.
    B, num_obj, max_len = 2, 8, 8
    v_size = q_size = output_size = 32
    num_inter_head = 4
    num_intra_head = 4
    num_block = 1

    params = init_single_block_params(k_params, v_size, q_size, output_size)
    v = jax.random.normal(kv, (B, num_obj, v_size), dtype=jnp.float32)
    q = jax.random.normal(kq, (B, max_len, q_size), dtype=jnp.float32)
    v_mask = jnp.array([[1, 1, 1, 1, 1, 1, 1, 1],
                        [1, 1, 1, 1, 1, 1, 0, 0]], dtype=jnp.float32)
    q_mask = jnp.array([[1, 1, 1, 1, 1, 0, 0, 0],
                        [1, 1, 1, 1, 1, 1, 1, 1]], dtype=jnp.float32)

    fwd = jax.jit(functools.partial(single_block_forward,
                                    num_block=num_block,
                                    num_inter_head=num_inter_head,
                                    num_intra_head=num_intra_head))
    v_out, q_out = fwd(params, v, q, v_mask, q_mask)
    jax.block_until_ready((v_out, q_out))

    v_ref, q_ref = single_block_reference(params, v, q, v_mask, q_mask,
                                          num_block=num_block,
                                          num_inter_head=num_inter_head,
                                          num_intra_head=num_intra_head)

    assert v_out.shape == (B, num_obj, output_size)
    assert q_out.shape == (B, max_len, output_size)
    # Kernels use default (fast) MXU precision + approx-reciprocal softmax, so
    # compare against the HIGHEST-precision reference with bf16-level tolerance.
    assert jnp.allclose(v_out, v_ref, atol=3e-2, rtol=3e-2), \
        float(jnp.max(jnp.abs(v_out - v_ref)))
    assert jnp.allclose(q_out, q_ref, atol=3e-2, rtol=3e-2), \
        float(jnp.max(jnp.abs(q_out - q_ref)))

    print("KERNEL_OK")
</pallas_src>

<mosaic_0001>
module attributes {stable_mosaic.version = 11 : i64} {
  func.func @kernel(%arg0: i32, %arg1: memref<8x32xf32, #tpu.memory_space<vmem>>, %arg2: memref<32x32xf32, #tpu.memory_space<vmem>>, %arg3: memref<1x32xf32, #tpu.memory_space<vmem>>, %arg4: memref<8x32xf32, #tpu.memory_space<vmem>>) attributes {dimension_semantics = [#tpu.dimension_semantics<parallel>], iteration_bounds = array<i64: 2>, scalar_prefetch = 0 : i64, scratch_operands = 0 : i64, tpu.core_type = #tpu.core_type<tc>, window_params = [{transform_indices = @transform_0, window_bounds = array<i64: 8, 32>}, {pipeline_mode = #tpu.pipeline_mode<synchronous>, transform_indices = @transform_1, window_bounds = array<i64: 32, 32>}, {pipeline_mode = #tpu.pipeline_mode<synchronous>, transform_indices = @transform_2, window_bounds = array<i64: 1, 32>}, {transform_indices = @transform_3, window_bounds = array<i64: 8, 32>}]} {
    %c0 = arith.constant 0 : index
    %c0_0 = arith.constant 0 : index
    %0 = vector.load %arg1[%c0, %c0_0] : memref<8x32xf32, #tpu.memory_space<vmem>>, vector<8x32xf32>
    %c0_1 = arith.constant 0 : index
    %c0_2 = arith.constant 0 : index
    %1 = vector.load %arg2[%c0_1, %c0_2] : memref<32x32xf32, #tpu.memory_space<vmem>>, vector<32x32xf32>
    %cst = arith.constant dense<0.000000e+00> : vector<8x32xf32>
    %2 = tpu.matmul %0, %1, %cst {dimension_numbers = #tpu.dot_dimension_numbers<[1], [0], [0], [1], [0, 0, 1, 1], [], []>} : vector<8x32xf32>, vector<32x32xf32>, vector<8x32xf32> -> vector<8x32xf32>
    %c0_3 = arith.constant 0 : index
    %c0_4 = arith.constant 0 : index
    %3 = vector.load %arg3[%c0_3, %c0_4] : memref<1x32xf32, #tpu.memory_space<vmem>>, vector<1x32xf32>
    %4 = vector.broadcast %3 : vector<1x32xf32> to vector<8x32xf32>
    %5 = arith.addf %2, %4 : vector<8x32xf32>
    %c0_5 = arith.constant 0 : index
    %c0_6 = arith.constant 0 : index
    %6 = vector.load %arg4[%c0_5, %c0_6] : memref<8x32xf32, #tpu.memory_space<vmem>>, vector<8x32xf32>
    tpu.vector_store %arg4[%c0_5, %c0_6], %5 {strides = array<i32>} : memref<8x32xf32, #tpu.memory_space<vmem>>, vector<8x32xf32>,
    return
  }
  func.func @transform_0(%arg0: i32) -> (i32, i32) {
    %c0_i32 = arith.constant 0 : i32
    %c0_i32_0 = arith.constant 0 : i32
    return %arg0, %c0_i32 : i32, i32
  }
  func.func @transform_1(%arg0: i32) -> (i32, i32) {
    %c0_i32 = arith.constant 0 : i32
    %c0_i32_0 = arith.constant 0 : i32
    %c0_i32_1 = arith.constant 0 : i32
    return %c0_i32, %c0_i32_0 : i32, i32
  }
  func.func @transform_2(%arg0: i32) -> (i32, i32) {
    %c0_i32 = arith.constant 0 : i32
    %c0_i32_0 = arith.constant 0 : i32
    %c0_i32_1 = arith.constant 0 : i32
    return %c0_i32, %c0_i32_0 : i32, i32
  }
  func.func @transform_3(%arg0: i32) -> (i32, i32) {
    %c0_i32 = arith.constant 0 : i32
    %c0_i32_0 = arith.constant 0 : i32
    return %arg0, %c0_i32 : i32, i32
  }
}

module attributes {stable_mosaic.version = 11 : i64} {
  func.func @kernel(%arg0: i32, %arg1: memref<1x8x32xf32, #tpu.memory_space<vmem>>, %arg2: memref<1x8x32xf32, #tpu.memory_space<vmem>>, %arg3: memref<1x8x1xf32, #tpu.memory_space<vmem>>, %arg4: memref<1x1x8xf32, #tpu.memory_space<vmem>>, %arg5: memref<1x8x1xf32, #tpu.memory_space<vmem>>, %arg6: memref<1x1x8xf32, #tpu.memory_space<vmem>>, %arg7: memref<32x32xf32, #tpu.memory_space<vmem>>, %arg8: memref<1x32xf32, #tpu.memory_space<vmem>>, %arg9: memref<32x32xf32, #tpu.memory_space<vmem>>, %arg10: memref<1x32xf32, #tpu.memory_space<vmem>>, %arg11: memref<32x96xf32, #tpu.memory_space<vmem>>, %arg12: memref<1x96xf32, #tpu.memory_space<vmem>>, %arg13: memref<32x96xf32, #tpu.memory_space<vmem>>, %arg14: memref<1x96xf32, #tpu.memory_space<vmem>>, %arg15: memref<32x32xf32, #tpu.memory_space<vmem>>, %arg16: memref<1x32xf32, #tpu.memory_space<vmem>>, %arg17: memref<32x32xf32, #tpu.memory_space<vmem>>, %arg18: memref<1x32xf32, #tpu.memory_space<vmem>>, %arg19: memref<1x8x32xf32, #tpu.memory_space<vmem>>, %arg20: memref<1x8x32xf32, #tpu.memory_space<vmem>>) attributes {dimension_semantics = [#tpu.dimension_semantics<parallel>], iteration_bounds = array<i64: 2>, scalar_prefetch = 0 : i64, scratch_operands = 0 : i64, tpu.core_type = #tpu.core_type<tc>, window_params = [{transform_indices = @transform_0, window_bounds = array<i64: 1, 8, 32>}, {transform_indices = @transform_1, window_bounds = array<i64: 1, 8, 32>}, {transform_indices = @transform_2, window_bounds = array<i64: 1, 8, 1>}, {transform_indices = @transform_3, window_bounds = array<i64: 1, 1, 8>}, {transform_indices = @transform_4, window_bounds = array<i64: 1, 8, 1>}, {transform_indices = @transform_5, window_bounds = array<i64: 1, 1, 8>}, {pipeline_mode = #tpu.pipeline_mode<synchronous>, transform_indices = @transform_6, window_bounds = array<i64: 32, 32>}, {pipeline_mode = #tpu.pipeline_mode<synchronous>, transform_indices = @transform_7, window_bounds = array<i64: 1, 32>}, {pipeline_mode = #tpu.pipeline_mode<synchronous>, transform_indices = @transform_8, window_bounds = array<i64: 32, 32>}, {pipeline_mode = #tpu.pipeline_mode<synchronous>, transform_indices = @transform_9, window_bounds = array<i64: 1, 32>}, {pipeline_mode = #tpu.pipeline_mode<synchronous>, transform_indices = @transform_10, window_bounds = array<i64: 32, 96>}, {pipeline_mode = #tpu.pipeline_mode<synchronous>, transform_indices = @transform_11, window_bounds = array<i64: 1, 96>}, {pipeline_mode = #tpu.pipeline_mode<synchronous>, transform_indices = @transform_12, window_bounds = array<i64: 32, 96>}, {pipeline_mode = #tpu.pipeline_mode<synchronous>, transform_indices = @transform_13, window_bounds = array<i64: 1, 96>}, {pipeline_mode = #tpu.pipeline_mode<synchronous>, transform_indices = @transform_14, window_bounds = array<i64: 32, 32>}, {pipeline_mode = #tpu.pipeline_mode<synchronous>, transform_indices = @transform_15, window_bounds = array<i64: 1, 32>}, {pipeline_mode = #tpu.pipeline_mode<synchronous>, transform_indices = @transform_16, window_bounds = array<i64: 32, 32>}, {pipeline_mode = #tpu.pipeline_mode<synchronous>, transform_indices = @transform_17, window_bounds = array<i64: 1, 32>}, {transform_indices = @transform_18, window_bounds = array<i64: 1, 8, 32>}, {transform_indices = @transform_19, window_bounds = array<i64: 1, 8, 32>}]} {
    %c0 = arith.constant 0 : index
    %c0_0 = arith.constant 0 : index
    %c0_1 = arith.constant 0 : index
    %0 = vector.load %arg1[%c0, %c0_0, %c0_1] : memref<1x8x32xf32, #tpu.memory_space<vmem>>, vector<1x8x32xf32>
    %1 = vector.shape_cast %0 : vector<1x8x32xf32> to vector<8x32xf32>
    %c0_2 = arith.constant 0 : index
    %c0_3 = arith.constant 0 : index
    %c0_4 = arith.constant 0 : index
    %2 = vector.load %arg2[%c0_2, %c0_3, %c0_4] : memref<1x8x32xf32, #tpu.memory_space<vmem>>, vector<1x8x32xf32>
    %3 = vector.shape_cast %2 : vector<1x8x32xf32> to vector<8x32xf32>
    %c0_5 = arith.constant 0 : index
    %c0_6 = arith.constant 0 : index
    %c0_7 = arith.constant 0 : index
    %4 = vector.load %arg3[%c0_5, %c0_6, %c0_7] : memref<1x8x1xf32, #tpu.memory_space<vmem>>, vector<1x8x1xf32>
    %5 = vector.shape_cast %4 : vector<1x8x1xf32> to vector<8x1xf32>
    %c0_8 = arith.constant 0 : index
    %c0_9 = arith.constant 0 : index
    %c0_10 = arith.constant 0 : index
    %6 = vector.load %arg5[%c0_8, %c0_9, %c0_10] : memref<1x8x1xf32, #tpu.memory_space<vmem>>, vector<1x8x1xf32>
    %7 = vector.shape_cast %6 : vector<1x8x1xf32> to vector<8x1xf32>
    %8 = vector.broadcast %5 : vector<8x1xf32> to vector<8x32xf32>
    %9 = arith.mulf %1, %8 : vector<8x32xf32>
    %cst = arith.constant dense<0.000000e+00> : vector<32xf32>
    %10 = vector.multi_reduction <add>, %9, %cst [0] : vector<8x32xf32> to vector<32xf32>
    %11 = vector.shape_cast %10 : vector<32xf32> to vector<1x32xf32>
    %cst_11 = arith.constant dense<0.000000e+00> : vector<1xf32>
    %12 = vector.multi_reduction <add>, %5, %cst_11 [0] : vector<8x1xf32> to vector<1xf32>
    %13 = vector.shape_cast %12 : vector<1xf32> to vector<1x1xf32>
    %14 = vector.broadcast %13 : vector<1x1xf32> to vector<1x32xf32>
    %15 = arith.divf %11, %14 : vector<1x32xf32>
    %16 = vector.broadcast %7 : vector<8x1xf32> to vector<8x32xf32>
    %17 = arith.mulf %3, %16 : vector<8x32xf32>
    %cst_12 = arith.constant dense<0.000000e+00> : vector<32xf32>
    %18 = vector.multi_reduction <add>, %17, %cst_12 [0] : vector<8x32xf32> to vector<32xf32>
    %19 = vector.shape_cast %18 : vector<32xf32> to vector<1x32xf32>
    %cst_13 = arith.constant dense<0.000000e+00> : vector<1xf32>
    %20 = vector.multi_reduction <add>, %7, %cst_13 [0] : vector<8x1xf32> to vector<1xf32>
    %21 = vector.shape_cast %20 : vector<1xf32> to vector<1x1xf32>
    %22 = vector.broadcast %21 : vector<1x1xf32> to vector<1x32xf32>
    %23 = arith.divf %19, %22 : vector<1x32xf32>
    %cst_14 = arith.constant 0.000000e+00 : f32
    %24 = vector.broadcast %cst_14 : f32 to vector<1x32xf32>
    %25 = arith.maximumf %15, %24 : vector<1x32xf32>
    %c0_15 = arith.constant 0 : index
    %c0_16 = arith.constant 0 : index
    %26 = vector.load %arg7[%c0_15, %c0_16] : memref<32x32xf32, #tpu.memory_space<vmem>>, vector<32x32xf32>
    %cst_17 = arith.constant dense<0.000000e+00> : vector<1x32xf32>
    %27 = tpu.matmul %25, %26, %cst_17 {dimension_numbers = #tpu.dot_dimension_numbers<[1], [0], [0], [1], [0, 0, 1, 1], [], []>} : vector<1x32xf32>, vector<32x32xf32>, vector<1x32xf32> -> vector<1x32xf32>
    %c0_18 = arith.constant 0 : index
    %c0_19 = arith.constant 0 : index
    %28 = vector.load %arg8[%c0_18, %c0_19] : memref<1x32xf32, #tpu.memory_space<vmem>>, vector<1x32xf32>
    %29 = arith.addf %27, %28 : vector<1x32xf32>
    %cst_20 = arith.constant 0.000000e+00 : f32
    %30 = vector.broadcast %cst_20 : f32 to vector<1x32xf32>
    %31 = arith.subf %30, %29 : vector<1x32xf32>
    %32 = math.exp %31 : vector<1x32xf32>
    %cst_21 = arith.constant 1.000000e+00 : f32
    %33 = vector.broadcast %cst_21 : f32 to vector<1x32xf32>
    %34 = arith.addf %33, %32 : vector<1x32xf32>
    %35 = tpu.reciprocal %34 {approx = true} : vector<1x32xf32> -> vector<1x32xf32>
    %cst_22 = arith.constant 0.000000e+00 : f32
    %36 = vector.broadcast %cst_22 : f32 to vector<1x32xf32>
    %37 = arith.maximumf %23, %36 : vector<1x32xf32>
    %c0_23 = arith.constant 0 : index
    %c0_24 = arith.constant 0 : index
    %38 = vector.load %arg9[%c0_23, %c0_24] : memref<32x32xf32, #tpu.memory_space<vmem>>, vector<32x32xf32>
    %cst_25 = arith.constant dense<0.000000e+00> : vector<1x32xf32>
    %39 = tpu.matmul %37, %38, %cst_25 {dimension_numbers = #tpu.dot_dimension_numbers<[1], [0], [0], [1], [0, 0, 1, 1], [], []>} : vector<1x32xf32>, vector<32x32xf32>, vector<1x32xf32> -> vector<1x32xf32>
    %c0_26 = arith.constant 0 : index
    %c0_27 = arith.constant 0 : index
    %40 = vector.load %arg10[%c0_26, %c0_27] : memref<1x32xf32, #tpu.memory_space<vmem>>, vector<1x32xf32>
    %41 = arith.addf %39, %40 : vector<1x32xf32>
    %cst_28 = arith.constant 0.000000e+00 : f32
    %42 = vector.broadcast %cst_28 : f32 to vector<1x32xf32>
    %43 = arith.subf %42, %41 : vector<1x32xf32>
    %44 = math.exp %43 : vector<1x32xf32>
    %cst_29 = arith.constant 1.000000e+00 : f32
    %45 = vector.broadcast %cst_29 : f32 to vector<1x32xf32>
    %46 = arith.addf %45, %44 : vector<1x32xf32>
    %47 = tpu.reciprocal %46 {approx = true} : vector<1x32xf32> -> vector<1x32xf32>
    %cst_30 = arith.constant 0.000000e+00 : f32
    %48 = vector.broadcast %cst_30 : f32 to vector<8x32xf32>
    %49 = arith.maximumf %1, %48 : vector<8x32xf32>
    %c0_31 = arith.constant 0 : index
    %c0_32 = arith.constant 0 : index
    %50 = vector.load %arg11[%c0_31, %c0_32] : memref<32x96xf32, #tpu.memory_space<vmem>>, vector<32x96xf32>
    %cst_33 = arith.constant dense<0.000000e+00> : vector<8x96xf32>
    %51 = tpu.matmul %49, %50, %cst_33 {dimension_numbers = #tpu.dot_dimension_numbers<[1], [0], [0], [1], [0, 0, 1, 1], [], []>} : vector<8x32xf32>, vector<32x96xf32>, vector<8x96xf32> -> vector<8x96xf32>
    %c0_34 = arith.constant 0 : index
    %c0_35 = arith.constant 0 : index
    %52 = vector.load %arg12[%c0_34, %c0_35] : memref<1x96xf32, #tpu.memory_space<vmem>>, vector<1x96xf32>
    %53 = vector.broadcast %52 : vector<1x96xf32> to vector<8x96xf32>
    %54 = arith.addf %51, %53 : vector<8x96xf32>
    %55 = vector.broadcast %5 : vector<8x1xf32> to vector<8x96xf32>
    %56 = arith.mulf %54, %55 : vector<8x96xf32>
    %cst_36 = arith.constant 0.000000e+00 : f32
    %57 = vector.broadcast %cst_36 : f32 to vector<8x32xf32>
    %58 = arith.maximumf %3, %57 : vector<8x32xf32>
    %c0_37 = arith.constant 0 : index
    %c0_38 = arith.constant 0 : index
    %59 = vector.load %arg13[%c0_37, %c0_38] : memref<32x96xf32, #tpu.memory_space<vmem>>, vector<32x96xf32>
    %cst_39 = arith.constant dense<0.000000e+00> : vector<8x96xf32>
    %60 = tpu.matmul %58, %59, %cst_39 {dimension_numbers = #tpu.dot_dimension_numbers<[1], [0], [0], [1], [0, 0, 1, 1], [], []>} : vector<8x32xf32>, vector<32x96xf32>, vector<8x96xf32> -> vector<8x96xf32>
    %c0_40 = arith.constant 0 : index
    %c0_41 = arith.constant 0 : index
    %61 = vector.load %arg14[%c0_40, %c0_41] : memref<1x96xf32, #tpu.memory_space<vmem>>, vector<1x96xf32>
    %62 = vector.broadcast %61 : vector<1x96xf32> to vector<8x96xf32>
    %63 = arith.addf %60, %62 : vector<8x96xf32>
    %64 = vector.broadcast %7 : vector<8x1xf32> to vector<8x96xf32>
    %65 = arith.mulf %63, %64 : vector<8x96xf32>
    %66 = vector.extract_strided_slice %56 {offsets = [0, 0], sizes = [8, 32], strides = [1, 1]} : vector<8x96xf32> to vector<8x32xf32>
    %67 = vector.extract_strided_slice %56 {offsets = [0, 32], sizes = [8, 32], strides = [1, 1]} : vector<8x96xf32> to vector<8x32xf32>
    %68 = vector.extract_strided_slice %56 {offsets = [0, 64], sizes = [8, 32], strides = [1, 1]} : vector<8x96xf32> to vector<8x32xf32>
    %69 = vector.extract_strided_slice %65 {offsets = [0, 0], sizes = [8, 32], strides = [1, 1]} : vector<8x96xf32> to vector<8x32xf32>
    %70 = vector.extract_strided_slice %65 {offsets = [0, 32], sizes = [8, 32], strides = [1, 1]} : vector<8x96xf32> to vector<8x32xf32>
    %71 = vector.extract_strided_slice %65 {offsets = [0, 64], sizes = [8, 32], strides = [1, 1]} : vector<8x96xf32> to vector<8x32xf32>
    %cst_42 = arith.constant 1.000000e+00 : f32
    %72 = vector.broadcast %cst_42 : f32 to vector<1x32xf32>
    %73 = arith.addf %72, %47 : vector<1x32xf32>
    %cst_43 = arith.constant 1.000000e+00 : f32
    %74 = vector.broadcast %cst_43 : f32 to vector<1x32xf32>
    %75 = arith.addf %74, %35 : vector<1x32xf32>
    %c0_44 = arith.constant 0 : index
    %c0_45 = arith.constant 0 : index
    %c0_46 = arith.constant 0 : index
    %76 = vector.load %arg4[%c0_44, %c0_45, %c0_46] : memref<1x1x8xf32, #tpu.memory_space<vmem>>, vector<1x1x8xf32>
    %77 = vector.shape_cast %76 : vector<1x1x8xf32> to vector<1x8xf32>
    %cst_47 = arith.constant 0.000000e+00 : f32
    %78 = vector.broadcast %cst_47 : f32 to vector<1x8xf32>
    %79 = arith.cmpf oeq, %77, %78 : vector<1x8xf32>
    %c0_48 = arith.constant 0 : index
    %c0_49 = arith.constant 0 : index
    %c0_50 = arith.constant 0 : index
    %80 = vector.load %arg6[%c0_48, %c0_49, %c0_50] : memref<1x1x8xf32, #tpu.memory_space<vmem>>, vector<1x1x8xf32>
    %81 = vector.shape_cast %80 : vector<1x1x8xf32> to vector<1x8xf32>
    %cst_51 = arith.constant 0.000000e+00 : f32
    %82 = vector.broadcast %cst_51 : f32 to vector<1x8xf32>
    %83 = arith.cmpf oeq, %81, %82 : vector<1x8xf32>
    %84 = vector.broadcast %73 : vector<1x32xf32> to vector<8x32xf32>
    %85 = arith.mulf %67, %84 : vector<8x32xf32>
    %86 = vector.broadcast %73 : vector<1x32xf32> to vector<8x32xf32>
    %87 = arith.mulf %66, %86 : vector<8x32xf32>
    %88 = vector.extract_strided_slice %85 {offsets = [0, 0], sizes = [8, 8], strides = [1, 1]} : vector<8x32xf32> to vector<8x8xf32>
    %89 = vector.extract_strided_slice %87 {offsets = [0, 0], sizes = [8, 8], strides = [1, 1]} : vector<8x32xf32> to vector<8x8xf32>
    %cst_52 = arith.constant dense<0.000000e+00> : vector<8x8xf32>
    %90 = tpu.matmul %88, %89, %cst_52 {dimension_numbers = #tpu.dot_dimension_numbers<[1], [1], [0], [0], [0, 0, 1, 0], [], []>} : vector<8x8xf32>, vector<8x8xf32>, vector<8x8xf32> -> vector<8x8xf32>
    %cst_53 = arith.constant -1.000000e+09 : f32
    %91 = vector.shape_cast %79 : vector<1x8xi1> to vector<1x8xi1>
    %92 = vector.broadcast %91 : vector<1x8xi1> to vector<8x8xi1>
    %93 = vector.broadcast %cst_53 : f32 to vector<8x8xf32>
    %94 = arith.select %92, %93, %90 : vector<8x8xi1>, vector<8x8xf32>
    %cst_54 = arith.constant 0.353553385 : f32
    %95 = vector.broadcast %cst_54 : f32 to vector<8x8xf32>
    %96 = arith.mulf %94, %95 : vector<8x8xf32>
    %cst_55 = arith.constant dense<0xFF800000> : vector<8xf32>
    %97 = vector.multi_reduction <maximumf>, %96, %cst_55 [1] : vector<8x8xf32> to vector<8xf32>
    %98 = vector.shape_cast %97 : vector<8xf32> to vector<8x1xf32>
    %99 = vector.broadcast %98 : vector<8x1xf32> to vector<8x8xf32>
    %100 = arith.subf %96, %99 : vector<8x8xf32>
    %101 = math.exp %100 : vector<8x8xf32>
    %cst_56 = arith.constant dense<0.000000e+00> : vector<8xf32>
    %102 = vector.multi_reduction <add>, %101, %cst_56 [1] : vector<8x8xf32> to vector<8xf32>
    %103 = vector.shape_cast %102 : vector<8xf32> to vector<8x1xf32>
    %104 = tpu.reciprocal %103 {approx = true} : vector<8x1xf32> -> vector<8x1xf32>
    %105 = vector.broadcast %104 : vector<8x1xf32> to vector<8x8xf32>
    %106 = arith.mulf %101, %105 : vector<8x8xf32>
    %107 = vector.extract_strided_slice %68 {offsets = [0, 0], sizes = [8, 8], strides = [1, 1]} : vector<8x32xf32> to vector<8x8xf32>
    %cst_57 = arith.constant dense<0.000000e+00> : vector<8x8xf32>
    %108 = tpu.matmul %106, %107, %cst_57 {dimension_numbers = #tpu.dot_dimension_numbers<[1], [0], [0], [1], [0, 0, 1, 1], [], []>} : vector<8x8xf32>, vector<8x8xf32>, vector<8x8xf32> -> vector<8x8xf32>
    %109 = vector.extract_strided_slice %85 {offsets = [0, 8], sizes = [8, 8], strides = [1, 1]} : vector<8x32xf32> to vector<8x8xf32>
    %110 = vector.extract_strided_slice %87 {offsets = [0, 8], sizes = [8, 8], strides = [1, 1]} : vector<8x32xf32> to vector<8x8xf32>
    %cst_58 = arith.constant dense<0.000000e+00> : vector<8x8xf32>
    %111 = tpu.matmul %109, %110, %cst_58 {dimension_numbers = #tpu.dot_dimension_numbers<[1], [1], [0], [0], [0, 0, 1, 0], [], []>} : vector<8x8xf32>, vector<8x8xf32>, vector<8x8xf32> -> vector<8x8xf32>
    %cst_59 = arith.constant -1.000000e+09 : f32
    %112 = vector.shape_cast %79 : vector<1x8xi1> to vector<1x8xi1>
    %113 = vector.broadcast %112 : vector<1x8xi1> to vector<8x8xi1>
    %114 = vector.broadcast %cst_59 : f32 to vector<8x8xf32>
    %115 = arith.select %113, %114, %111 : vector<8x8xi1>, vector<8x8xf32>
    %cst_60 = arith.constant 0.353553385 : f32
    %116 = vector.broadcast %cst_60 : f32 to vector<8x8xf32>
    %117 = arith.mulf %115, %116 : vector<8x8xf32>
    %cst_61 = arith.constant dense<0xFF800000> : vector<8xf32>
    %118 = vector.multi_reduction <maximumf>, %117, %cst_61 [1] : vector<8x8xf32> to vector<8xf32>
    %119 = vector.shape_cast %118 : vector<8xf32> to vector<8x1xf32>
    %120 = vector.broadcast %119 : vector<8x1xf32> to vector<8x8xf32>
    %121 = arith.subf %117, %120 : vector<8x8xf32>
    %122 = math.exp %121 : vector<8x8xf32>
    %cst_62 = arith.constant dense<0.000000e+00> : vector<8xf32>
    %123 = vector.multi_reduction <add>, %122, %cst_62 [1] : vector<8x8xf32> to vector<8xf32>
    %124 = vector.shape_cast %123 : vector<8xf32> to vector<8x1xf32>
    %125 = tpu.reciprocal %124 {approx = true} : vector<8x1xf32> -> vector<8x1xf32>
    %126 = vector.broadcast %125 : vector<8x1xf32> to vector<8x8xf32>
    %127 = arith.mulf %122, %126 : vector<8x8xf32>
    %128 = vector.extract_strided_slice %68 {offsets = [0, 8], sizes = [8, 8], strides = [1, 1]} : vector<8x32xf32> to vector<8x8xf32>
    %cst_63 = arith.constant dense<0.000000e+00> : vector<8x8xf32>
    %129 = tpu.matmul %127, %128, %cst_63 {dimension_numbers = #tpu.dot_dimension_numbers<[1], [0], [0], [1], [0, 0, 1, 1], [], []>} : vector<8x8xf32>, vector<8x8xf32>, vector<8x8xf32> -> vector<8x8xf32>
    %130 = vector.extract_strided_slice %85 {offsets = [0, 16], sizes = [8, 8], strides = [1, 1]} : vector<8x32xf32> to vector<8x8xf32>
    %131 = vector.extract_strided_slice %87 {offsets = [0, 16], sizes = [8, 8], strides = [1, 1]} : vector<8x32xf32> to vector<8x8xf32>
    %cst_64 = arith.constant dense<0.000000e+00> : vector<8x8xf32>
    %132 = tpu.matmul %130, %131, %cst_64 {dimension_numbers = #tpu.dot_dimension_numbers<[1], [1], [0], [0], [0, 0, 1, 0], [], []>} : vector<8x8xf32>, vector<8x8xf32>, vector<8x8xf32> -> vector<8x8xf32>
    %cst_65 = arith.constant -1.000000e+09 : f32
    %133 = vector.shape_cast %79 : vector<1x8xi1> to vector<1x8xi1>
    %134 = vector.broadcast %133 : vector<1x8xi1> to vector<8x8xi1>
    %135 = vector.broadcast %cst_65 : f32 to vector<8x8xf32>
    %136 = arith.select %134, %135, %132 : vector<8x8xi1>, vector<8x8xf32>
    %cst_66 = arith.constant 0.353553385 : f32
    %137 = vector.broadcast %cst_66 : f32 to vector<8x8xf32>
    %138 = arith.mulf %136, %137 : vector<8x8xf32>
    %cst_67 = arith.constant dense<0xFF800000> : vector<8xf32>
    %139 = vector.multi_reduction <maximumf>, %138, %cst_67 [1] : vector<8x8xf32> to vector<8xf32>
    %140 = vector.shape_cast %139 : vector<8xf32> to vector<8x1xf32>
    %141 = vector.broadcast %140 : vector<8x1xf32> to vector<8x8xf32>
    %142 = arith.subf %138, %141 : vector<8x8xf32>
    %143 = math.exp %142 : vector<8x8xf32>
    %cst_68 = arith.constant dense<0.000000e+00> : vector<8xf32>
    %144 = vector.multi_reduction <add>, %143, %cst_68 [1] : vector<8x8xf32> to vector<8xf32>
    %145 = vector.shape_cast %144 : vector<8xf32> to vector<8x1xf32>
    %146 = tpu.reciprocal %145 {approx = true} : vector<8x1xf32> -> vector<8x1xf32>
    %147 = vector.broadcast %146 : vector<8x1xf32> to vector<8x8xf32>
    %148 = arith.mulf %143, %147 : vector<8x8xf32>
    %149 = vector.extract_strided_slice %68 {offsets = [0, 16], sizes = [8, 8], strides = [1, 1]} : vector<8x32xf32> to vector<8x8xf32>
    %cst_69 = arith.constant dense<0.000000e+00> : vector<8x8xf32>
    %150 = tpu.matmul %148, %149, %cst_69 {dimension_numbers = #tpu.dot_dimension_numbers<[1], [0], [0], [1], [0, 0, 1, 1], [], []>} : vector<8x8xf32>, vector<8x8xf32>, vector<8x8xf32> -> vector<8x8xf32>
    %151 = vector.extract_strided_slice %85 {offsets = [0, 24], sizes = [8, 8], strides = [1, 1]} : vector<8x32xf32> to vector<8x8xf32>
    %152 = vector.extract_strided_slice %87 {offsets = [0, 24], sizes = [8, 8], strides = [1, 1]} : vector<8x32xf32> to vector<8x8xf32>
    %cst_70 = arith.constant dense<0.000000e+00> : vector<8x8xf32>
    %153 = tpu.matmul %151, %152, %cst_70 {dimension_numbers = #tpu.dot_dimension_numbers<[1], [1], [0], [0], [0, 0, 1, 0], [], []>} : vector<8x8xf32>, vector<8x8xf32>, vector<8x8xf32> -> vector<8x8xf32>
    %cst_71 = arith.constant -1.000000e+09 : f32
    %154 = vector.shape_cast %79 : vector<1x8xi1> to vector<1x8xi1>
    %155 = vector.broadcast %154 : vector<1x8xi1> to vector<8x8xi1>
    %156 = vector.broadcast %cst_71 : f32 to vector<8x8xf32>
    %157 = arith.select %155, %156, %153 : vector<8x8xi1>, vector<8x8xf32>
    %cst_72 = arith.constant 0.353553385 : f32
    %158 = vector.broadcast %cst_72 : f32 to vector<8x8xf32>
    %159 = arith.mulf %157, %158 : vector<8x8xf32>
    %cst_73 = arith.constant dense<0xFF800000> : vector<8xf32>
    %160 = vector.multi_reduction <maximumf>, %159, %cst_73 [1] : vector<8x8xf32> to vector<8xf32>
    %161 = vector.shape_cast %160 : vector<8xf32> to vector<8x1xf32>
    %162 = vector.broadcast %161 : vector<8x1xf32> to vector<8x8xf32>
    %163 = arith.subf %159, %162 : vector<8x8xf32>
    %164 = math.exp %163 : vector<8x8xf32>
    %cst_74 = arith.constant dense<0.000000e+00> : vector<8xf32>
    %165 = vector.multi_reduction <add>, %164, %cst_74 [1] : vector<8x8xf32> to vector<8xf32>
    %166 = vector.shape_cast %165 : vector<8xf32> to vector<8x1xf32>
    %167 = tpu.reciprocal %166 {approx = true} : vector<8x1xf32> -> vector<8x1xf32>
    %168 = vector.broadcast %167 : vector<8x1xf32> to vector<8x8xf32>
    %169 = arith.mulf %164, %168 : vector<8x8xf32>
    %170 = vector.extract_strided_slice %68 {offsets = [0, 24], sizes = [8, 8], strides = [1, 1]} : vector<8x32xf32> to vector<8x8xf32>
    %cst_75 = arith.constant dense<0.000000e+00> : vector<8x8xf32>
    %171 = tpu.matmul %169, %170, %cst_75 {dimension_numbers = #tpu.dot_dimension_numbers<[1], [0], [0], [1], [0, 0, 1, 1], [], []>} : vector<8x8xf32>, vector<8x8xf32>, vector<8x8xf32> -> vector<8x8xf32>
    %172 = tpu.concatenate %108, %129, %150, %171 in 1 : vector<8x8xf32>, vector<8x8xf32>, vector<8x8xf32>, vector<8x8xf32> -> vector<8x32xf32>
    %173 = vector.broadcast %75 : vector<1x32xf32> to vector<8x32xf32>
    %174 = arith.mulf %70, %173 : vector<8x32xf32>
    %175 = vector.broadcast %75 : vector<1x32xf32> to vector<8x32xf32>
    %176 = arith.mulf %69, %175 : vector<8x32xf32>
    %177 = vector.extract_strided_slice %174 {offsets = [0, 0], sizes = [8, 8], strides = [1, 1]} : vector<8x32xf32> to vector<8x8xf32>
    %178 = vector.extract_strided_slice %176 {offsets = [0, 0], sizes = [8, 8], strides = [1, 1]} : vector<8x32xf32> to vector<8x8xf32>
    %cst_76 = arith.constant dense<0.000000e+00> : vector<8x8xf32>
    %179 = tpu.matmul %177, %178, %cst_76 {dimension_numbers = #tpu.dot_dimension_numbers<[1], [1], [0], [0], [0, 0, 1, 0], [], []>} : vector<8x8xf32>, vector<8x8xf32>, vector<8x8xf32> -> vector<8x8xf32>
    %cst_77 = arith.constant -1.000000e+09 : f32
    %180 = vector.shape_cast %83 : vector<1x8xi1> to vector<1x8xi1>
    %181 = vector.broadcast %180 : vector<1x8xi1> to vector<8x8xi1>
    %182 = vector.broadcast %cst_77 : f32 to vector<8x8xf32>
    %183 = arith.select %181, %182, %179 : vector<8x8xi1>, vector<8x8xf32>
    %cst_78 = arith.constant 0.353553385 : f32
    %184 = vector.broadcast %cst_78 : f32 to vector<8x8xf32>
    %185 = arith.mulf %183, %184 : vector<8x8xf32>
    %cst_79 = arith.constant dense<0xFF800000> : vector<8xf32>
    %186 = vector.multi_reduction <maximumf>, %185, %cst_79 [1] : vector<8x8xf32> to vector<8xf32>
    %187 = vector.shape_cast %186 : vector<8xf32> to vector<8x1xf32>
    %188 = vector.broadcast %187 : vector<8x1xf32> to vector<8x8xf32>
    %189 = arith.subf %185, %188 : vector<8x8xf32>
    %190 = math.exp %189 : vector<8x8xf32>
    %cst_80 = arith.constant dense<0.000000e+00> : vector<8xf32>
    %191 = vector.multi_reduction <add>, %190, %cst_80 [1] : vector<8x8xf32> to vector<8xf32>
    %192 = vector.shape_cast %191 : vector<8xf32> to vector<8x1xf32>
    %193 = tpu.reciprocal %192 {approx = true} : vector<8x1xf32> -> vector<8x1xf32>
    %194 = vector.broadcast %193 : vector<8x1xf32> to vector<8x8xf32>
    %195 = arith.mulf %190, %194 : vector<8x8xf32>
    %196 = vector.extract_strided_slice %71 {offsets = [0, 0], sizes = [8, 8], strides = [1, 1]} : vector<8x32xf32> to vector<8x8xf32>
    %cst_81 = arith.constant dense<0.000000e+00> : vector<8x8xf32>
    %197 = tpu.matmul %195, %196, %cst_81 {dimension_numbers = #tpu.dot_dimension_numbers<[1], [0], [0], [1], [0, 0, 1, 1], [], []>} : vector<8x8xf32>, vector<8x8xf32>, vector<8x8xf32> -> vector<8x8xf32>
    %198 = vector.extract_strided_slice %174 {offsets = [0, 8], sizes = [8, 8], strides = [1, 1]} : vector<8x32xf32> to vector<8x8xf32>
    %199 = vector.extract_strided_slice %176 {offsets = [0, 8], sizes = [8, 8], strides = [1, 1]} : vector<8x32xf32> to vector<8x8xf32>
    %cst_82 = arith.constant dense<0.000000e+00> : vector<8x8xf32>
    %200 = tpu.matmul %198, %199, %cst_82 {dimension_numbers = #tpu.dot_dimension_numbers<[1], [1], [0], [0], [0, 0, 1, 0], [], []>} : vector<8x8xf32>, vector<8x8xf32>, vector<8x8xf32> -> vector<8x8xf32>
    %cst_83 = arith.constant -1.000000e+09 : f32
    %201 = vector.shape_cast %83 : vector<1x8xi1> to vector<1x8xi1>
    %202 = vector.broadcast %201 : vector<1x8xi1> to vector<8x8xi1>
    %203 = vector.broadcast %cst_83 : f32 to vector<8x8xf32>
    %204 = arith.select %202, %203, %200 : vector<8x8xi1>, vector<8x8xf32>
    %cst_84 = arith.constant 0.353553385 : f32
    %205 = vector.broadcast %cst_84 : f32 to vector<8x8xf32>
    %206 = arith.mulf %204, %205 : vector<8x8xf32>
    %cst_85 = arith.constant dense<0xFF800000> : vector<8xf32>
    %207 = vector.multi_reduction <maximumf>, %206, %cst_85 [1] : vector<8x8xf32> to vector<8xf32>
    %208 = vector.shape_cast %207 : vector<8xf32> to vector<8x1xf32>
    %209 = vector.broadcast %208 : vector<8x1xf32> to vector<8x8xf32>
    %210 = arith.subf %206, %209 : vector<8x8xf32>
    %211 = math.exp %210 : vector<8x8xf32>
    %cst_86 = arith.constant dense<0.000000e+00> : vector<8xf32>
    %212 = vector.multi_reduction <add>, %211, %cst_86 [1] : vector<8x8xf32> to vector<8xf32>
    %213 = vector.shape_cast %212 : vector<8xf32> to vector<8x1xf32>
    %214 = tpu.reciprocal %213 {approx = true} : vector<8x1xf32> -> vector<8x1xf32>
    %215 = vector.broadcast %214 : vector<8x1xf32> to vector<8x8xf32>
    %216 = arith.mulf %211, %215 : vector<8x8xf32>
    %217 = vector.extract_strided_slice %71 {offsets = [0, 8], sizes = [8, 8], strides = [1, 1]} : vector<8x32xf32> to vector<8x8xf32>
    %cst_87 = arith.constant dense<0.000000e+00> : vector<8x8xf32>
    %218 = tpu.matmul %216, %217, %cst_87 {dimension_numbers = #tpu.dot_dimension_numbers<[1], [0], [0], [1], [0, 0, 1, 1], [], []>} : vector<8x8xf32>, vector<8x8xf32>, vector<8x8xf32> -> vector<8x8xf32>
    %219 = vector.extract_strided_slice %174 {offsets = [0, 16], sizes = [8, 8], strides = [1, 1]} : vector<8x32xf32> to vector<8x8xf32>
    %220 = vector.extract_strided_slice %176 {offsets = [0, 16], sizes = [8, 8], strides = [1, 1]} : vector<8x32xf32> to vector<8x8xf32>
    %cst_88 = arith.constant dense<0.000000e+00> : vector<8x8xf32>
    %221 = tpu.matmul %219, %220, %cst_88 {dimension_numbers = #tpu.dot_dimension_numbers<[1], [1], [0], [0], [0, 0, 1, 0], [], []>} : vector<8x8xf32>, vector<8x8xf32>, vector<8x8xf32> -> vector<8x8xf32>
    %cst_89 = arith.constant -1.000000e+09 : f32
    %222 = vector.shape_cast %83 : vector<1x8xi1> to vector<1x8xi1>
    %223 = vector.broadcast %222 : vector<1x8xi1> to vector<8x8xi1>
    %224 = vector.broadcast %cst_89 : f32 to vector<8x8xf32>
    %225 = arith.select %223, %224, %221 : vector<8x8xi1>, vector<8x8xf32>
    %cst_90 = arith.constant 0.353553385 : f32
    %226 = vector.broadcast %cst_90 : f32 to vector<8x8xf32>
    %227 = arith.mulf %225, %226 : vector<8x8xf32>
    %cst_91 = arith.constant dense<0xFF800000> : vector<8xf32>
    %228 = vector.multi_reduction <maximumf>, %227, %cst_91 [1] : vector<8x8xf32> to vector<8xf32>
    %229 = vector.shape_cast %228 : vector<8xf32> to vector<8x1xf32>
    %230 = vector.broadcast %229 : vector<8x1xf32> to vector<8x8xf32>
    %231 = arith.subf %227, %230 : vector<8x8xf32>
    %232 = math.exp %231 : vector<8x8xf32>
    %cst_92 = arith.constant dense<0.000000e+00> : vector<8xf32>
    %233 = vector.multi_reduction <add>, %232, %cst_92 [1] : vector<8x8xf32> to vector<8xf32>
    %234 = vector.shape_cast %233 : vector<8xf32> to vector<8x1xf32>
    %235 = tpu.reciprocal %234 {approx = true} : vector<8x1xf32> -> vector<8x1xf32>
    %236 = vector.broadcast %235 : vector<8x1xf32> to vector<8x8xf32>
    %237 = arith.mulf %232, %236 : vector<8x8xf32>
    %238 = vector.extract_strided_slice %71 {offsets = [0, 16], sizes = [8, 8], strides = [1, 1]} : vector<8x32xf32> to vector<8x8xf32>
    %cst_93 = arith.constant dense<0.000000e+00> : vector<8x8xf32>
    %239 = tpu.matmul %237, %238, %cst_93 {dimension_numbers = #tpu.dot_dimension_numbers<[1], [0], [0], [1], [0, 0, 1, 1], [], []>} : vector<8x8xf32>, vector<8x8xf32>, vector<8x8xf32> -> vector<8x8xf32>
    %240 = vector.extract_strided_slice %174 {offsets = [0, 24], sizes = [8, 8], strides = [1, 1]} : vector<8x32xf32> to vector<8x8xf32>
    %241 = vector.extract_strided_slice %176 {offsets = [0, 24], sizes = [8, 8], strides = [1, 1]} : vector<8x32xf32> to vector<8x8xf32>
    %cst_94 = arith.constant dense<0.000000e+00> : vector<8x8xf32>
    %242 = tpu.matmul %240, %241, %cst_94 {dimension_numbers = #tpu.dot_dimension_numbers<[1], [1], [0], [0], [0, 0, 1, 0], [], []>} : vector<8x8xf32>, vector<8x8xf32>, vector<8x8xf32> -> vector<8x8xf32>
    %cst_95 = arith.constant -1.000000e+09 : f32
    %243 = vector.shape_cast %83 : vector<1x8xi1> to vector<1x8xi1>
    %244 = vector.broadcast %243 : vector<1x8xi1> to vector<8x8xi1>
    %245 = vector.broadcast %cst_95 : f32 to vector<8x8xf32>
    %246 = arith.select %244, %245, %242 : vector<8x8xi1>, vector<8x8xf32>
    %cst_96 = arith.constant 0.353553385 : f32
    %247 = vector.broadcast %cst_96 : f32 to vector<8x8xf32>
    %248 = arith.mulf %246, %247 : vector<8x8xf32>
    %cst_97 = arith.constant dense<0xFF800000> : vector<8xf32>
    %249 = vector.multi_reduction <maximumf>, %248, %cst_97 [1] : vector<8x8xf32> to vector<8xf32>
    %250 = vector.shape_cast %249 : vector<8xf32> to vector<8x1xf32>
    %251 = vector.broadcast %250 : vector<8x1xf32> to vector<8x8xf32>
    %252 = arith.subf %248, %251 : vector<8x8xf32>
    %253 = math.exp %252 : vector<8x8xf32>
    %cst_98 = arith.constant dense<0.000000e+00> : vector<8xf32>
    %254 = vector.multi_reduction <add>, %253, %cst_98 [1] : vector<8x8xf32> to vector<8xf32>
    %255 = vector.shape_cast %254 : vector<8xf32> to vector<8x1xf32>
    %256 = tpu.reciprocal %255 {approx = true} : vector<8x1xf32> -> vector<8x1xf32>
    %257 = vector.broadcast %256 : vector<8x1xf32> to vector<8x8xf32>
    %258 = arith.mulf %253, %257 : vector<8x8xf32>
    %259 = vector.extract_strided_slice %71 {offsets = [0, 24], sizes = [8, 8], strides = [1, 1]} : vector<8x32xf32> to vector<8x8xf32>
    %cst_99 = arith.constant dense<0.000000e+00> : vector<8x8xf32>
    %260 = tpu.matmul %258, %259, %cst_99 {dimension_numbers = #tpu.dot_dimension_numbers<[1], [0], [0], [1], [0, 0, 1, 1], [], []>} : vector<8x8xf32>, vector<8x8xf32>, vector<8x8xf32> -> vector<8x8xf32>
    %261 = tpu.concatenate %197, %218, %239, %260 in 1 : vector<8x8xf32>, vector<8x8xf32>, vector<8x8xf32>, vector<8x8xf32> -> vector<8x32xf32>
    %262 = arith.addf %1, %172 : vector<8x32xf32>
    %c0_100 = arith.constant 0 : index
    %c0_101 = arith.constant 0 : index
    %263 = vector.load %arg15[%c0_100, %c0_101] : memref<32x32xf32, #tpu.memory_space<vmem>>, vector<32x32xf32>
    %cst_102 = arith.constant dense<0.000000e+00> : vector<8x32xf32>
    %264 = tpu.matmul %262, %263, %cst_102 {dimension_numbers = #tpu.dot_dimension_numbers<[1], [0], [0], [1], [0, 0, 1, 1], [], []>} : vector<8x32xf32>, vector<32x32xf32>, vector<8x32xf32> -> vector<8x32xf32>
    %c0_103 = arith.constant 0 : index
    %c0_104 = arith.constant 0 : index
    %265 = vector.load %arg16[%c0_103, %c0_104] : memref<1x32xf32, #tpu.memory_space<vmem>>, vector<1x32xf32>
    %266 = vector.broadcast %265 : vector<1x32xf32> to vector<8x32xf32>
    %267 = arith.addf %264, %266 : vector<8x32xf32>
    %c0_105 = arith.constant 0 : index
    %c0_106 = arith.constant 0 : index
    %c0_107 = arith.constant 0 : index
    %268 = vector.load %arg19[%c0_105, %c0_106, %c0_107] : memref<1x8x32xf32, #tpu.memory_space<vmem>>, vector<1x8x32xf32>
    %269 = vector.shape_cast %268 : vector<1x8x32xf32> to vector<8x32xf32>
    %270 = vector.shape_cast %267 : vector<8x32xf32> to vector<1x8x32xf32>
    tpu.vector_store %arg19[%c0_105, %c0_106, %c0_107], %270 {strides = array<i32>} : memref<1x8x32xf32, #tpu.memory_space<vmem>>, vector<1x8x32xf32>,
    %271 = arith.addf %3, %261 : vector<8x32xf32>
    %c0_108 = arith.constant 0 : index
    %c0_109 = arith.constant 0 : index
    %272 = vector.load %arg17[%c0_108, %c0_109] : memref<32x32xf32, #tpu.memory_space<vmem>>, vector<32x32xf32>
    %cst_110 = arith.constant dense<0.000000e+00> : vector<8x32xf32>
    %273 = tpu.matmul %271, %272, %cst_110 {dimension_numbers = #tpu.dot_dimension_numbers<[1], [0], [0], [1], [0, 0, 1, 1], [], []>} : vector<8x32xf32>, vector<32x32xf32>, vector<8x32xf32> -> vector<8x32xf32>
    %c0_111 = arith.constant 0 : index
    %c0_112 = arith.constant 0 : index
    %274 = vector.load %arg18[%c0_111, %c0_112] : memref<1x32xf32, #tpu.memory_space<vmem>>, vector<1x32xf32>
    %275 = vector.broadcast %274 : vector<1x32xf32> to vector<8x32xf32>
    %276 = arith.addf %273, %275 : vector<8x32xf32>
    %c0_113 = arith.constant 0 : index
    %c0_114 = arith.constant 0 : index
    %c0_115 = arith.constant 0 : index
    %277 = vector.load %arg20[%c0_113, %c0_114, %c0_115] : memref<1x8x32xf32, #tpu.memory_space<vmem>>, vector<1x8x32xf32>
    %278 = vector.shape_cast %277 : vector<1x8x32xf32> to vector<8x32xf32>
    %279 = vector.shape_cast %276 : vector<8x32xf32> to vector<1x8x32xf32>
    tpu.vector_store %arg20[%c0_113, %c0_114, %c0_115], %279 {strides = array<i32>} : memref<1x8x32xf32, #tpu.memory_space<vmem>>, vector<1x8x32xf32>,
    return
  }
  func.func @transform_0(%arg0: i32) -> (i32, i32, i32) {
    %c0_i32 = arith.constant 0 : i32
    %c0_i32_0 = arith.constant 0 : i32
    %c0_i32_1 = arith.constant 0 : i32
    return %arg0, %c0_i32, %c0_i32_0 : i32, i32, i32
  }
  func.func @transform_1(%arg0: i32) -> (i32, i32, i32) {
    %c0_i32 = arith.constant 0 : i32
    %c0_i32_0 = arith.constant 0 : i32
    %c0_i32_1 = arith.constant 0 : i32
    return %arg0, %c0_i32, %c0_i32_0 : i32, i32, i32
  }
  func.func @transform_2(%arg0: i32) -> (i32, i32, i32) {
    %c0_i32 = arith.constant 0 : i32
    %c0_i32_0 = arith.constant 0 : i32
    %c0_i32_1 = arith.constant 0 : i32
    return %arg0, %c0_i32, %c0_i32_0 : i32, i32, i32
  }
  func.func @transform_3(%arg0: i32) -> (i32, i32, i32) {
    %c0_i32 = arith.constant 0 : i32
    %c0_i32_0 = arith.constant 0 : i32
    %c0_i32_1 = arith.constant 0 : i32
    return %arg0, %c0_i32, %c0_i32_0 : i32, i32, i32
  }
  func.func @transform_4(%arg0: i32) -> (i32, i32, i32) {
    %c0_i32 = arith.constant 0 : i32
    %c0_i32_0 = arith.constant 0 : i32
    %c0_i32_1 = arith.constant 0 : i32
    return %arg0, %c0_i32, %c0_i32_0 : i32, i32, i32
  }
  func.func @transform_5(%arg0: i32) -> (i32, i32, i32) {
    %c0_i32 = arith.constant 0 : i32
    %c0_i32_0 = arith.constant 0 : i32
    %c0_i32_1 = arith.constant 0 : i32
    return %arg0, %c0_i32, %c0_i32_0 : i32, i32, i32
  }
  func.func @transform_6(%arg0: i32) -> (i32, i32) {
    %c0_i32 = arith.constant 0 : i32
    %c0_i32_0 = arith.constant 0 : i32
    %c0_i32_1 = arith.constant 0 : i32
    return %c0_i32, %c0_i32_0 : i32, i32
  }
  func.func @transform_7(%arg0: i32) -> (i32, i32) {
    %c0_i32 = arith.constant 0 : i32
    %c0_i32_0 = arith.constant 0 : i32
    %c0_i32_1 = arith.constant 0 : i32
    return %c0_i32, %c0_i32_0 : i32, i32
  }
  func.func @transform_8(%arg0: i32) -> (i32, i32) {
    %c0_i32 = arith.constant 0 : i32
    %c0_i32_0 = arith.constant 0 : i32
    %c0_i32_1 = arith.constant 0 : i32
    return %c0_i32, %c0_i32_0 : i32, i32
  }
  func.func @transform_9(%arg0: i32) -> (i32, i32) {
    %c0_i32 = arith.constant 0 : i32
    %c0_i32_0 = arith.constant 0 : i32
    %c0_i32_1 = arith.constant 0 : i32
    return %c0_i32, %c0_i32_0 : i32, i32
  }
  func.func @transform_10(%arg0: i32) -> (i32, i32) {
    %c0_i32 = arith.constant 0 : i32
    %c0_i32_0 = arith.constant 0 : i32
    %c0_i32_1 = arith.constant 0 : i32
    return %c0_i32, %c0_i32_0 : i32, i32
  }
  func.func @transform_11(%arg0: i32) -> (i32, i32) {
    %c0_i32 = arith.constant 0 : i32
    %c0_i32_0 = arith.constant 0 : i32
    %c0_i32_1 = arith.constant 0 : i32
    return %c0_i32, %c0_i32_0 : i32, i32
  }
  func.func @transform_12(%arg0: i32) -> (i32, i32) {
    %c0_i32 = arith.constant 0 : i32
    %c0_i32_0 = arith.constant 0 : i32
    %c0_i32_1 = arith.constant 0 : i32
    return %c0_i32, %c0_i32_0 : i32, i32
  }
  func.func @transform_13(%arg0: i32) -> (i32, i32) {
    %c0_i32 = arith.constant 0 : i32
    %c0_i32_0 = arith.constant 0 : i32
    %c0_i32_1 = arith.constant 0 : i32
    return %c0_i32, %c0_i32_0 : i32, i32
  }
  func.func @transform_14(%arg0: i32) -> (i32, i32) {
    %c0_i32 = arith.constant 0 : i32
    %c0_i32_0 = arith.constant 0 : i32
    %c0_i32_1 = arith.constant 0 : i32
    return %c0_i32, %c0_i32_0 : i32, i32
  }
  func.func @transform_15(%arg0: i32) -> (i32, i32) {
    %c0_i32 = arith.constant 0 : i32
    %c0_i32_0 = arith.constant 0 : i32
    %c0_i32_1 = arith.constant 0 : i32
    return %c0_i32, %c0_i32_0 : i32, i32
  }
  func.func @transform_16(%arg0: i32) -> (i32, i32) {
    %c0_i32 = arith.constant 0 : i32
    %c0_i32_0 = arith.constant 0 : i32
    %c0_i32_1 = arith.constant 0 : i32
    return %c0_i32, %c0_i32_0 : i32, i32
  }
  func.func @transform_17(%arg0: i32) -> (i32, i32) {
    %c0_i32 = arith.constant 0 : i32
    %c0_i32_0 = arith.constant 0 : i32
    %c0_i32_1 = arith.constant 0 : i32
    return %c0_i32, %c0_i32_0 : i32, i32
  }
  func.func @transform_18(%arg0: i32) -> (i32, i32, i32) {
    %c0_i32 = arith.constant 0 : i32
    %c0_i32_0 = arith.constant 0 : i32
    %c0_i32_1 = arith.constant 0 : i32
    return %arg0, %c0_i32, %c0_i32_0 : i32, i32, i32
  }
  func.func @transform_19(%arg0: i32) -> (i32, i32, i32) {
    %c0_i32 = arith.constant 0 : i32
    %c0_i32_0 = arith.constant 0 : i32
    %c0_i32_1 = arith.constant 0 : i32
    return %arg0, %c0_i32, %c0_i32_0 : i32, i32, i32
  }
}

module attributes {stable_mosaic.version = 11 : i64} {
  func.func @kernel(%arg0: i32, %arg1: memref<1x8x32xf32, #tpu.memory_space<vmem>>, %arg2: memref<1x8x32xf32, #tpu.memory_space<vmem>>, %arg3: memref<1x8x1xf32, #tpu.memory_space<vmem>>, %arg4: memref<1x1x8xf32, #tpu.memory_space<vmem>>, %arg5: memref<1x8x1xf32, #tpu.memory_space<vmem>>, %arg6: memref<1x1x8xf32, #tpu.memory_space<vmem>>, %arg7: memref<32x96xf32, #tpu.memory_space<vmem>>, %arg8: memref<1x96xf32, #tpu.memory_space<vmem>>, %arg9: memref<32x96xf32, #tpu.memory_space<vmem>>, %arg10: memref<1x96xf32, #tpu.memory_space<vmem>>, %arg11: memref<32x32xf32, #tpu.memory_space<vmem>>, %arg12: memref<32x32xf32, #tpu.memory_space<vmem>>, %arg13: memref<1x32xf32, #tpu.memory_space<vmem>>, %arg14: memref<32x32xf32, #tpu.memory_space<vmem>>, %arg15: memref<32x32xf32, #tpu.memory_space<vmem>>, %arg16: memref<1x32xf32, #tpu.memory_space<vmem>>, %arg17: memref<1x8x32xf32, #tpu.memory_space<vmem>>, %arg18: memref<1x8x32xf32, #tpu.memory_space<vmem>>) attributes {dimension_semantics = [#tpu.dimension_semantics<parallel>], iteration_bounds = array<i64: 2>, scalar_prefetch = 0 : i64, scratch_operands = 0 : i64, tpu.core_type = #tpu.core_type<tc>, window_params = [{transform_indices = @transform_0, window_bounds = array<i64: 1, 8, 32>}, {transform_indices = @transform_1, window_bounds = array<i64: 1, 8, 32>}, {transform_indices = @transform_2, window_bounds = array<i64: 1, 8, 1>}, {transform_indices = @transform_3, window_bounds = array<i64: 1, 1, 8>}, {transform_indices = @transform_4, window_bounds = array<i64: 1, 8, 1>}, {transform_indices = @transform_5, window_bounds = array<i64: 1, 1, 8>}, {pipeline_mode = #tpu.pipeline_mode<synchronous>, transform_indices = @transform_6, window_bounds = array<i64: 32, 96>}, {pipeline_mode = #tpu.pipeline_mode<synchronous>, transform_indices = @transform_7, window_bounds = array<i64: 1, 96>}, {pipeline_mode = #tpu.pipeline_mode<synchronous>, transform_indices = @transform_8, window_bounds = array<i64: 32, 96>}, {pipeline_mode = #tpu.pipeline_mode<synchronous>, transform_indices = @transform_9, window_bounds = array<i64: 1, 96>}, {pipeline_mode = #tpu.pipeline_mode<synchronous>, transform_indices = @transform_10, window_bounds = array<i64: 32, 32>}, {pipeline_mode = #tpu.pipeline_mode<synchronous>, transform_indices = @transform_11, window_bounds = array<i64: 32, 32>}, {pipeline_mode = #tpu.pipeline_mode<synchronous>, transform_indices = @transform_12, window_bounds = array<i64: 1, 32>}, {pipeline_mode = #tpu.pipeline_mode<synchronous>, transform_indices = @transform_13, window_bounds = array<i64: 32, 32>}, {pipeline_mode = #tpu.pipeline_mode<synchronous>, transform_indices = @transform_14, window_bounds = array<i64: 32, 32>}, {pipeline_mode = #tpu.pipeline_mode<synchronous>, transform_indices = @transform_15, window_bounds = array<i64: 1, 32>}, {transform_indices = @transform_16, window_bounds = array<i64: 1, 8, 32>}, {transform_indices = @transform_17, window_bounds = array<i64: 1, 8, 32>}]} {
    %c0 = arith.constant 0 : index
    %c0_0 = arith.constant 0 : index
    %c0_1 = arith.constant 0 : index
    %0 = vector.load %arg1[%c0, %c0_0, %c0_1] : memref<1x8x32xf32, #tpu.memory_space<vmem>>, vector<1x8x32xf32>
    %1 = vector.shape_cast %0 : vector<1x8x32xf32> to vector<8x32xf32>
    %c0_2 = arith.constant 0 : index
    %c0_3 = arith.constant 0 : index
    %c0_4 = arith.constant 0 : index
    %2 = vector.load %arg2[%c0_2, %c0_3, %c0_4] : memref<1x8x32xf32, #tpu.memory_space<vmem>>, vector<1x8x32xf32>
    %3 = vector.shape_cast %2 : vector<1x8x32xf32> to vector<8x32xf32>
    %cst = arith.constant 0.000000e+00 : f32
    %4 = vector.broadcast %cst : f32 to vector<8x32xf32>
    %5 = arith.maximumf %1, %4 : vector<8x32xf32>
    %c0_5 = arith.constant 0 : index
    %c0_6 = arith.constant 0 : index
    %6 = vector.load %arg7[%c0_5, %c0_6] : memref<32x96xf32, #tpu.memory_space<vmem>>, vector<32x96xf32>
    %cst_7 = arith.constant dense<0.000000e+00> : vector<8x96xf32>
    %7 = tpu.matmul %5, %6, %cst_7 {dimension_numbers = #tpu.dot_dimension_numbers<[1], [0], [0], [1], [0, 0, 1, 1], [], []>} : vector<8x32xf32>, vector<32x96xf32>, vector<8x96xf32> -> vector<8x96xf32>
    %c0_8 = arith.constant 0 : index
    %c0_9 = arith.constant 0 : index
    %8 = vector.load %arg8[%c0_8, %c0_9] : memref<1x96xf32, #tpu.memory_space<vmem>>, vector<1x96xf32>
    %9 = vector.broadcast %8 : vector<1x96xf32> to vector<8x96xf32>
    %10 = arith.addf %7, %9 : vector<8x96xf32>
    %c0_10 = arith.constant 0 : index
    %c0_11 = arith.constant 0 : index
    %c0_12 = arith.constant 0 : index
    %11 = vector.load %arg3[%c0_10, %c0_11, %c0_12] : memref<1x8x1xf32, #tpu.memory_space<vmem>>, vector<1x8x1xf32>
    %12 = vector.shape_cast %11 : vector<1x8x1xf32> to vector<8x1xf32>
    %13 = vector.broadcast %12 : vector<8x1xf32> to vector<8x96xf32>
    %14 = arith.mulf %10, %13 : vector<8x96xf32>
    %cst_13 = arith.constant 0.000000e+00 : f32
    %15 = vector.broadcast %cst_13 : f32 to vector<8x32xf32>
    %16 = arith.maximumf %3, %15 : vector<8x32xf32>
    %c0_14 = arith.constant 0 : index
    %c0_15 = arith.constant 0 : index
    %17 = vector.load %arg9[%c0_14, %c0_15] : memref<32x96xf32, #tpu.memory_space<vmem>>, vector<32x96xf32>
    %cst_16 = arith.constant dense<0.000000e+00> : vector<8x96xf32>
    %18 = tpu.matmul %16, %17, %cst_16 {dimension_numbers = #tpu.dot_dimension_numbers<[1], [0], [0], [1], [0, 0, 1, 1], [], []>} : vector<8x32xf32>, vector<32x96xf32>, vector<8x96xf32> -> vector<8x96xf32>
    %c0_17 = arith.constant 0 : index
    %c0_18 = arith.constant 0 : index
    %19 = vector.load %arg10[%c0_17, %c0_18] : memref<1x96xf32, #tpu.memory_space<vmem>>, vector<1x96xf32>
    %20 = vector.broadcast %19 : vector<1x96xf32> to vector<8x96xf32>
    %21 = arith.addf %18, %20 : vector<8x96xf32>
    %c0_19 = arith.constant 0 : index
    %c0_20 = arith.constant 0 : index
    %c0_21 = arith.constant 0 : index
    %22 = vector.load %arg5[%c0_19, %c0_20, %c0_21] : memref<1x8x1xf32, #tpu.memory_space<vmem>>, vector<1x8x1xf32>
    %23 = vector.shape_cast %22 : vector<1x8x1xf32> to vector<8x1xf32>
    %24 = vector.broadcast %23 : vector<8x1xf32> to vector<8x96xf32>
    %25 = arith.mulf %21, %24 : vector<8x96xf32>
    %26 = vector.extract_strided_slice %14 {offsets = [0, 0], sizes = [8, 32], strides = [1, 1]} : vector<8x96xf32> to vector<8x32xf32>
    %27 = vector.extract_strided_slice %14 {offsets = [0, 32], sizes = [8, 32], strides = [1, 1]} : vector<8x96xf32> to vector<8x32xf32>
    %28 = vector.extract_strided_slice %14 {offsets = [0, 64], sizes = [8, 32], strides = [1, 1]} : vector<8x96xf32> to vector<8x32xf32>
    %29 = vector.extract_strided_slice %25 {offsets = [0, 0], sizes = [8, 32], strides = [1, 1]} : vector<8x96xf32> to vector<8x32xf32>
    %30 = vector.extract_strided_slice %25 {offsets = [0, 32], sizes = [8, 32], strides = [1, 1]} : vector<8x96xf32> to vector<8x32xf32>
    %31 = vector.extract_strided_slice %25 {offsets = [0, 64], sizes = [8, 32], strides = [1, 1]} : vector<8x96xf32> to vector<8x32xf32>
    %c0_22 = arith.constant 0 : index
    %c0_23 = arith.constant 0 : index
    %c0_24 = arith.constant 0 : index
    %32 = vector.load %arg4[%c0_22, %c0_23, %c0_24] : memref<1x1x8xf32, #tpu.memory_space<vmem>>, vector<1x1x8xf32>
    %33 = vector.shape_cast %32 : vector<1x1x8xf32> to vector<1x8xf32>
    %cst_25 = arith.constant 0.000000e+00 : f32
    %34 = vector.broadcast %cst_25 : f32 to vector<1x8xf32>
    %35 = arith.cmpf oeq, %33, %34 : vector<1x8xf32>
    %c0_26 = arith.constant 0 : index
    %c0_27 = arith.constant 0 : index
    %c0_28 = arith.constant 0 : index
    %36 = vector.load %arg6[%c0_26, %c0_27, %c0_28] : memref<1x1x8xf32, #tpu.memory_space<vmem>>, vector<1x1x8xf32>
    %37 = vector.shape_cast %36 : vector<1x1x8xf32> to vector<1x8xf32>
    %cst_29 = arith.constant 0.000000e+00 : f32
    %38 = vector.broadcast %cst_29 : f32 to vector<1x8xf32>
    %39 = arith.cmpf oeq, %37, %38 : vector<1x8xf32>
    %40 = vector.extract_strided_slice %27 {offsets = [0, 0], sizes = [8, 8], strides = [1, 1]} : vector<8x32xf32> to vector<8x8xf32>
    %41 = vector.extract_strided_slice %29 {offsets = [0, 0], sizes = [8, 8], strides = [1, 1]} : vector<8x32xf32> to vector<8x8xf32>
    %cst_30 = arith.constant dense<0.000000e+00> : vector<8x8xf32>
    %42 = tpu.matmul %40, %41, %cst_30 {dimension_numbers = #tpu.dot_dimension_numbers<[1], [1], [0], [0], [0, 0, 1, 0], [], []>} : vector<8x8xf32>, vector<8x8xf32>, vector<8x8xf32> -> vector<8x8xf32>
    %cst_31 = arith.constant -1.000000e+09 : f32
    %43 = vector.shape_cast %39 : vector<1x8xi1> to vector<1x8xi1>
    %44 = vector.broadcast %43 : vector<1x8xi1> to vector<8x8xi1>
    %45 = vector.broadcast %cst_31 : f32 to vector<8x8xf32>
    %46 = arith.select %44, %45, %42 : vector<8x8xi1>, vector<8x8xf32>
    %cst_32 = arith.constant 0.353553385 : f32
    %47 = vector.broadcast %cst_32 : f32 to vector<8x8xf32>
    %48 = arith.mulf %46, %47 : vector<8x8xf32>
    %cst_33 = arith.constant dense<0xFF800000> : vector<8xf32>
    %49 = vector.multi_reduction <maximumf>, %48, %cst_33 [1] : vector<8x8xf32> to vector<8xf32>
    %50 = vector.shape_cast %49 : vector<8xf32> to vector<8x1xf32>
    %51 = vector.broadcast %50 : vector<8x1xf32> to vector<8x8xf32>
    %52 = arith.subf %48, %51 : vector<8x8xf32>
    %53 = math.exp %52 : vector<8x8xf32>
    %cst_34 = arith.constant dense<0.000000e+00> : vector<8xf32>
    %54 = vector.multi_reduction <add>, %53, %cst_34 [1] : vector<8x8xf32> to vector<8xf32>
    %55 = vector.shape_cast %54 : vector<8xf32> to vector<8x1xf32>
    %56 = tpu.reciprocal %55 {approx = true} : vector<8x1xf32> -> vector<8x1xf32>
    %57 = vector.broadcast %56 : vector<8x1xf32> to vector<8x8xf32>
    %58 = arith.mulf %53, %57 : vector<8x8xf32>
    %59 = vector.extract_strided_slice %31 {offsets = [0, 0], sizes = [8, 8], strides = [1, 1]} : vector<8x32xf32> to vector<8x8xf32>
    %cst_35 = arith.constant dense<0.000000e+00> : vector<8x8xf32>
    %60 = tpu.matmul %58, %59, %cst_35 {dimension_numbers = #tpu.dot_dimension_numbers<[1], [0], [0], [1], [0, 0, 1, 1], [], []>} : vector<8x8xf32>, vector<8x8xf32>, vector<8x8xf32> -> vector<8x8xf32>
    %61 = vector.extract_strided_slice %27 {offsets = [0, 8], sizes = [8, 8], strides = [1, 1]} : vector<8x32xf32> to vector<8x8xf32>
    %62 = vector.extract_strided_slice %29 {offsets = [0, 8], sizes = [8, 8], strides = [1, 1]} : vector<8x32xf32> to vector<8x8xf32>
    %cst_36 = arith.constant dense<0.000000e+00> : vector<8x8xf32>
    %63 = tpu.matmul %61, %62, %cst_36 {dimension_numbers = #tpu.dot_dimension_numbers<[1], [1], [0], [0], [0, 0, 1, 0], [], []>} : vector<8x8xf32>, vector<8x8xf32>, vector<8x8xf32> -> vector<8x8xf32>
    %cst_37 = arith.constant -1.000000e+09 : f32
    %64 = vector.shape_cast %39 : vector<1x8xi1> to vector<1x8xi1>
    %65 = vector.broadcast %64 : vector<1x8xi1> to vector<8x8xi1>
    %66 = vector.broadcast %cst_37 : f32 to vector<8x8xf32>
    %67 = arith.select %65, %66, %63 : vector<8x8xi1>, vector<8x8xf32>
    %cst_38 = arith.constant 0.353553385 : f32
    %68 = vector.broadcast %cst_38 : f32 to vector<8x8xf32>
    %69 = arith.mulf %67, %68 : vector<8x8xf32>
    %cst_39 = arith.constant dense<0xFF800000> : vector<8xf32>
    %70 = vector.multi_reduction <maximumf>, %69, %cst_39 [1] : vector<8x8xf32> to vector<8xf32>
    %71 = vector.shape_cast %70 : vector<8xf32> to vector<8x1xf32>
    %72 = vector.broadcast %71 : vector<8x1xf32> to vector<8x8xf32>
    %73 = arith.subf %69, %72 : vector<8x8xf32>
    %74 = math.exp %73 : vector<8x8xf32>
    %cst_40 = arith.constant dense<0.000000e+00> : vector<8xf32>
    %75 = vector.multi_reduction <add>, %74, %cst_40 [1] : vector<8x8xf32> to vector<8xf32>
    %76 = vector.shape_cast %75 : vector<8xf32> to vector<8x1xf32>
    %77 = tpu.reciprocal %76 {approx = true} : vector<8x1xf32> -> vector<8x1xf32>
    %78 = vector.broadcast %77 : vector<8x1xf32> to vector<8x8xf32>
    %79 = arith.mulf %74, %78 : vector<8x8xf32>
    %80 = vector.extract_strided_slice %31 {offsets = [0, 8], sizes = [8, 8], strides = [1, 1]} : vector<8x32xf32> to vector<8x8xf32>
    %cst_41 = arith.constant dense<0.000000e+00> : vector<8x8xf32>
    %81 = tpu.matmul %79, %80, %cst_41 {dimension_numbers = #tpu.dot_dimension_numbers<[1], [0], [0], [1], [0, 0, 1, 1], [], []>} : vector<8x8xf32>, vector<8x8xf32>, vector<8x8xf32> -> vector<8x8xf32>
    %82 = vector.extract_strided_slice %27 {offsets = [0, 16], sizes = [8, 8], strides = [1, 1]} : vector<8x32xf32> to vector<8x8xf32>
    %83 = vector.extract_strided_slice %29 {offsets = [0, 16], sizes = [8, 8], strides = [1, 1]} : vector<8x32xf32> to vector<8x8xf32>
    %cst_42 = arith.constant dense<0.000000e+00> : vector<8x8xf32>
    %84 = tpu.matmul %82, %83, %cst_42 {dimension_numbers = #tpu.dot_dimension_numbers<[1], [1], [0], [0], [0, 0, 1, 0], [], []>} : vector<8x8xf32>, vector<8x8xf32>, vector<8x8xf32> -> vector<8x8xf32>
    %cst_43 = arith.constant -1.000000e+09 : f32
    %85 = vector.shape_cast %39 : vector<1x8xi1> to vector<1x8xi1>
    %86 = vector.broadcast %85 : vector<1x8xi1> to vector<8x8xi1>
    %87 = vector.broadcast %cst_43 : f32 to vector<8x8xf32>
    %88 = arith.select %86, %87, %84 : vector<8x8xi1>, vector<8x8xf32>
    %cst_44 = arith.constant 0.353553385 : f32
    %89 = vector.broadcast %cst_44 : f32 to vector<8x8xf32>
    %90 = arith.mulf %88, %89 : vector<8x8xf32>
    %cst_45 = arith.constant dense<0xFF800000> : vector<8xf32>
    %91 = vector.multi_reduction <maximumf>, %90, %cst_45 [1] : vector<8x8xf32> to vector<8xf32>
    %92 = vector.shape_cast %91 : vector<8xf32> to vector<8x1xf32>
    %93 = vector.broadcast %92 : vector<8x1xf32> to vector<8x8xf32>
    %94 = arith.subf %90, %93 : vector<8x8xf32>
    %95 = math.exp %94 : vector<8x8xf32>
    %cst_46 = arith.constant dense<0.000000e+00> : vector<8xf32>
    %96 = vector.multi_reduction <add>, %95, %cst_46 [1] : vector<8x8xf32> to vector<8xf32>
    %97 = vector.shape_cast %96 : vector<8xf32> to vector<8x1xf32>
    %98 = tpu.reciprocal %97 {approx = true} : vector<8x1xf32> -> vector<8x1xf32>
    %99 = vector.broadcast %98 : vector<8x1xf32> to vector<8x8xf32>
    %100 = arith.mulf %95, %99 : vector<8x8xf32>
    %101 = vector.extract_strided_slice %31 {offsets = [0, 16], sizes = [8, 8], strides = [1, 1]} : vector<8x32xf32> to vector<8x8xf32>
    %cst_47 = arith.constant dense<0.000000e+00> : vector<8x8xf32>
    %102 = tpu.matmul %100, %101, %cst_47 {dimension_numbers = #tpu.dot_dimension_numbers<[1], [0], [0], [1], [0, 0, 1, 1], [], []>} : vector<8x8xf32>, vector<8x8xf32>, vector<8x8xf32> -> vector<8x8xf32>
    %103 = vector.extract_strided_slice %27 {offsets = [0, 24], sizes = [8, 8], strides = [1, 1]} : vector<8x32xf32> to vector<8x8xf32>
    %104 = vector.extract_strided_slice %29 {offsets = [0, 24], sizes = [8, 8], strides = [1, 1]} : vector<8x32xf32> to vector<8x8xf32>
    %cst_48 = arith.constant dense<0.000000e+00> : vector<8x8xf32>
    %105 = tpu.matmul %103, %104, %cst_48 {dimension_numbers = #tpu.dot_dimension_numbers<[1], [1], [0], [0], [0, 0, 1, 0], [], []>} : vector<8x8xf32>, vector<8x8xf32>, vector<8x8xf32> -> vector<8x8xf32>
    %cst_49 = arith.constant -1.000000e+09 : f32
    %106 = vector.shape_cast %39 : vector<1x8xi1> to vector<1x8xi1>
    %107 = vector.broadcast %106 : vector<1x8xi1> to vector<8x8xi1>
    %108 = vector.broadcast %cst_49 : f32 to vector<8x8xf32>
    %109 = arith.select %107, %108, %105 : vector<8x8xi1>, vector<8x8xf32>
    %cst_50 = arith.constant 0.353553385 : f32
    %110 = vector.broadcast %cst_50 : f32 to vector<8x8xf32>
    %111 = arith.mulf %109, %110 : vector<8x8xf32>
    %cst_51 = arith.constant dense<0xFF800000> : vector<8xf32>
    %112 = vector.multi_reduction <maximumf>, %111, %cst_51 [1] : vector<8x8xf32> to vector<8xf32>
    %113 = vector.shape_cast %112 : vector<8xf32> to vector<8x1xf32>
    %114 = vector.broadcast %113 : vector<8x1xf32> to vector<8x8xf32>
    %115 = arith.subf %111, %114 : vector<8x8xf32>
    %116 = math.exp %115 : vector<8x8xf32>
    %cst_52 = arith.constant dense<0.000000e+00> : vector<8xf32>
    %117 = vector.multi_reduction <add>, %116, %cst_52 [1] : vector<8x8xf32> to vector<8xf32>
    %118 = vector.shape_cast %117 : vector<8xf32> to vector<8x1xf32>
    %119 = tpu.reciprocal %118 {approx = true} : vector<8x1xf32> -> vector<8x1xf32>
    %120 = vector.broadcast %119 : vector<8x1xf32> to vector<8x8xf32>
    %121 = arith.mulf %116, %120 : vector<8x8xf32>
    %122 = vector.extract_strided_slice %31 {offsets = [0, 24], sizes = [8, 8], strides = [1, 1]} : vector<8x32xf32> to vector<8x8xf32>
    %cst_53 = arith.constant dense<0.000000e+00> : vector<8x8xf32>
    %123 = tpu.matmul %121, %122, %cst_53 {dimension_numbers = #tpu.dot_dimension_numbers<[1], [0], [0], [1], [0, 0, 1, 1], [], []>} : vector<8x8xf32>, vector<8x8xf32>, vector<8x8xf32> -> vector<8x8xf32>
    %124 = tpu.concatenate %60, %81, %102, %123 in 1 : vector<8x8xf32>, vector<8x8xf32>, vector<8x8xf32>, vector<8x8xf32> -> vector<8x32xf32>
    %125 = vector.extract_strided_slice %30 {offsets = [0, 0], sizes = [8, 8], strides = [1, 1]} : vector<8x32xf32> to vector<8x8xf32>
    %126 = vector.extract_strided_slice %26 {offsets = [0, 0], sizes = [8, 8], strides = [1, 1]} : vector<8x32xf32> to vector<8x8xf32>
    %cst_54 = arith.constant dense<0.000000e+00> : vector<8x8xf32>
    %127 = tpu.matmul %125, %126, %cst_54 {dimension_numbers = #tpu.dot_dimension_numbers<[1], [1], [0], [0], [0, 0, 1, 0], [], []>} : vector<8x8xf32>, vector<8x8xf32>, vector<8x8xf32> -> vector<8x8xf32>
    %cst_55 = arith.constant -1.000000e+09 : f32
    %128 = vector.shape_cast %35 : vector<1x8xi1> to vector<1x8xi1>
    %129 = vector.broadcast %128 : vector<1x8xi1> to vector<8x8xi1>
    %130 = vector.broadcast %cst_55 : f32 to vector<8x8xf32>
    %131 = arith.select %129, %130, %127 : vector<8x8xi1>, vector<8x8xf32>
    %cst_56 = arith.constant 0.353553385 : f32
    %132 = vector.broadcast %cst_56 : f32 to vector<8x8xf32>
    %133 = arith.mulf %131, %132 : vector<8x8xf32>
    %cst_57 = arith.constant dense<0xFF800000> : vector<8xf32>
    %134 = vector.multi_reduction <maximumf>, %133, %cst_57 [1] : vector<8x8xf32> to vector<8xf32>
    %135 = vector.shape_cast %134 : vector<8xf32> to vector<8x1xf32>
    %136 = vector.broadcast %135 : vector<8x1xf32> to vector<8x8xf32>
    %137 = arith.subf %133, %136 : vector<8x8xf32>
    %138 = math.exp %137 : vector<8x8xf32>
    %cst_58 = arith.constant dense<0.000000e+00> : vector<8xf32>
    %139 = vector.multi_reduction <add>, %138, %cst_58 [1] : vector<8x8xf32> to vector<8xf32>
    %140 = vector.shape_cast %139 : vector<8xf32> to vector<8x1xf32>
    %141 = tpu.reciprocal %140 {approx = true} : vector<8x1xf32> -> vector<8x1xf32>
    %142 = vector.broadcast %141 : vector<8x1xf32> to vector<8x8xf32>
    %143 = arith.mulf %138, %142 : vector<8x8xf32>
    %144 = vector.extract_strided_slice %28 {offsets = [0, 0], sizes = [8, 8], strides = [1, 1]} : vector<8x32xf32> to vector<8x8xf32>
    %cst_59 = arith.constant dense<0.000000e+00> : vector<8x8xf32>
    %145 = tpu.matmul %143, %144, %cst_59 {dimension_numbers = #tpu.dot_dimension_numbers<[1], [0], [0], [1], [0, 0, 1, 1], [], []>} : vector<8x8xf32>, vector<8x8xf32>, vector<8x8xf32> -> vector<8x8xf32>
    %146 = vector.extract_strided_slice %30 {offsets = [0, 8], sizes = [8, 8], strides = [1, 1]} : vector<8x32xf32> to vector<8x8xf32>
    %147 = vector.extract_strided_slice %26 {offsets = [0, 8], sizes = [8, 8], strides = [1, 1]} : vector<8x32xf32> to vector<8x8xf32>
    %cst_60 = arith.constant dense<0.000000e+00> : vector<8x8xf32>
    %148 = tpu.matmul %146, %147, %cst_60 {dimension_numbers = #tpu.dot_dimension_numbers<[1], [1], [0], [0], [0, 0, 1, 0], [], []>} : vector<8x8xf32>, vector<8x8xf32>, vector<8x8xf32> -> vector<8x8xf32>
    %cst_61 = arith.constant -1.000000e+09 : f32
    %149 = vector.shape_cast %35 : vector<1x8xi1> to vector<1x8xi1>
    %150 = vector.broadcast %149 : vector<1x8xi1> to vector<8x8xi1>
    %151 = vector.broadcast %cst_61 : f32 to vector<8x8xf32>
    %152 = arith.select %150, %151, %148 : vector<8x8xi1>, vector<8x8xf32>
    %cst_62 = arith.constant 0.353553385 : f32
    %153 = vector.broadcast %cst_62 : f32 to vector<8x8xf32>
    %154 = arith.mulf %152, %153 : vector<8x8xf32>
    %cst_63 = arith.constant dense<0xFF800000> : vector<8xf32>
    %155 = vector.multi_reduction <maximumf>, %154, %cst_63 [1] : vector<8x8xf32> to vector<8xf32>
    %156 = vector.shape_cast %155 : vector<8xf32> to vector<8x1xf32>
    %157 = vector.broadcast %156 : vector<8x1xf32> to vector<8x8xf32>
    %158 = arith.subf %154, %157 : vector<8x8xf32>
    %159 = math.exp %158 : vector<8x8xf32>
    %cst_64 = arith.constant dense<0.000000e+00> : vector<8xf32>
    %160 = vector.multi_reduction <add>, %159, %cst_64 [1] : vector<8x8xf32> to vector<8xf32>
    %161 = vector.shape_cast %160 : vector<8xf32> to vector<8x1xf32>
    %162 = tpu.reciprocal %161 {approx = true} : vector<8x1xf32> -> vector<8x1xf32>
    %163 = vector.broadcast %162 : vector<8x1xf32> to vector<8x8xf32>
    %164 = arith.mulf %159, %163 : vector<8x8xf32>
    %165 = vector.extract_strided_slice %28 {offsets = [0, 8], sizes = [8, 8], strides = [1, 1]} : vector<8x32xf32> to vector<8x8xf32>
    %cst_65 = arith.constant dense<0.000000e+00> : vector<8x8xf32>
    %166 = tpu.matmul %164, %165, %cst_65 {dimension_numbers = #tpu.dot_dimension_numbers<[1], [0], [0], [1], [0, 0, 1, 1], [], []>} : vector<8x8xf32>, vector<8x8xf32>, vector<8x8xf32> -> vector<8x8xf32>
    %167 = vector.extract_strided_slice %30 {offsets = [0, 16], sizes = [8, 8], strides = [1, 1]} : vector<8x32xf32> to vector<8x8xf32>
    %168 = vector.extract_strided_slice %26 {offsets = [0, 16], sizes = [8, 8], strides = [1, 1]} : vector<8x32xf32> to vector<8x8xf32>
    %cst_66 = arith.constant dense<0.000000e+00> : vector<8x8xf32>
    %169 = tpu.matmul %167, %168, %cst_66 {dimension_numbers = #tpu.dot_dimension_numbers<[1], [1], [0], [0], [0, 0, 1, 0], [], []>} : vector<8x8xf32>, vector<8x8xf32>, vector<8x8xf32> -> vector<8x8xf32>
    %cst_67 = arith.constant -1.000000e+09 : f32
    %170 = vector.shape_cast %35 : vector<1x8xi1> to vector<1x8xi1>
    %171 = vector.broadcast %170 : vector<1x8xi1> to vector<8x8xi1>
    %172 = vector.broadcast %cst_67 : f32 to vector<8x8xf32>
    %173 = arith.select %171, %172, %169 : vector<8x8xi1>, vector<8x8xf32>
    %cst_68 = arith.constant 0.353553385 : f32
    %174 = vector.broadcast %cst_68 : f32 to vector<8x8xf32>
    %175 = arith.mulf %173, %174 : vector<8x8xf32>
    %cst_69 = arith.constant dense<0xFF800000> : vector<8xf32>
    %176 = vector.multi_reduction <maximumf>, %175, %cst_69 [1] : vector<8x8xf32> to vector<8xf32>
    %177 = vector.shape_cast %176 : vector<8xf32> to vector<8x1xf32>
    %178 = vector.broadcast %177 : vector<8x1xf32> to vector<8x8xf32>
    %179 = arith.subf %175, %178 : vector<8x8xf32>
    %180 = math.exp %179 : vector<8x8xf32>
    %cst_70 = arith.constant dense<0.000000e+00> : vector<8xf32>
    %181 = vector.multi_reduction <add>, %180, %cst_70 [1] : vector<8x8xf32> to vector<8xf32>
    %182 = vector.shape_cast %181 : vector<8xf32> to vector<8x1xf32>
    %183 = tpu.reciprocal %182 {approx = true} : vector<8x1xf32> -> vector<8x1xf32>
    %184 = vector.broadcast %183 : vector<8x1xf32> to vector<8x8xf32>
    %185 = arith.mulf %180, %184 : vector<8x8xf32>
    %186 = vector.extract_strided_slice %28 {offsets = [0, 16], sizes = [8, 8], strides = [1, 1]} : vector<8x32xf32> to vector<8x8xf32>
    %cst_71 = arith.constant dense<0.000000e+00> : vector<8x8xf32>
    %187 = tpu.matmul %185, %186, %cst_71 {dimension_numbers = #tpu.dot_dimension_numbers<[1], [0], [0], [1], [0, 0, 1, 1], [], []>} : vector<8x8xf32>, vector<8x8xf32>, vector<8x8xf32> -> vector<8x8xf32>
    %188 = vector.extract_strided_slice %30 {offsets = [0, 24], sizes = [8, 8], strides = [1, 1]} : vector<8x32xf32> to vector<8x8xf32>
    %189 = vector.extract_strided_slice %26 {offsets = [0, 24], sizes = [8, 8], strides = [1, 1]} : vector<8x32xf32> to vector<8x8xf32>
    %cst_72 = arith.constant dense<0.000000e+00> : vector<8x8xf32>
    %190 = tpu.matmul %188, %189, %cst_72 {dimension_numbers = #tpu.dot_dimension_numbers<[1], [1], [0], [0], [0, 0, 1, 0], [], []>} : vector<8x8xf32>, vector<8x8xf32>, vector<8x8xf32> -> vector<8x8xf32>
    %cst_73 = arith.constant -1.000000e+09 : f32
    %191 = vector.shape_cast %35 : vector<1x8xi1> to vector<1x8xi1>
    %192 = vector.broadcast %191 : vector<1x8xi1> to vector<8x8xi1>
    %193 = vector.broadcast %cst_73 : f32 to vector<8x8xf32>
    %194 = arith.select %192, %193, %190 : vector<8x8xi1>, vector<8x8xf32>
    %cst_74 = arith.constant 0.353553385 : f32
    %195 = vector.broadcast %cst_74 : f32 to vector<8x8xf32>
    %196 = arith.mulf %194, %195 : vector<8x8xf32>
    %cst_75 = arith.constant dense<0xFF800000> : vector<8xf32>
    %197 = vector.multi_reduction <maximumf>, %196, %cst_75 [1] : vector<8x8xf32> to vector<8xf32>
    %198 = vector.shape_cast %197 : vector<8xf32> to vector<8x1xf32>
    %199 = vector.broadcast %198 : vector<8x1xf32> to vector<8x8xf32>
    %200 = arith.subf %196, %199 : vector<8x8xf32>
    %201 = math.exp %200 : vector<8x8xf32>
    %cst_76 = arith.constant dense<0.000000e+00> : vector<8xf32>
    %202 = vector.multi_reduction <add>, %201, %cst_76 [1] : vector<8x8xf32> to vector<8xf32>
    %203 = vector.shape_cast %202 : vector<8xf32> to vector<8x1xf32>
    %204 = tpu.reciprocal %203 {approx = true} : vector<8x1xf32> -> vector<8x1xf32>
    %205 = vector.broadcast %204 : vector<8x1xf32> to vector<8x8xf32>
    %206 = arith.mulf %201, %205 : vector<8x8xf32>
    %207 = vector.extract_strided_slice %28 {offsets = [0, 24], sizes = [8, 8], strides = [1, 1]} : vector<8x32xf32> to vector<8x8xf32>
    %cst_77 = arith.constant dense<0.000000e+00> : vector<8x8xf32>
    %208 = tpu.matmul %206, %207, %cst_77 {dimension_numbers = #tpu.dot_dimension_numbers<[1], [0], [0], [1], [0, 0, 1, 1], [], []>} : vector<8x8xf32>, vector<8x8xf32>, vector<8x8xf32> -> vector<8x8xf32>
    %209 = tpu.concatenate %145, %166, %187, %208 in 1 : vector<8x8xf32>, vector<8x8xf32>, vector<8x8xf32>, vector<8x8xf32> -> vector<8x32xf32>
    %c0_78 = arith.constant 0 : index
    %c0_79 = arith.constant 0 : index
    %210 = vector.load %arg11[%c0_78, %c0_79] : memref<32x32xf32, #tpu.memory_space<vmem>>, vector<32x32xf32>
    %cst_80 = arith.constant dense<0.000000e+00> : vector<8x32xf32>
    %211 = tpu.matmul %1, %210, %cst_80 {dimension_numbers = #tpu.dot_dimension_numbers<[1], [0], [0], [1], [0, 0, 1, 1], [], []>} : vector<8x32xf32>, vector<32x32xf32>, vector<8x32xf32> -> vector<8x32xf32>
    %c0_81 = arith.constant 0 : index
    %c0_82 = arith.constant 0 : index
    %212 = vector.load %arg12[%c0_81, %c0_82] : memref<32x32xf32, #tpu.memory_space<vmem>>, vector<32x32xf32>
    %cst_83 = arith.constant dense<0.000000e+00> : vector<8x32xf32>
    %213 = tpu.matmul %124, %212, %cst_83 {dimension_numbers = #tpu.dot_dimension_numbers<[1], [0], [0], [1], [0, 0, 1, 1], [], []>} : vector<8x32xf32>, vector<32x32xf32>, vector<8x32xf32> -> vector<8x32xf32>
    %214 = arith.addf %211, %213 : vector<8x32xf32>
    %c0_84 = arith.constant 0 : index
    %c0_85 = arith.constant 0 : index
    %215 = vector.load %arg13[%c0_84, %c0_85] : memref<1x32xf32, #tpu.memory_space<vmem>>, vector<1x32xf32>
    %216 = vector.broadcast %215 : vector<1x32xf32> to vector<8x32xf32>
    %217 = arith.addf %214, %216 : vector<8x32xf32>
    %c0_86 = arith.constant 0 : index
    %c0_87 = arith.constant 0 : index
    %c0_88 = arith.constant 0 : index
    %218 = vector.load %arg17[%c0_86, %c0_87, %c0_88] : memref<1x8x32xf32, #tpu.memory_space<vmem>>, vector<1x8x32xf32>
    %219 = vector.shape_cast %218 : vector<1x8x32xf32> to vector<8x32xf32>
    %220 = vector.shape_cast %217 : vector<8x32xf32> to vector<1x8x32xf32>
    tpu.vector_store %arg17[%c0_86, %c0_87, %c0_88], %220 {strides = array<i32>} : memref<1x8x32xf32, #tpu.memory_space<vmem>>, vector<1x8x32xf32>,
    %c0_89 = arith.constant 0 : index
    %c0_90 = arith.constant 0 : index
    %221 = vector.load %arg14[%c0_89, %c0_90] : memref<32x32xf32, #tpu.memory_space<vmem>>, vector<32x32xf32>
    %cst_91 = arith.constant dense<0.000000e+00> : vector<8x32xf32>
    %222 = tpu.matmul %3, %221, %cst_91 {dimension_numbers = #tpu.dot_dimension_numbers<[1], [0], [0], [1], [0, 0, 1, 1], [], []>} : vector<8x32xf32>, vector<32x32xf32>, vector<8x32xf32> -> vector<8x32xf32>
    %c0_92 = arith.constant 0 : index
    %c0_93 = arith.constant 0 : index
    %223 = vector.load %arg15[%c0_92, %c0_93] : memref<32x32xf32, #tpu.memory_space<vmem>>, vector<32x32xf32>
    %cst_94 = arith.constant dense<0.000000e+00> : vector<8x32xf32>
    %224 = tpu.matmul %209, %223, %cst_94 {dimension_numbers = #tpu.dot_dimension_numbers<[1], [0], [0], [1], [0, 0, 1, 1], [], []>} : vector<8x32xf32>, vector<32x32xf32>, vector<8x32xf32> -> vector<8x32xf32>
    %225 = arith.addf %222, %224 : vector<8x32xf32>
    %c0_95 = arith.constant 0 : index
    %c0_96 = arith.constant 0 : index
    %226 = vector.load %arg16[%c0_95, %c0_96] : memref<1x32xf32, #tpu.memory_space<vmem>>, vector<1x32xf32>
    %227 = vector.broadcast %226 : vector<1x32xf32> to vector<8x32xf32>
    %228 = arith.addf %225, %227 : vector<8x32xf32>
    %c0_97 = arith.constant 0 : index
    %c0_98 = arith.constant 0 : index
    %c0_99 = arith.constant 0 : index
    %229 = vector.load %arg18[%c0_97, %c0_98, %c0_99] : memref<1x8x32xf32, #tpu.memory_space<vmem>>, vector<1x8x32xf32>
    %230 = vector.shape_cast %229 : vector<1x8x32xf32> to vector<8x32xf32>
    %231 = vector.shape_cast %228 : vector<8x32xf32> to vector<1x8x32xf32>
    tpu.vector_store %arg18[%c0_97, %c0_98, %c0_99], %231 {strides = array<i32>} : memref<1x8x32xf32, #tpu.memory_space<vmem>>, vector<1x8x32xf32>,
    return
  }
  func.func @transform_0(%arg0: i32) -> (i32, i32, i32) {
    %c0_i32 = arith.constant 0 : i32
    %c0_i32_0 = arith.constant 0 : i32
    %c0_i32_1 = arith.constant 0 : i32
    return %arg0, %c0_i32, %c0_i32_0 : i32, i32, i32
  }
  func.func @transform_1(%arg0: i32) -> (i32, i32, i32) {
    %c0_i32 = arith.constant 0 : i32
    %c0_i32_0 = arith.constant 0 : i32
    %c0_i32_1 = arith.constant 0 : i32
    return %arg0, %c0_i32, %c0_i32_0 : i32, i32, i32
  }
  func.func @transform_2(%arg0: i32) -> (i32, i32, i32) {
    %c0_i32 = arith.constant 0 : i32
    %c0_i32_0 = arith.constant 0 : i32
    %c0_i32_1 = arith.constant 0 : i32
    return %arg0, %c0_i32, %c0_i32_0 : i32, i32, i32
  }
  func.func @transform_3(%arg0: i32) -> (i32, i32, i32) {
    %c0_i32 = arith.constant 0 : i32
    %c0_i32_0 = arith.constant 0 : i32
    %c0_i32_1 = arith.constant 0 : i32
    return %arg0, %c0_i32, %c0_i32_0 : i32, i32, i32
  }
  func.func @transform_4(%arg0: i32) -> (i32, i32, i32) {
    %c0_i32 = arith.constant 0 : i32
    %c0_i32_0 = arith.constant 0 : i32
    %c0_i32_1 = arith.constant 0 : i32
    return %arg0, %c0_i32, %c0_i32_0 : i32, i32, i32
  }
  func.func @transform_5(%arg0: i32) -> (i32, i32, i32) {
    %c0_i32 = arith.constant 0 : i32
    %c0_i32_0 = arith.constant 0 : i32
    %c0_i32_1 = arith.constant 0 : i32
    return %arg0, %c0_i32, %c0_i32_0 : i32, i32, i32
  }
  func.func @transform_6(%arg0: i32) -> (i32, i32) {
    %c0_i32 = arith.constant 0 : i32
    %c0_i32_0 = arith.constant 0 : i32
    %c0_i32_1 = arith.constant 0 : i32
    return %c0_i32, %c0_i32_0 : i32, i32
  }
  func.func @transform_7(%arg0: i32) -> (i32, i32) {
    %c0_i32 = arith.constant 0 : i32
    %c0_i32_0 = arith.constant 0 : i32
    %c0_i32_1 = arith.constant 0 : i32
    return %c0_i32, %c0_i32_0 : i32, i32
  }
  func.func @transform_8(%arg0: i32) -> (i32, i32) {
    %c0_i32 = arith.constant 0 : i32
    %c0_i32_0 = arith.constant 0 : i32
    %c0_i32_1 = arith.constant 0 : i32
    return %c0_i32, %c0_i32_0 : i32, i32
  }
  func.func @transform_9(%arg0: i32) -> (i32, i32) {
    %c0_i32 = arith.constant 0 : i32
    %c0_i32_0 = arith.constant 0 : i32
    %c0_i32_1 = arith.constant 0 : i32
    return %c0_i32, %c0_i32_0 : i32, i32
  }
  func.func @transform_10(%arg0: i32) -> (i32, i32) {
    %c0_i32 = arith.constant 0 : i32
    %c0_i32_0 = arith.constant 0 : i32
    %c0_i32_1 = arith.constant 0 : i32
    return %c0_i32, %c0_i32_0 : i32, i32
  }
  func.func @transform_11(%arg0: i32) -> (i32, i32) {
    %c0_i32 = arith.constant 0 : i32
    %c0_i32_0 = arith.constant 0 : i32
    %c0_i32_1 = arith.constant 0 : i32
    return %c0_i32, %c0_i32_0 : i32, i32
  }
  func.func @transform_12(%arg0: i32) -> (i32, i32) {
    %c0_i32 = arith.constant 0 : i32
    %c0_i32_0 = arith.constant 0 : i32
    %c0_i32_1 = arith.constant 0 : i32
    return %c0_i32, %c0_i32_0 : i32, i32
  }
  func.func @transform_13(%arg0: i32) -> (i32, i32) {
    %c0_i32 = arith.constant 0 : i32
    %c0_i32_0 = arith.constant 0 : i32
    %c0_i32_1 = arith.constant 0 : i32
    return %c0_i32, %c0_i32_0 : i32, i32
  }
  func.func @transform_14(%arg0: i32) -> (i32, i32) {
    %c0_i32 = arith.constant 0 : i32
    %c0_i32_0 = arith.constant 0 : i32
    %c0_i32_1 = arith.constant 0 : i32
    return %c0_i32, %c0_i32_0 : i32, i32
  }
  func.func @transform_15(%arg0: i32) -> (i32, i32) {
    %c0_i32 = arith.constant 0 : i32
    %c0_i32_0 = arith.constant 0 : i32
    %c0_i32_1 = arith.constant 0 : i32
    return %c0_i32, %c0_i32_0 : i32, i32
  }
  func.func @transform_16(%arg0: i32) -> (i32, i32, i32) {
    %c0_i32 = arith.constant 0 : i32
    %c0_i32_0 = arith.constant 0 : i32
    %c0_i32_1 = arith.constant 0 : i32
    return %arg0, %c0_i32, %c0_i32_0 : i32, i32, i32
  }
  func.func @transform_17(%arg0: i32) -> (i32, i32, i32) {
    %c0_i32 = arith.constant 0 : i32
    %c0_i32_0 = arith.constant 0 : i32
    %c0_i32_1 = arith.constant 0 : i32
    return %arg0, %c0_i32, %c0_i32_0 : i32, i32, i32
  }
}

</mosaic_0001>

<bundles_post_ra>
// kernel: single_block_forward.4
= control target key start
LH: loop header
LB: loop body
LE: loop exit
PB: predicated region body
PF: predicated region fallthrough
CT: control target
= control target key end

     0   :  { %s300_s12 = smov 0   ;;  %s332_s0 = inlined_call_operand.vmem [shape: f32[16,32], index: 0, kind: input, shape index: {}]   ;;  %s333_s1 = inlined_call_operand.vmem [shape: f32[32,32], index: 1, kind: input, shape index: {}]   ;;  %s334_s2 = inlined_call_operand.vmem [shape: f32[1,32], index: 2, kind: input, shape index: {}]   ;;  %s335_s3 = inlined_call_operand.vmem [shape: f32[16,32], index: 3, kind: output, shape index: {}]  }
   0x1 LB: > { %s253_s13 = sadd.s32 4294967295, %s278_s12   ;;  %p257_p0 = scmp.ge.s32.totalorder %s278_s12, 1  ;;  %s278_s12 = sphi %s300_s12, %s13_s12  }
   0x2   : > { %p136_p1 = scmp.lt.s32.totalorder %s278_s12, 3 }
   0x4   : > { %p137_p2 = pnand %p257_p0, %p136_p1 }
   0x5   : > { %p158_p3 = scmp.lt.s32.totalorder (!%p137_p2), %s253_s13, 1 }
   0x6   : > { %140 = sbr.rel (%p137_p2) target bundleno = 148 (0x94), region = 32 }
   0xb   : > { %v170_v0 = vld [vmem:[%s333_s1 + $0x18] sm:$0xff]  ;;  %v169_v1 = vld [vmem:[%s333_s1 + $0x10] sm:$0xff]  ;;  %v168_v2 = vld [vmem:[%s333_s1 + $0x8] sm:$0xff]  ;;  %s337_s13 = smov (!%p158_p3, %s253_s13), 1  ;;  %vm175_vm0 = vcmask 261120  }
   0xc   : > { %191 = vmatpush.msra.mxu0 %v170_v0  ;;  %v167_v3 = vld [vmem:[%s333_s1] sm:$0xff]  ;;  %s258_s22 = sshll.u32 %s337_s13, 3 }
   0xd   : > { %s161_s25 = scalar_lea.vmem %s332_s0, %s258_s22  ;;  %v271_v5 = vld [vmem:[%s334_s2] ss:$0 sm:$0xff]  ;;  %s165_s30 = scalar_lea.vmem %s335_s3, %s258_s22 }
   0xe   : > { %192 = vmatpush.msra.mxu0 %v169_v1  ;;  %v166_v4 = vld [vmem:[%s161_s25] sm:$0xff] }
  0x10   : > { %193 = vmatpush.msra.mxu0 %v168_v2 }
  0x12   : > { %194 = vmatpush.msra.mxu0 %v167_v3 }
  0x13   : > { %260 = vmatmul.msk.f32.vlgmr.msra.gmra.mxu0 %vm175_vm0, %v166_v4 }
  0x90   : > { %v196_v6 = vpop.f32.mrf.mxu0 }
  0x91   : > { %v197_v7 = vadd.f32 %v271_v5, %v196_v6 }
  0x93   : > { %199 = vst.msk [vmem:[%s165_s30] sm:$0xff] %vm175_vm0, %v197_v7 }
  0x94 PF: > { %s13_s12 = sadd.s32 1, %s278_s12  }
  0x95   : > { %p10_p4 = scmp.ge.s32.totalorder %s13_s12, 4  }
  0x97   :  { %12 = sbr.rel (!%p10_p4) target bundleno = 1 (0x1), region = 62 }

// kernel: single_block_forward.7
= control target key start
LH: loop header
LB: loop body
LE: loop exit
PB: predicated region body
PF: predicated region fallthrough
CT: control target
= control target key end

     0   :  { %s2476_s0 = inlined_call_operand.vmem [shape: f32[2,8,32], index: 0, kind: input, shape index: {}]   ;;  %s2477_s1 = inlined_call_operand.vmem [shape: f32[2,8,32], index: 1, kind: input, shape index: {}]   ;;  %s2478_s2 = inlined_call_operand.vmem [shape: f32[2,8,1], index: 2, kind: input, shape index: {}]   ;;  %s2479_s3 = inlined_call_operand.vmem [shape: f32[2,1,8], index: 3, kind: input, shape index: {}]   ;;  %s2480_s4 = inlined_call_operand.vmem [shape: f32[2,8,1], index: 4, kind: input, shape index: {}]   ;;  %s2481_s5 = inlined_call_operand.vmem [shape: f32[2,1,8], index: 5, kind: input, shape index: {}]   ;;  %s2482_s6 = inlined_call_operand.vmem [shape: f32[32,32], index: 6, kind: input, shape index: {}]   ;;  %s2483_s7 = inlined_call_operand.vmem [shape: f32[1,32], index: 7, kind: input, shape index: {}]   ;;  %s2484_s8 = inlined_call_operand.vmem [shape: f32[32,32], index: 8, kind: input, shape index: {}]   ;;  %s2485_s9 = inlined_call_operand.vmem [shape: f32[1,32], index: 9, kind: input, shape index: {}]   ;;  %s2486_s10 = inlined_call_operand.vmem [shape: f32[32,96], index: 10, kind: input, shape index: {}]   ;;  %s2487_s11 = inlined_call_operand.vmem [shape: f32[1,96], index: 11, kind: input, shape index: {}]   ;;  %s2488_s12 = inlined_call_operand.vmem [shape: f32[32,96], index: 12, kind: input, shape index: {}]   ;;  %s2489_s13 = inlined_call_operand.vmem [shape: f32[1,96], index: 13, kind: input, shape index: {}]   ;;  %s2490_s14 = inlined_call_operand.vmem [shape: f32[32,32], index: 14, kind: input, shape index: {}]   ;;  %s2491_s15 = inlined_call_operand.vmem [shape: f32[1,32], index: 15, kind: input, shape index: {}]   ;;  %s2492_s16 = inlined_call_operand.vmem [shape: f32[32,32], index: 16, kind: input, shape index: {}]   ;;  %s2493_s17 = inlined_call_operand.vmem [shape: f32[1,32], index: 17, kind: input, shape index: {}]   ;;  %s2494_s18 = inlined_call_operand.hbm [shape: f32[2,8,32], index: 18, kind: output, shape index: {0}]   ;;  %s2495_s19 = inlined_call_operand.hbm [shape: f32[2,8,32], index: 19, kind: output, shape index: {1}]  }
   0x1   :  { %2505 = sst [smem:[#allocation15_spill]] %s2476_s0 }
   0x2   :  { %2506 = sst [smem:[#allocation16_spill]] %s2477_s1 }
   0x3   :  { %2507 = sst [smem:[#allocation17_spill]] %s2478_s2 }
   0x4   :  { %2508 = sst [smem:[#allocation18_spill]] %s2479_s3 }
   0x5   :  { %2509 = sst [smem:[#allocation19_spill]] %s2480_s4 }
   0x6   :  { %2510 = sst [smem:[#allocation20_spill]] %s2481_s5 }
   0x7   :  { %2511 = sst [smem:[#allocation21_spill]] %s2482_s6 }
   0x8   :  { %2512 = sst [smem:[#allocation22_spill]] %s2486_s10 }
   0x9   :  { %2513 = sst [smem:[#allocation23_spill]] %s2488_s12 }
   0xa   :  { %2514 = sst [smem:[#allocation24_spill]] %s2493_s17 }
   0xb   :  { %2515 = sst [smem:[#allocation25_spill]] %s2495_s19 }
   0xc   :  { %25 = vsyncpa [#allocation3], 0 }
   0xd   :  { %27 = vsyncpa [#allocation3 + $0x1], 0 }
   0xe   :  { %28 = vsyncpa [#allocation5], 0 }
   0xf   :  { %30 = vsyncpa [#allocation5 + $0x1], 0  ;;  %s2125_s0 = smov 0   ;;  %s2127_s30 = smov 0  }
  0x10   :  { %s2129_s20 = smov 0   ;;  %s2131_s21 = smov 0  }
  0x11 LB: > { %2516 = sst [smem:[#allocation8_spill]] %s1995_s0  ;;  %s2146_s1 = sadd.s32 4294967295, %s2007_s21   ;;  %s2007_s21 = sphi %s2131_s21, %s2546_s21   ;;  %s2003_s20 = sphi %s2129_s20, %s2548_s20   ;;  %s1999_s30 = sphi %s2127_s30, %s2550_s30   ;;  %s1995_s0 = sphi %s2125_s0, %s2549_s0  }
  0x12   : > { %2517 = sst [smem:[#allocation9_spill]] %s2003_s20  ;;  %s1752_s22 = sadd.s32 4294967294, %s2007_s21  }
  0x13   : > { %2518 = sst [smem:[#allocation10_spill]] %s2007_s21  ;;  %s2150_s2 = sadd.s32 1, %s2007_s21  }
  0x14   : > { %2519 = sst [smem:[#allocation11_spill]] %s2150_s2  ;;  %s451_s23 = sadd.s32 1, %s2003_s20 }
  0x15   : > { %s448_s24 = ssub.s32 %s2007_s21, %s2150_s2  ;;  %p461_p0 = scmp.ne.s32.totalorder %s2003_s20, %s1999_s30 }
  0x16   : > { %p449_p1 = scmp.eq.s32.totalorder %s448_s24, 0  ;;  %p462_p2 = scmp.eq.s32.totalorder %s2146_s1, 1 }
  0x17   : > { %p467_p3 = scmp.ne.s32.totalorder %s1999_s30, %s1995_s0  ;;  %p468_p4 = scmp.eq.s32.totalorder %s1752_s22, 1 }
  0x18   : > { %s2161_s25 = scalar_select %p449_p1, %s2003_s20, %s451_s23  }
  0x19   : > { %p2163_p5 = por %p462_p2, %p461_p0  ;;  %p2167_p6 = por %p468_p4, %p467_p3 }
  0x1a   : > { %2520 = sst [smem:[#allocation12_spill]] %s2161_s25  ;;  %p1755_p7 = scmp.ge.s32.totalorder %s2007_s21, 1 }
  0x1b   : > { %s2521_s3 = scalar_select %p2163_p5, 1, 0 }
  0x1c   : > { %s2523_s26 = scalar_select %p2167_p6, 1, 0 }
  0x1d   : > { %2522 = sst [smem:[#allocation13_spill]] %s2521_s3  ;;  %p588_p8 = scmp.lt.s32.totalorder %s2007_s21, 3 }
  0x1e   : > { %2524 = sst [smem:[#allocation14_spill]] %s2523_s26 }
  0x1f   : > { %p589_p9 = pnand %p1755_p7, %p588_p8 }
  0x20   : > { %s2525_s10 = sld [smem:[#allocation22_spill]] (!%p589_p9)  ;;  %p666_p10 = scmp.lt.s32.totalorder (!%p589_p9), %s2146_s1, 1 }
  0x21   : > { %592 = sbr.rel (%p589_p9) target bundleno = 1449 (0x5a9), region = 92  ;;  %s2526_s12 = sld [smem:[#allocation23_spill]] (!%p589_p9) }
  0x22   : > { %s2527_s27 = sld [smem:[#allocation15_spill]] (!%p589_p9)  ;;  %s2014_s20 = smov (!%p589_p9), 88  }
  0x23   : > { %s2528_s17 = sld [smem:[#allocation16_spill]] (!%p589_p9)  ;;  %s2015_s25 = smov (!%p589_p9), 80  }
  0x24   : > { %s2529_s4 = sld [smem:[#allocation19_spill]] (!%p589_p9)  ;;  %s2017_s22 = smov (!%p589_p9), 96  }
  0x25   : > { %s2531_s6 = sld [smem:[#allocation21_spill]] (!%p589_p9)  ;;  %s2020_s23 = smov (!%p589_p9), 48  }
  0x26   : > { %v846_v0 = vld [vmem:[%s2525_s10 + $0x18] sm:$0xff]  ;;  %v845_v2 = vld [vmem:[%s2525_s10 + $0x10] sm:$0xff]  ;;  %v844_v4 = vld [vmem:[%s2525_s10 + $0x8] sm:$0xff]  ;;  %s2193_s29 = scalar_select %p666_p10, %s2146_s1, 1  ;;  %v2009_v6 = vmov 0   ;;  %vm706_vm0 = vcmask 7168  }
  0x27   : > { %v879_v1 = vld [vmem:[%s2526_s12 + $0x18] sm:$0xff]  ;;  %866 = vmatpush.msra.mxu2 %v846_v0  ;;  %v878_v3 = vld [vmem:[%s2526_s12 + $0x10] sm:$0xff]  ;;  %v877_v5 = vld [vmem:[%s2526_s12 + $0x8] sm:$0xff]  ;;  %1859 = vset.pattern.permute.xlu1 %v2009_v6  ;;  %vm698_vm1 = vcmask 261120   ;;  %vm924_vm10 = vcmask 64512   ;;  %s2537_s5 = sld [smem:[#allocation20_spill]] }
  0x28   : > { %899 = vmatpush.msra.mxu3 %v879_v1  ;;  %1858 = vset.pattern.permute.xlu0 %v2009_v6  ;;  %v843_v7 = vld [vmem:[%s2525_s10] sm:$0xff]  ;;  %s1758_s26 = sshll.u32 %s2193_s29, 3  ;;  %v812_v30 = vld [vmem:[%s2484_s8 + $0x18] sm:$0xff]  ;;  %v811_v32 = vld [vmem:[%s2484_s8 + $0x10] sm:$0xff]  ;;  %s2021_s24 = smov 40   ;;  %vm1207_vm15 = vcmask 130048  }
  0x29   : > { %867 = vmatpush.msra.mxu2 %v845_v2  ;;  %v876_v8 = vld [vmem:[%s2526_s12] sm:$0xff]  ;;  %s669_s28 = scalar_lea.vmem %s2527_s27, %s1758_s26  ;;  %s673_s19 = scalar_lea.vmem %s2528_s17, %s1758_s26  ;;  %829 = vmatpush.msra.mxu1 %v812_v30  ;;  %v810_v34 = vld [vmem:[%s2484_s8 + $0x8] sm:$0xff] }
  0x2a   : > { %900 = vmatpush.msra.mxu3 %v878_v3  ;;  %v2210_v9 = vld [vmem:[%s669_s28] sm:$0xff]  ;;  %s684_s2 = scalar_lea.vmem %s2529_s4, %s1758_s26  ;;  %s2530_s12 = sld [smem:[#allocation17_spill]] }
  0x2b   : > { %868 = vmatpush.msra.mxu2 %v844_v4  ;;  %v2212_v10 = vld [vmem:[%s673_s19] sm:$0xff]  ;;  %v842_v11 = vmax.f32 %v2210_v9, 0.0  ;;  %v778_v29 = vld [vmem:[%s2531_s6 + $0x18] sm:$0xff]  ;;  %v777_v31 = vld [vmem:[%s2531_s6 + $0x10] sm:$0xff]  ;;  %830 = vmatpush.msra.mxu1 %v811_v32  ;;  %s2012_s27 = smov 104   ;;  %s2013_s28 = smov 72  }
  0x2c   : > { %901 = vmatpush.msra.mxu3 %v877_v5  ;;  %v875_v12 = vmax.f32 %v2212_v10, 0.0  ;;  %v691_v13 = vld [vmem:[%s684_s2] sm:$0xff]  ;;  %795 = vmatpush.msra.mxu0 %v778_v29  ;;  %v776_v33 = vld [vmem:[%s2531_s6 + $0x8] sm:$0xff]  ;;  %s2016_s2 = smov 112   ;;  %s2534_s17 = sld [smem:[#allocation18_spill]] }
  0x2d   : > { %869 = vmatpush.msra.mxu2 %v843_v7  ;;  %v747_v15 = vsel %vm706_vm0, %v691_v13, 0.0  ;;  %v775_v35 = vld [vmem:[%s2531_s6] sm:$0xff]  ;;  %831 = vmatpush.msra.mxu1 %v810_v34 }
  0x2e   : > { %902 = vmatpush.msra.mxu3 %v876_v8  ;;  %1764 = vmatmul.msk.f32.vlgmr.msra.gmra.mxu2 %vm698_vm1, %v842_v11  ;;  %v748_v17 = vrot.slane %v747_v15, 4  ;;  %v809_v36 = vld [vmem:[%s2484_s8] sm:$0xff] }
  0x2f   : > { %1765 = vmatmul.msk.f32.vlgmr.msra.gmra.mxu3 %vm698_vm1, %v875_v12  ;;  %796 = vmatpush.msra.mxu0 %v777_v31 }
  0x30   : > { %s677_s3 = scalar_lea.vmem %s2530_s12, %s1758_s26  ;;  %v749_v19 = vadd.f32 %v748_v17, %v747_v15  ;;  %832 = vmatpush.msra.mxu1 %v809_v36  ;;  %s2011_s26 = smov 120  }
  0x31   : > { %v690_v14 = vld [vmem:[%s677_s3] sm:$0xff]  ;;  %797 = vmatpush.msra.mxu0 %v776_v33  ;;  %s2010_s3 = smov 32  }
  0x32   : > { %v707_v16 = vsel %vm706_vm0, %v690_v14, 0.0  ;;  %v750_v21 = vrot.slane %v749_v19, 2  ;;  %s680_s19 = scalar_lea.vmem %s2534_s17, %s2193_s29  ;;  %vm1209_vm0 = vcmask 195584  }
  0x33   : > { %v708_v18 = vrot.slane %v707_v16, 4  ;;  %798 = vmatpush.msra.mxu0 %v775_v35  ;;  %v1865_v35 = vld [vmem:[%s2487_s11] ss:$0 sm:$0xff] }
  0x34   : > { %v751_v23 = vadd.f32 %v750_v21, %v749_v19  ;;  %v813_v21 = vld [vmem:[%s2485_s9] sm:$0x1] }
  0x35   : > { %v709_v20 = vadd.f32 %v708_v18, %v707_v16 }
  0x36   : > { %v752_v25 = vrot.slane %v751_v23, 1 }
  0x37   : > { %v710_v22 = vrot.slane %v709_v20, 2 }
  0x38   : > { %v753_v27 = vadd.f32 %v752_v25, %v751_v23 }
  0x39   : > { %v711_v24 = vadd.f32 %v710_v22, %v709_v20  ;;  %v779_v22 = vld [vmem:[%s2483_s7] sm:$0x1] }
  0x3a   : > { %756 = vperm.xlu0 %1858, %v753_v27  }
  0x3b   : > { %v712_v26 = vrot.slane %v711_v24, 1 }
  0x3d   : > { %v713_v28 = vadd.f32 %v712_v26, %v711_v24 }
  0x3f   : > { %716 = vperm.xlu1 %1859, %v713_v28  }
  0x42   : > { %736 = vperm.xlu0 %1858, %v691_v13  }
  0x47   : > { %694 = vperm.xlu1 %1859, %v690_v14  }
  0xac   : > { %v757_v37 = vpop.permute.xlu0 %756 }
  0xad   : > { %1869 = vrcp.f32 %v757_v37  ;;  %v770_v63 = vand.u32 2147483648, %v757_v37  ;;  %vm764_vm6 = vweird.f32 %v757_v37  ;;  %v768_v3 = vand.u32 2147483647, %v757_v37 }
  0xaf   : > { %v771_v11 = vor.u32 1.1754944e-38, %v770_v63  ;;  %vm769_vm9 = vcmp.eq.f32.partialorder %v768_v3, 8.507059e+37 }
  0xb1   : > { %v717_v38 = vpop.permute.xlu1 %716  ;;  %v871_v36 = vpop.f32.mrf.mxu2 }
  0xb2   : > { %1871 = vrcp.f32 %v717_v38  ;;  %vm724_vm2 = vweird.f32 %v717_v38  ;;  %v730_v55 = vand.u32 2147483648, %v717_v38  ;;  %v728_v59 = vand.u32 2147483647, %v717_v38 }
  0xb3   : > { %v1870_v39 = vpop.eup %1869 }
  0xb4   : > { %v760_v41 = vmul.f32 %v1870_v39, %v757_v37  ;;  %v2248_v42 = vpop.permute.xlu0 %736  ;;  %vm765_vm4 = vweird.f32 %v1870_v39  ;;  %v731_v1 = vor.u32 1.1754944e-38, %v730_v55  ;;  %vm729_vm8 = vcmp.eq.f32.partialorder %v728_v59, 8.507059e+37 }
  0xb5   : > { %v739_v45 = vmul.f32 %v2248_v42, %v2212_v10  ;;  %vm766_vm7 = vmor %vm764_vm6, %vm765_vm4  ;;  %v872_v37 = vadd.f32 %v1865_v35, %v871_v36 }
  0xb6   : > { %v761_v46 = vsub.f32 1.0, %v760_v41 }
  0xb7   : > { %v740_v49 = vsel %vm698_vm1, %v739_v45, 0.0 }
  0xb8   : > { %v1872_v40 = vpop.eup %1871  ;;  %v762_v50 = vmul.f32 %v1870_v39, %v761_v46  ;;  %v741_v51 = vrot.slane %v740_v49, 4 }
  0xb9   : > { %v2250_v43 = vpop.permute.xlu1 %694  ;;  %v720_v44 = vmul.f32 %v1872_v40, %v717_v38  ;;  %vm725_vm3 = vweird.f32 %v1872_v40 }
  0xba   : > { %v697_v47 = vmul.f32 %v2250_v43, %v2210_v9  ;;  %v742_v56 = vadd.f32 %v741_v51, %v740_v49  ;;  %vm2258_vm5 = vmor %vm724_vm2, %vm725_vm3  ;;  %v763_v62 = vadd.f32 %v1870_v39, %v762_v50 }
  0xbb   : > { %v721_v48 = vsub.f32 1.0, %v720_v44 }
  0xbc   : > { %v699_v52 = vsel %vm698_vm1, %v697_v47, 0.0  ;;  %v743_v61 = vrot.slane %v742_v56, 2  ;;  %v767_v8 = vsel %vm766_vm7, %v1870_v39, %v763_v62 }
  0xbd   : > { %v722_v53 = vmul.f32 %v1872_v40, %v721_v48  ;;  %v700_v54 = vrot.slane %v699_v52, 4  ;;  %v772_v16 = vsel %vm769_vm9, %v771_v11, %v767_v8  ;;  %v1866_v48 = vld [vmem:[%s2489_s13] ss:$0 sm:$0xff] }
  0xbe   : > { %v744_v2 = vadd.f32 %v743_v61, %v742_v56 }
  0xbf   : > { %v701_v57 = vadd.f32 %v700_v54, %v699_v52  ;;  %v723_v58 = vadd.f32 %v1872_v40, %v722_v53 }
  0xc0   : > { %v745_v7 = vrot.slane %v744_v2, 1 }
  0xc1   : > { %v702_v0 = vrot.slane %v701_v57, 2  ;;  %v727_v5 = vsel %vm2258_vm5, %v1872_v40, %v723_v58  ;;  %v2276_v40 = vmul.f32 %v872_v37, %v2250_v43  ;;  %v904_v43 = vpop.f32.mrf.mxu3 }
  0xc2   : > { %v732_v13 = vsel %vm729_vm8, %v731_v1, %v727_v5  ;;  %v746_v14 = vadd.f32 %v745_v7, %v744_v2  ;;  %v905_v49 = vadd.f32 %v1866_v48, %v904_v43  ;;  %v910_v5 = vld [vmem:[%s680_s19] sm:$0x1] }
  0xc3   : > { %v703_v4 = vadd.f32 %v702_v0, %v701_v57  ;;  %vm911_vm11 = vcmp.eq.f32.partialorder %v910_v5, 0.0 }
  0xc4   : > { %v773_v17 = vmul.f32 %v772_v16, %v746_v14  ;;  %v2284_v50 = vmul.f32 %v905_v49, %v2248_v42  ;;  %v950_v7 = vsel %vm911_vm11, 1, %v2009_v6 }
  0xc5   : > { %v704_v12 = vrot.slane %v703_v4, 1  ;;  %v951_v8 = vperm.slane %v950_v7, 0 }
  0xc6   : > { %v808_v19 = vmax.f32 %v773_v17, 0.0 }
  0xc7   : > { %v705_v15 = vadd.f32 %v704_v12, %v703_v4  ;;  %vm2309_vm12 = vcmp.eq.s32.totalorder %v951_v8, 1 }
  0xc8   : > { %1763 = vmatmul.msk.f32.vlgmr.msra.gmra.mxu1 %vm698_vm1, %v808_v19 }
  0xc9   : > { %v733_v18 = vmul.f32 %v732_v13, %v705_v15 }
  0xcb   : > { %v774_v20 = vmax.f32 %v733_v18, 0.0 }
  0xcd   : > { %1762 = vmatmul.msk.f32.vlgmr.msra.gmra.mxu0 %vm698_vm1, %v774_v20 }
 0x145   : > { %v834_v23 = vpop.f32.mrf.mxu1 }
 0x146   : > { %v835_v25 = vadd.f32 %v834_v23, %v813_v21 }
 0x148   : > { %v837_v27 = vsub.f32 0.0, %v835_v25 }
 0x14a   : > { %v800_v24 = vpop.f32.mrf.mxu0  ;;  %v838_v29 = vmul.f32 1.442695, %v837_v27 }
 0x14b   : > { %v801_v26 = vadd.f32 %v800_v24, %v779_v22 }
 0x14c   : > { %1873 = vpow2.f32 %v838_v29 }
 0x14d   : > { %v803_v28 = vsub.f32 0.0, %v801_v26 }
 0x14f   : > { %v804_v30 = vmul.f32 1.442695, %v803_v28 }
 0x151   : > { %1875 = vpow2.f32 %v804_v30 }
 0x152   : > { %v1874_v31 = vpop.eup %1873 }
 0x153   : > { %v840_v33 = vadd.f32 1.0, %v1874_v31 }
 0x155   : > { %1877 = vrcp.f32 %v840_v33 }
 0x157   : > { %v1876_v32 = vpop.eup %1875 }
 0x158   : > { %v806_v34 = vadd.f32 1.0, %v1876_v32 }
 0x15a   : > { %1879 = vrcp.f32 %v806_v34 }
 0x15b   : > { %v1878_v38 = vpop.eup %1877 }
 0x15c   : > { %v908_v39 = vadd.f32 1.0, %v1878_v38 }
 0x15e   : > { %v914_v41 = vperm.slane %v908_v39, 0 }
 0x160   : > { %v1880_v44 = vpop.eup %1879  ;;  %916 = vrot.lane.b32.xlu2 %v914_v41, %s2010_s3  ;;  %v920_v45 = vmul.f32 %v914_v41, %v2276_v40  ;;  %v1860_v41 = vpack.i.bf16 %v2284_v50, %v2276_v40 }
 0x161   : > { %v909_v46 = vadd.f32 1.0, %v1880_v44 }
 0x162   : > { %995 = vrot.lane.b32.xlu0 %v920_v45, %s2011_s26  ;;  %1766 = vmatpush.xpose.msk.msrb.mxu0 %vm924_vm10, %v920_v45 }
 0x163   : > { %v1211_v47 = vperm.slane %v909_v46, 0 }
 0x165   : > { %v1217_v51 = vmul.f32 %v1211_v47, %v2284_v50 }
 0x168   : > { %1213 = vrot.lane.b32.xlu2 %v1211_v47, %s2010_s3  ;;  %s687_s3 = scalar_lea.vmem %s2537_s5, %s2193_s29  ;;  %s2018_s29 = smov 64  }
 0x169   : > { %v912_v19 = vld [vmem:[%s687_s3] sm:$0x1] }
 0x16a   : > { %vm913_vm13 = vcmp.eq.f32.partialorder %v912_v19, 0.0 }
 0x16b   : > { %v1246_v26 = vsel %vm913_vm13, 1, %v2009_v6 }
 0x16c   : > { %v1247_v30 = vperm.slane %v1246_v26, 0 }
 0x16e   : > { %vm2330_vm14 = vcmp.eq.s32.totalorder %v1247_v30, 1 }
 0x170   : > { %1129 = vrot.lane.b32.xlu2 %v920_v45, %s2012_s27 }
 0x178   : > { %1291 = vrot.lane.b32.xlu2 %v1217_v51, %s2011_s26  ;;  %s2019_s26 = smov 56  }
 0x1ba   : > { %v917_v52 = vpop.permute.xlu2 %916 }
 0x1bb   : > { %v919_v53 = vmul.f32 %v917_v52, %v2276_v40 }
 0x1bd   : > { %1127 = vrot.lane.b32.xlu0 %v919_v53, %s2013_s28  ;;  %993 = vrot.lane.b32.xlu1 %v919_v53, %s2014_s20 }
 0x1be   : > { %1060 = vrot.lane.b32.xlu2 %v919_v53, %s2015_s25 }
 0x1c2   : > { %v1214_v54 = vpop.permute.xlu2 %1213 }
 0x1c3   : > { %v1216_v55 = vmul.f32 %v1214_v54, %v2284_v50 }
 0x1c5   : > { %1062 = vrot.lane.b32.xlu0 %v920_v45, %s2016_s2  ;;  %922 = vrot.lane.b32.xlu1 %v919_v53, %s2017_s22 }
 0x1c6   : > { %1219 = vrot.lane.b32.xlu2 %v1216_v55, %s2017_s22  ;;  %s2542_s22 = sld [smem:[#allocation24_spill]] }
 0x1ca   : > { %v1130_v56 = vpop.permute.xlu2 %1129 }
 0x1cd   : > { %1289 = vrot.lane.b32.xlu1 %v1216_v55, %s2014_s20  ;;  %1425 = vrot.lane.b32.xlu0 %v1217_v51, %s2012_s27  ;;  %s2022_s27 = smov 8   ;;  %s2024_s20 = smov 24  }
 0x1d2   : > { %v1292_v59 = vpop.permute.xlu2 %1291 }
 0x1d4   : > { %v996_v42 = vpop.permute.xlu0 %995 }
 0x1d5   : > { %1769 = vmatpush.xpose.msk.msrb.mxu2 %vm924_vm10, %v996_v42  ;;  %1423 = vrot.lane.b32.xlu1 %v1216_v55, %s2013_s28  ;;  %s2023_s28 = smov 16  }
 0x1d6   : > { %1358 = vrot.lane.b32.xlu0 %v1217_v51, %s2016_s2 }
 0x1d9   : > { %1775 = vmatpush.xpose.msk.msra.mxu2 %vm924_vm10, %v1130_v56 }
 0x1dd   : > { %1356 = vrot.lane.b32.xlu1 %v1216_v55, %s2015_s25  ;;  %s1794_s25 = sshll.u32 %s2146_s1, 3 }
 0x1de   : > { %s1587_s12 = scalar_lea.hbm %s2494_s18, %s1794_s25 }
 0x1df   : > { %s1591_s3 = sshll.u32 %s1587_s12, 4  ;;  %s1592_s3 = int_to_ptr.hbm [resolvable:$true] %s1591_s3 }
 0x1e0   : > { %s1927_s12 = sshra.s32 %s1592_s3, 4  ;;  %s1928_s12 = int_to_ptr.hbm [resolvable:$true] %s1927_s12 }
 0x1e1   : > { %s1929_s5 = scalar_lea.hbm %s1928_s12, 8  ;;  %p1934_p0 = scmp.lt.s32.totalorder %s1928_s12, %s2494_s18 }
 0x1e2   : > { %p1930_p11 = scmp.ne.s32.totalorder %s1928_s12, %s1929_s5 }
 0x1e4   : > { %p1931_p12 = pnand %p1930_p11, %p2163_p5 }
 0x1e6   : > { %p1932_p13 = pneg %p1931_p12 }
 0x218   : > { %v1061_v62 = vpop.permute.xlu2 %1060 }
 0x220   : > { %v1220_v1 = vpop.permute.xlu2 %1219 }
 0x22f   : > { %v1128_v57 = vpop.permute.xlu0 %1127  ;;  %v994_v58 = vpop.permute.xlu1 %993 }
 0x230   : > { %1770 = vmatmul.msk.f32.vlgmr.msrb.gmra.mxu2 %vm924_vm10, %v994_v58 }
 0x231   : > { %1781 = vmatpush.xpose.msk.msrb.mxu2 %vm924_vm10, %v1292_v59 }
 0x237   : > { %v1063_v60 = vpop.permute.xlu0 %1062  ;;  %v923_v61 = vpop.permute.xlu1 %922 }
 0x238   : > { %1767 = vmatmul.msk.f32.vlgmr.msrb.gmra.mxu0 %vm924_vm10, %v923_v61  ;;  %1776 = vmatmul.msk.f32.vlgmr.msra.gmra.mxu2 %vm924_vm10, %v1128_v57 }
 0x239   : > { %1772 = vmatpush.xpose.msk.msra.mxu0 %vm924_vm10, %v1063_v60 }
 0x23d   : > { %1778 = vmatpush.xpose.msk.msrb.mxu0 %vm924_vm10, %v1217_v51 }
 0x23f   : > { %v1290_v63 = vpop.permute.xlu1 %1289  ;;  %v1426_v0 = vpop.permute.xlu0 %1425 }
 0x240   : > { %1773 = vmatmul.msk.f32.vlgmr.msra.gmra.mxu0 %vm924_vm10, %v1061_v62  ;;  %1782 = vmatmul.msk.f32.vlgmr.msrb.gmra.mxu2 %vm924_vm10, %v1290_v63 }
 0x241   : > { %1787 = vmatpush.xpose.msk.msra.mxu2 %vm924_vm10, %v1426_v0 }
 0x247   : > { %v1424_v2 = vpop.permute.xlu1 %1423 }
 0x248   : > { %v1359_v3 = vpop.permute.xlu0 %1358  ;;  %1779 = vmatmul.msk.f32.vlgmr.msrb.gmra.mxu0 %vm924_vm10, %v1220_v1  ;;  %1788 = vmatmul.msk.f32.vlgmr.msra.gmra.mxu2 %vm924_vm10, %v1424_v2 }
 0x249   : > { %1784 = vmatpush.xpose.msk.msra.mxu0 %vm924_vm10, %v1359_v3 }
 0x24f   : > { %v1357_v4 = vpop.permute.xlu1 %1356 }
 0x250   : > { %1785 = vmatmul.msk.f32.vlgmr.msra.gmra.mxu0 %vm924_vm10, %v1357_v4 }
 0x2b3   : > { %v1018_v12 = vpop.f32.mrf.mxu2 }
 0x2b4   : > { %v1021_v13 = vsel %vm2309_vm12, -1e+09, %v1018_v12 }
 0x2b5   : > { %v1022_v14 = vmul.f32 0.35355338, %v1021_v13  ;;  %v947_v15 = vpop.f32.mrf.mxu0 }
 0x2b6   : > { %v953_v16 = vsel %vm2309_vm12, -1e+09, %v947_v15 }
 0x2b7   : > { %v954_v17 = vmul.f32 0.35355338, %v953_v16  ;;  %v1023_v18 = vsel %vm924_vm10, %v1022_v14, -inf }
 0x2b8   : > { %1024 = vmax.xlane.f32.xlu2 %v1023_v18 }
 0x2b9   : > { %v955_v20 = vsel %vm924_vm10, %v954_v17, -inf }
 0x2ba   : > { %956 = vmax.xlane.f32.xlu0 %v955_v20 }
 0x2bb   : > { %v1152_v21 = vpop.f32.mrf.mxu2 }
 0x2bc   : > { %v1155_v22 = vsel %vm2309_vm12, -1e+09, %v1152_v21 }
 0x2bd   : > { %v1156_v23 = vmul.f32 0.35355338, %v1155_v22  ;;  %v1085_v24 = vpop.f32.mrf.mxu0 }
 0x2be   : > { %v1088_v25 = vsel %vm2309_vm12, -1e+09, %v1085_v24 }
 0x2bf   : > { %v1089_v27 = vmul.f32 0.35355338, %v1088_v25  ;;  %v1157_v28 = vsel %vm924_vm10, %v1156_v23, -inf }
 0x2c0   : > { %1158 = vmax.xlane.f32.xlu1 %v1157_v28 }
 0x2c1   : > { %v1090_v29 = vsel %vm924_vm10, %v1089_v27, -inf }
 0x2c2   : > { %1091 = vmax.xlane.f32.xlu2 %v1090_v29 }
 0x2c3   : > { %v1314_v31 = vpop.f32.mrf.mxu2 }
 0x2c4   : > { %v1317_v44 = vsel %vm2330_vm14, -1e+09, %v1314_v31 }
 0x2c5   : > { %v1243_v33 = vpop.f32.mrf.mxu0  ;;  %v1318_v45 = vmul.f32 0.35355338, %v1317_v44 }
 0x2c6   : > { %v1249_v34 = vsel %vm2330_vm14, -1e+09, %v1243_v33 }
 0x2c7   : > { %v1250_v35 = vmul.f32 0.35355338, %v1249_v34  ;;  %v1319_v47 = vsel %vm924_vm10, %v1318_v45, -inf }
 0x2c9   : > { %v1251_v6 = vsel %vm924_vm10, %v1250_v35, -inf }
 0x2ca   : > { %1252 = vmax.xlane.f32.xlu0 %v1251_v6 }
 0x2cb   : > { %v1448_v36 = vpop.f32.mrf.mxu2 }
 0x2cc   : > { %v1451_v37 = vsel %vm2330_vm14, -1e+09, %v1448_v36 }
 0x2cd   : > { %v2339_v38 = vmul.f32 0.35355338, %v1451_v37  ;;  %v1381_v46 = vpop.f32.mrf.mxu0 }
 0x2ce   : > { %v1384_v48 = vsel %vm2330_vm14, -1e+09, %v1381_v46 }
 0x2cf   : > { %v1453_v39 = vsel %vm924_vm10, %v2339_v38, -inf  ;;  %v2352_v43 = vmul.f32 0.35355338, %v1384_v48 }
 0x2d0   : > { %1454 = vmax.xlane.f32.xlu1 %v1453_v39 }
 0x2d1   : > { %v1386_v49 = vsel %vm924_vm10, %v2352_v43, -inf }
 0x2da   : > { %967 = vrot.lane.b32.xlu2 %v2276_v40, %s2018_s29 }
 0x2de   : > { %1861 = vrot.lane.b32.xlu0 %v1860_v41, %s2019_s26 }
 0x303   : > { %1320 = vmax.xlane.f32.xlu2 %v1319_v47 }
 0x30b   : > { %1387 = vmax.xlane.f32.xlu2 %v1386_v49 }
 0x32b   : > { %v1025_v51 = vpop.xlane.xlu2 %1024 }
 0x32c   : > { %v1026_v52 = vsub.f32 %v1022_v14, %v1025_v51 }
 0x32d   : > { %v957_v53 = vpop.xlane.xlu0 %956 }
 0x32e   : > { %v1027_v54 = vmul.f32 1.442695, %v1026_v52  ;;  %v958_v55 = vsub.f32 %v954_v17, %v957_v53 }
 0x330   : > { %1881 = vpow2.f32 %v1027_v54  ;;  %v959_v42 = vmul.f32 1.442695, %v958_v55 }
 0x332   : > { %1883 = vpow2.f32 %v959_v42 }
 0x333   : > { %v1159_v56 = vpop.xlane.xlu1 %1158 }
 0x334   : > { %v1160_v57 = vsub.f32 %v1156_v23, %v1159_v56 }
 0x335   : > { %v1092_v58 = vpop.xlane.xlu2 %1091 }
 0x336   : > { %v1882_v59 = vpop.eup %1881  ;;  %v1161_v60 = vmul.f32 1.442695, %v1160_v57  ;;  %v1093_v61 = vsub.f32 %v1089_v27, %v1092_v58 }
 0x337   : > { %v1029_v62 = vsel %vm924_vm10, %v1882_v59, 0.0 }
 0x338   : > { %v1884_v63 = vpop.eup %1883  ;;  %1885 = vpow2.f32 %v1161_v60  ;;  %v1094_v0 = vmul.f32 1.442695, %v1093_v61  ;;  %1030 = vadd.xlane.f32.xlu0 %v1029_v62 }
 0x339   : > { %v961_v1 = vsel %vm924_vm10, %v1884_v63, 0.0 }
 0x33a   : > { %1887 = vpow2.f32 %v1094_v0  ;;  %962 = vadd.xlane.f32.xlu1 %v961_v1 }
 0x33d   : > { %v968_v2 = vpop.permute.xlu2 %967  ;;  %v1253_v3 = vpop.xlane.xlu0 %1252 }
 0x33e   : > { %v2358_v4 = vpop.eup %1885  ;;  %v1254_v5 = vsub.f32 %v1250_v35, %v1253_v3  ;;  %988 = vmatpush.msrb.mxu1 %v968_v2 }
 0x33f   : > { %v1163_v7 = vsel %vm924_vm10, %v2358_v4, 0.0 }
 0x340   : > { %v1888_v8 = vpop.eup %1887  ;;  %v1255_v11 = vmul.f32 1.442695, %v1254_v5  ;;  %1164 = vadd.xlane.f32.xlu2 %v1163_v7  ;;  %v1509_v5 = vld [vmem:[%s2490_s14 + $0x18] sm:$0xff]  ;;  %v1508_v7 = vld [vmem:[%s2490_s14 + $0x10] sm:$0xff] }
 0x341   : > { %v1096_v12 = vsel %vm924_vm10, %v1888_v8, 0.0  ;;  %1529 = vmatpush.msrb.mxu0 %v1509_v5 }
 0x342   : > { %1889 = vpow2.f32 %v1255_v11  ;;  %1097 = vadd.xlane.f32.xlu1 %v1096_v12  ;;  %v1506_v11 = vld [vmem:[%s2490_s14] sm:$0xff]  ;;  %v1542_v12 = vld [vmem:[%s2492_s16 + $0x18] sm:$0xff] }
 0x343   : > { %v1455_v17 = vpop.xlane.xlu1 %1454  ;;  %1530 = vmatpush.msrb.mxu0 %v1508_v7 }
 0x344   : > { %v1456_v18 = vsub.f32 %v2339_v38, %v1455_v17 }
 0x346   : > { %v1457_v19 = vmul.f32 1.442695, %v1456_v18 }
 0x348   : > { %v1890_v13 = vpop.eup %1889  ;;  %1891 = vpow2.f32 %v1457_v19 }
 0x349   : > { %v1257_v14 = vsel %vm924_vm10, %v1890_v13, 0.0 }
 0x34a   : > { %1258 = vadd.xlane.f32.xlu0 %v1257_v14  ;;  %v1540_v14 = vld [vmem:[%s2492_s16 + $0x8] sm:$0xff] }
 0x34e   : > { %v1892_v23 = vpop.eup %1891 }
 0x34f   : > { %v1459_v24 = vsel %vm924_vm10, %v1892_v23, 0.0 }
 0x350   : > { %v2364_v15 = vpop.permute.xlu0 %1861 }
 0x351   : > { %v1863_v16 = vunpack.i.l.bf16 %v2364_v15  ;;  %v1864_v53 = vunpack.i.h.bf16 %v2364_v15  ;;  %v1539_v15 = vld [vmem:[%s2492_s16] sm:$0xff] }
 0x353   : > { %1055 = vmatpush.msrb.mxu3 %v1863_v16 }
 0x358   : > { %1101 = vrot.lane.b32.xlu2 %v2276_v40, %s2020_s23 }
 0x35e   : > { %1263 = vrot.lane.b32.xlu0 %v2284_v50, %s2018_s29 }
 0x366   : > { %1397 = vrot.lane.b32.xlu0 %v2284_v50, %s2020_s23  ;;  %s1933_s23 = scalar_lea.hbm %s2494_s18, 16 }
 0x367   : > { %p1935_p1 = scmp.lt.s32.totalorder %s1933_s23, %s1929_s5 }
 0x369   : > { %p1936_p2 = por %p1935_p1, %p1934_p0 }
 0x36b   : > { %p1937_p3 = pnand %p1936_p2, %p1932_p13 }
 0x376   : > { %v1321_v20 = vpop.xlane.xlu2 %1320 }
 0x377   : > { %v1322_v21 = vsub.f32 %v1318_v45, %v1321_v20 }
 0x379   : > { %v1323_v22 = vmul.f32 1.442695, %v1322_v21 }
 0x37b   : > { %1893 = vpow2.f32 %v1323_v22 }
 0x37e   : > { %v1388_v27 = vpop.xlane.xlu2 %1387 }
 0x37f   : > { %v1389_v34 = vsub.f32 %v2352_v43, %v1388_v27 }
 0x381   : > { %v1894_v25 = vpop.eup %1893  ;;  %1460 = vadd.xlane.f32.xlu2 %v1459_v24 }
 0x382   : > { %v1325_v26 = vsel %vm924_vm10, %v1894_v25, 0.0 }
 0x383   : > { %1326 = vadd.xlane.f32.xlu1 %v1325_v26 }
 0x399   : > { %1464 = vrot.lane.b32.xlu2 %v2284_v50, %s2021_s24  ;;  %v1390_v50 = vmul.f32 1.442695, %v1389_v34 }
 0x39c   : > { %1168 = vrot.lane.b32.xlu1 %v2276_v40, %s2021_s24  ;;  %s2541_s24 = sld [smem:[#allocation25_spill]] }
 0x3ab   : > { %v1031_v28 = vpop.xlane.xlu0 %1030 }
 0x3ac   : > { %1895 = vrcp.f32 %v1031_v28 }
 0x3ad   : > { %v963_v29 = vpop.xlane.xlu1 %962 }
 0x3ae   : > { %1897 = vrcp.f32 %v963_v29 }
 0x3b2   : > { %v1896_v30 = vpop.eup %1895 }
 0x3b3   : > { %v1165_v31 = vpop.xlane.xlu2 %1164  ;;  %v1033_v32 = vmul.f32 %v1896_v30, %v1882_v59 }
 0x3b4   : > { %v1898_v33 = vpop.eup %1897 }
 0x3b5   : > { %v1098_v35 = vpop.xlane.xlu1 %1097  ;;  %1771 = vmatmul.msk.f32.vlgmr.msrb.gmra.mxu3 %vm924_vm10, %v1033_v32  ;;  %v965_v6 = vmul.f32 %v1898_v33, %v1884_v63 }
 0x3b6   : > { %1899 = vrcp.f32 %v1098_v35 }
 0x3b7   : > { %1768 = vmatmul.msk.f32.vlgmr.msrb.gmra.mxu1 %vm924_vm10, %v965_v6  ;;  %1901 = vpow2.f32 %v1390_v50 }
 0x3bb   : > { %v1102_v40 = vpop.permute.xlu2 %1101 }
 0x3bc   : > { %v1900_v36 = vpop.eup %1899  ;;  %1122 = vmatpush.msra.mxu1 %v1102_v40 }
 0x3bd   : > { %v1100_v37 = vmul.f32 %v1900_v36, %v1888_v8  ;;  %v1902_v38 = vpop.eup %1901  ;;  %v1259_v39 = vpop.xlane.xlu0 %1258  ;;  %v1507_v8 = vld [vmem:[%s2490_s14 + $0x8] sm:$0xff] }
 0x3be   : > { %v1392_v41 = vsel %vm924_vm10, %v1902_v38, 0.0  ;;  %1903 = vrcp.f32 %v1259_v39  ;;  %1531 = vmatpush.msrb.mxu0 %v1507_v8 }
 0x3bf   : > { %1774 = vmatmul.msk.f32.vlgmr.msra.gmra.mxu1 %vm924_vm10, %v1100_v37  ;;  %1905 = vrcp.f32 %v1165_v31  ;;  %v1868_v31 = vld [vmem:[%s2542_s22] ss:$0 sm:$0xff] }
 0x3c0   : > { %1532 = vmatpush.msrb.mxu0 %v1506_v11 }
 0x3c4   : > { %v1904_v44 = vpop.eup %1903 }
 0x3c5   : > { %v1261_v45 = vmul.f32 %v1904_v44, %v1890_v13  ;;  %v1906_v49 = vpop.eup %1905  ;;  %v1541_v13 = vld [vmem:[%s2492_s16 + $0x10] sm:$0xff] }
 0x3c6   : > { %1393 = vadd.xlane.f32.xlu1 %v1392_v41  ;;  %v1167_v51 = vmul.f32 %v1906_v49, %v2358_v4 }
 0x3d0   : > { %v1264_v46 = vpop.permute.xlu0 %1263 }
 0x3d1   : > { %1284 = vmatpush.msrb.mxu1 %v1264_v46 }
 0x3d2   : > { %1780 = vmatmul.msk.f32.vlgmr.msrb.gmra.mxu1 %vm924_vm10, %v1261_v45 }
 0x3d8   : > { %v1398_v47 = vpop.permute.xlu0 %1397 }
 0x3d9   : > { %1418 = vmatpush.msra.mxu1 %v1398_v47 }
 0x3db   : > { %1562 = vmatpush.msrb.mxu1 %v1542_v12 }
 0x3dd   : > { %1563 = vmatpush.msrb.mxu1 %v1541_v13 }
 0x3df   : > { %1564 = vmatpush.msrb.mxu1 %v1540_v14 }
 0x3e1   : > { %1565 = vmatpush.msrb.mxu1 %v1539_v15 }
 0x3f4   : > { %v1461_v43 = vpop.xlane.xlu2 %1460 }
 0x3f6   : > { %v1327_v48 = vpop.xlane.xlu1 %1326 }
 0x3f7   : > { %1907 = vrcp.f32 %v1327_v48 }
 0x3f8   : > { %1909 = vrcp.f32 %v1461_v43 }
 0x3fc   : > { %v1465_v54 = vpop.permute.xlu2 %1464 }
 0x3fd   : > { %v1908_v55 = vpop.eup %1907 }
 0x3fe   : > { %v1329_v42 = vmul.f32 %v1908_v55, %v1894_v25  ;;  %v1910_v56 = vpop.eup %1909 }
 0x3ff   : > { %v1463_v57 = vmul.f32 %v1910_v56, %v1892_v23 }
 0x40e   : > { %v1169_v52 = vpop.permute.xlu1 %1168 }
 0x40f   : > { %1189 = vmatpush.msra.mxu3 %v1169_v52 }
 0x410   : > { %1777 = vmatmul.msk.f32.vlgmr.msra.gmra.mxu3 %vm924_vm10, %v1167_v51 }
 0x411   : > { %1351 = vmatpush.msrb.mxu3 %v1864_v53 }
 0x413   : > { %1485 = vmatpush.msra.mxu3 %v1465_v54 }
 0x418   : > { %1783 = vmatmul.msk.f32.vlgmr.msrb.gmra.mxu3 %vm924_vm10, %v1329_v42 }
 0x420   : > { %1789 = vmatmul.msk.f32.vlgmr.msra.gmra.mxu3 %vm924_vm10, %v1463_v57 }
 0x434   : > { %v990_v58 = vpop.f32.mrf.mxu1 }
 0x438   : > { %v1057_v59 = vpop.f32.mrf.mxu3 }
 0x439   : > { %v1394_v60 = vpop.xlane.xlu1 %1393  ;;  %1195 = vrot.lane.b32.xlu1 %v1057_v59, %s2022_s27 }
 0x43a   : > { %1911 = vrcp.f32 %v1394_v60 }
 0x43c   : > { %v1124_v61 = vpop.f32.mrf.mxu1 }
 0x43d   : > { %1199 = vrot.lane.b32.xlu0 %v1124_v61, %s2023_s28 }
 0x440   : > { %v1912_v62 = vpop.eup %1911 }
 0x441   : > { %v1396_v63 = vmul.f32 %v1912_v62, %v1902_v38 }
 0x443   : > { %1786 = vmatmul.msk.f32.vlgmr.msra.gmra.mxu1 %vm924_vm10, %v1396_v63 }
 0x44f   : > { %v1286_v3 = vpop.f32.mrf.mxu1 }
 0x493   : > { %v1191_v0 = vpop.f32.mrf.mxu3 }
 0x49b   : > { %v1353_v1 = vpop.f32.mrf.mxu3 }
 0x49c   : > { %1491 = vrot.lane.b32.xlu0 %v1353_v1, %s2022_s27  ;;  %s1601_s27 = scalar_lea.hbm %s2541_s24, %s1794_s25 }
 0x49d   : > { %s1605_s19 = sshll.u32 %s1601_s27, 4  ;;  %s1606_s19 = int_to_ptr.hbm [resolvable:$true] %s1605_s19 }
 0x4a3   : > { %v1487_v2 = vpop.f32.mrf.mxu3 }
 0x4a4   : > { %1203 = vrot.lane.b32.xlu0 %v1191_v0, %s2024_s20  ;;  %1499 = vrot.lane.b32.xlu1 %v1487_v2, %s2024_s20  ;;  %s2419_s20 = sand.u32 1, %s1999_s30  }
 0x4a5   : > { %s1756_s2 = sshll.u32 %s2419_s20, 3  ;;  %s1572_s4 = scalar_lea.sflag [#allocation3], %s2419_s20 }
 0x4a6   : > { %s658_s0 = scalar_lea.vmem [#allocation2], %s1756_s2  ;;  %s665_s10 = scalar_lea.vmem [#allocation4], %s1756_s2 }
 0x4a7   : > { %s1589_s21 = sshll.u32 %s658_s0, 4  ;;  %s1603_s17 = sshll.u32 %s665_s10, 4  ;;  %s1590_s21 = int_to_ptr.vmem [resolvable:$true] %s1589_s21  ;;  %s1604_s17 = int_to_ptr.vmem [resolvable:$true] %s1603_s17 }
 0x4ab   : > { %v1196_v18 = vpop.permute.xlu1 %1195 }
 0x4ac   : > { %v1206_v19 = vsel %vm924_vm10, %v990_v58, %v1196_v18 }
 0x4af   : > { %v1200_v16 = vpop.permute.xlu0 %1199 }
 0x4b0   : > { %v1208_v20 = vsel %vm1207_vm15, %v1206_v19, %v1200_v16 }
 0x4c0   : > { %v1420_v4 = vpop.f32.mrf.mxu1 }
 0x4c1   : > { %1495 = vrot.lane.b32.xlu2 %v1420_v4, %s2023_s28 }
 0x50e   : > { %v1492_v17 = vpop.permute.xlu0 %1491 }
 0x50f   : > { %v1502_v24 = vsel %vm924_vm10, %v1286_v3, %v1492_v17 }
 0x516   : > { %v1204_v21 = vpop.permute.xlu0 %1203  ;;  %v1500_v26 = vpop.permute.xlu1 %1499 }
 0x517   : > { %v1210_v22 = vsel %vm1209_vm0, %v1208_v20, %v1204_v21 }
 0x518   : > { %v1505_v23 = vadd.f32 %v1210_v22, %v2210_v9  ;;  %v1867_v9 = vld [vmem:[%s2491_s15] ss:$0 sm:$0xff] }
 0x51a   : > { %1790 = vmatmul.msk.f32.vlgmr.msrb.gmra.mxu0 %vm698_vm1, %v1505_v23 }
 0x51b   : > { %v1496_v25 = vpop.permute.xlu2 %1495 }
 0x51c   : > { %v1503_v27 = vsel %vm1207_vm15, %v1502_v24, %v1496_v25 }
 0x51d   : > { %v1504_v28 = vsel %vm1209_vm0, %v1503_v27, %v1500_v26 }
 0x51e   : > { %v1538_v29 = vadd.f32 %v1504_v28, %v2212_v10 }
 0x520   : > { %1791 = vmatmul.msk.f32.vlgmr.msrb.gmra.mxu1 %vm698_vm1, %v1538_v29 }
 0x597   : > { %v1534_v10 = vpop.f32.mrf.mxu0 }
 0x598   : > { %v1535_v30 = vadd.f32 %v1867_v9, %v1534_v10 }
 0x59a   : > { %1537 = vst.msk [vmem:[%s658_s0] sm:$0xff] %vm698_vm1, %v1535_v30 }
 0x59b   : > { %1940 = shalt.err (!%p1937_p3)
}
 0x59c   : > { %1798 = dma.vmem_to_hbm [thread:$0]  (%p2163_p5), %s1590_s21, 128, %s1592_s3, %s1572_s4  }
 0x59d   : > { %v1567_v32 = vpop.f32.mrf.mxu1  ;;  %s1577_s2 = scalar_lea.sflag [#allocation5], %s2419_s20  ;;  %s1955_s0 = sshra.s32 %s1606_s19, 4  ;;  %s1956_s0 = int_to_ptr.hbm [resolvable:$true] %s1955_s0 }
 0x59e   : > { %v1568_v33 = vadd.f32 %v1868_v31, %v1567_v32  ;;  %s1957_s6 = scalar_lea.hbm %s1956_s0, 8  ;;  %s1961_s28 = scalar_lea.hbm %s2541_s24, 16 }
 0x59f   : > { %p1958_p4 = scmp.ne.s32.totalorder %s1956_s0, %s1957_s6  ;;  %p1962_p9 = scmp.lt.s32.totalorder %s1956_s0, %s2541_s24 }
 0x5a0   : > { %1570 = vst.msk [vmem:[%s665_s10] sm:$0xff] %vm698_vm1, %v1568_v33  ;;  %p1963_p10 = scmp.lt.s32.totalorder %s1961_s28, %s1957_s6 }
 0x5a1   : > { %p1959_p7 = pnand %p1958_p4, %p2163_p5 }
 0x5a2   : > { %p1964_p11 = por %p1963_p10, %p1962_p9 }
 0x5a3   : > { %p1960_p8 = pneg %p1959_p7 }
 0x5a5   : > { %p1965_p12 = pnand %p1964_p11, %p1960_p8 }
 0x5a7   : > { %1968 = shalt.err (!%p1965_p12)
}
 0x5a8   : > { %1799 = dma.vmem_to_hbm [thread:$0]  (%p2163_p5), %s1604_s17, 128, %s1606_s19, %s1577_s2  }
 0x5a9 PF: > { %s2543_s20 = sld [smem:[#allocation10_spill]] }
 0x5aa   : > { %s2544_s21 = sld [smem:[#allocation8_spill]] }
 0x5af   : > { %p1809_p13 = scmp.ge.s32.totalorder %s2543_s20, 2 }
 0x5b0   : > { %s1617_s10 = sand.u32 1, %s2544_s21  }
 0x5b1   : > { %p1803_p0 = pnand %p1809_p13, %p2167_p6  ;;  %s1618_s12 = scalar_lea.sflag [#allocation3], %s1617_s10 }
 0x5b3   : > { %p1804_p1 = pneg %p1803_p0 }
 0x5b5   : > { %1986 = dma.done.wait (%p1804_p1), %s1618_s12, 128  }
 0x5b6   : > { %1988 = vsyncadd (%p1804_p1), %s1618_s12, 4294967168  ;;  %s1628_s25 = scalar_lea.sflag [#allocation5], %s1617_s10 }
 0x5b7   : > { %1990 = dma.done.wait (%p1804_p1), %s1628_s25, 128  }
 0x5b8   : > { %1992 = vsyncadd (%p1804_p1), %s1628_s25, 4294967168  ;;  %s2546_s21 = sld [smem:[#allocation11_spill]]  ;;  %s2549_s0 = smov %s1999_s30 }
 0x5b9   : > { %s2547_s26 = sld [smem:[#allocation9_spill]] }
 0x5ba   : > { %s2548_s20 = sld [smem:[#allocation12_spill]] }
 0x5be   : > { %p33_p5 = scmp.ge.s32.totalorder %s2546_s21, 4  }
 0x5bf   : > { %s2550_s30 = smov %s2547_s26 }
 0x5c0   :  { %35 = sbr.rel (!%p33_p5) target bundleno = 17 (0x11), region = 159 }
 0x5c5   :  { %1634 = vsyncpa [#allocation3], 1 }
 0x5c6   :  { %1636 = vsyncpa [#allocation3 + $0x1], 1 }
 0x5c7   :  { %1637 = vsyncpa [#allocation5], 1 }
 0x5c8   :  { %1639 = vsyncpa [#allocation5 + $0x1], 1 }

// kernel: single_block_forward.6
= control target key start
LH: loop header
LB: loop body
LE: loop exit
PB: predicated region body
PF: predicated region fallthrough
CT: control target
= control target key end

     0   :  { %s1771_s24 = smov 0   ;;  %s2034_s0 = inlined_call_operand.vmem [shape: f32[2,8,32], index: 0, kind: input, shape index: {}]   ;;  %s2035_s1 = inlined_call_operand.vmem [shape: f32[2,8,32], index: 1, kind: input, shape index: {}]   ;;  %s2036_s2 = inlined_call_operand.vmem [shape: f32[2,8,1], index: 2, kind: input, shape index: {}]   ;;  %s2037_s3 = inlined_call_operand.vmem [shape: f32[2,1,8], index: 3, kind: input, shape index: {}]   ;;  %s2038_s4 = inlined_call_operand.vmem [shape: f32[2,8,1], index: 4, kind: input, shape index: {}]   ;;  %s2039_s5 = inlined_call_operand.vmem [shape: f32[2,1,8], index: 5, kind: input, shape index: {}]   ;;  %s2040_s6 = inlined_call_operand.vmem [shape: f32[32,96], index: 6, kind: input, shape index: {}]   ;;  %s2041_s7 = inlined_call_operand.vmem [shape: f32[1,96], index: 7, kind: input, shape index: {}]   ;;  %s2042_s8 = inlined_call_operand.vmem [shape: f32[32,96], index: 8, kind: input, shape index: {}]   ;;  %s2043_s9 = inlined_call_operand.vmem [shape: f32[1,96], index: 9, kind: input, shape index: {}]   ;;  %s2044_s10 = inlined_call_operand.vmem [shape: f32[32,32], index: 10, kind: input, shape index: {}]   ;;  %s2045_s11 = inlined_call_operand.vmem [shape: f32[32,32], index: 11, kind: input, shape index: {}]   ;;  %s2046_s12 = inlined_call_operand.vmem [shape: f32[1,32], index: 12, kind: input, shape index: {}]   ;;  %s2047_s13 = inlined_call_operand.vmem [shape: f32[32,32], index: 13, kind: input, shape index: {}]   ;;  %s2048_s14 = inlined_call_operand.vmem [shape: f32[32,32], index: 14, kind: input, shape index: {}]   ;;  %s2049_s15 = inlined_call_operand.vmem [shape: f32[1,32], index: 15, kind: input, shape index: {}]   ;;  %s2050_s16 = inlined_call_operand.vmem [shape: f32[2,8,32], index: 16, kind: output, shape index: {0}]   ;;  %s2051_s17 = inlined_call_operand.vmem [shape: f32[2,8,32], index: 17, kind: output, shape index: {1}]  }
   0x1   :  { %2052 = sst [smem:[#allocation2_spill]] %s2034_s0 }
   0x2   :  { %2053 = sst [smem:[#allocation3_spill]] %s2035_s1 }
   0x3   :  { %2054 = sst [smem:[#allocation4_spill]] %s2037_s3 }
   0x4   :  { %2055 = sst [smem:[#allocation5_spill]] %s2040_s6 }
   0x5 LB: > { %s1550_s25 = sadd.s32 4294967295, %s1664_s24   ;;  %p1554_p0 = scmp.ge.s32.totalorder %s1664_s24, 1  ;;  %s1664_s24 = sphi %s1771_s24, %s28_s24  }
   0x6   : > { %p532_p1 = scmp.lt.s32.totalorder %s1664_s24, 3 }
   0x8   : > { %p533_p2 = pnand %p1554_p0, %p532_p1 }
   0x9   : > { %s2056_s6 = sld [smem:[#allocation5_spill]] (!%p533_p2)  ;;  %p604_p3 = scmp.lt.s32.totalorder (!%p533_p2), %s1550_s25, 1 }
   0xa   : > { %536 = sbr.rel (%p533_p2) target bundleno = 1559 (0x617), region = 84  ;;  %s2057_s3 = sld [smem:[#allocation4_spill]] (!%p533_p2) }
   0xb   : > { %s2058_s20 = sld [smem:[#allocation2_spill]] (!%p533_p2)  ;;  %s1667_s22 = smov (!%p533_p2), 120  }
   0xc   : > { %s2059_s26 = sld [smem:[#allocation3_spill]] (!%p533_p2)  ;;  %s1668_s23 = smov (!%p533_p2), 64  }
   0xd   : > { %s1671_s28 = smov (!%p533_p2), 88   ;;  %s1672_s0 = smov (!%p533_p2), 112  }
   0xe   : > { %s1679_s1 = smov (!%p533_p2), 24  }
   0xf   : > { %v640_v0 = vld [vmem:[%s2056_s6 + $0x18] sm:$0xff]  ;;  %v639_v2 = vld [vmem:[%s2056_s6 + $0x10] sm:$0xff]  ;;  %v638_v4 = vld [vmem:[%s2056_s6 + $0x8] sm:$0xff]  ;;  %s2065_s25 = smov (!%p604_p3, %s1550_s25), 1  ;;  %v1666_v6 = vmov 0   ;;  %vm645_vm0 = vcmask 261120  }
  0x10   : > { %v680_v1 = vld [vmem:[%s2042_s8 + $0x18] sm:$0xff]  ;;  %661 = vmatpush.msra.mxu0 %v640_v0  ;;  %v679_v3 = vld [vmem:[%s2042_s8 + $0x10] sm:$0xff]  ;;  %v678_v5 = vld [vmem:[%s2042_s8 + $0x8] sm:$0xff]  ;;  %1616 = vset.pattern.permute.xlu0 %v1666_v6  ;;  %s1803_s29 = sshll.u32 %s2065_s25, 3  ;;  %s618_s18 = scalar_lea.vmem %s2057_s3, %s2065_s25  ;;  %vm722_vm3 = vcmask 64512   ;;  %vm1004_vm6 = vcmask 130048  }
  0x11   : > { %700 = vmatpush.msra.mxu1 %v680_v1  ;;  %v637_v7 = vld [vmem:[%s2056_s6] sm:$0xff]  ;;  %s607_s21 = scalar_lea.vmem %s2058_s20, %s1803_s29  ;;  %s625_s30 = scalar_lea.vmem %s2039_s5, %s2065_s25  ;;  %vm1006_vm7 = vcmask 195584  }
  0x12   : > { %662 = vmatpush.msra.mxu0 %v639_v2  ;;  %v677_v8 = vld [vmem:[%s2042_s8] sm:$0xff]  ;;  %s611_s27 = scalar_lea.vmem %s2059_s26, %s1803_s29  ;;  %s615_s19 = scalar_lea.vmem %s2036_s2, %s1803_s29 }
  0x13   : > { %701 = vmatpush.msra.mxu1 %v679_v3  ;;  %v715_v9 = vld [vmem:[%s618_s18] sm:$0x1]  ;;  %s622_s6 = scalar_lea.vmem %s2038_s4, %s1803_s29  ;;  %s1669_s26 = smov 96  }
  0x14   : > { %663 = vmatpush.msra.mxu0 %v638_v4  ;;  %v1816_v10 = vld [vmem:[%s607_s21] sm:$0xff]  ;;  %vm716_vm1 = vcmp.eq.f32.partialorder %v715_v9, 0.0  ;;  %s1675_s25 = smov 56   ;;  %s1676_s3 = smov 40  }
  0x15   : > { %702 = vmatpush.msra.mxu1 %v678_v5  ;;  %v1818_v11 = vld [vmem:[%s611_s27] sm:$0xff]  ;;  %v636_v12 = vmax.f32 %v1816_v10, 0.0  ;;  %v1829_v15 = vsel %vm716_vm1, 1, %v1666_v6  ;;  %s1670_s27 = smov 72   ;;  %s1678_s18 = smov 8  }
  0x16   : > { %664 = vmatpush.msra.mxu0 %v637_v7  ;;  %v676_v13 = vmax.f32 %v1818_v11, 0.0  ;;  %v717_v14 = vld [vmem:[%s625_s30] sm:$0x1]  ;;  %s1673_s30 = smov 104   ;;  %v1035_v0 = vperm.slane %v1829_v15, 0  ;;  %s1680_s20 = smov 16  }
  0x17   : > { %703 = vmatpush.msra.mxu1 %v677_v8  ;;  %v669_v16 = vld [vmem:[%s615_s19] sm:$0xff]  ;;  %vm718_vm2 = vcmp.eq.f32.partialorder %v717_v14, 0.0  ;;  %1561 = vmatmul.msk.f32.vlgmr.msra.gmra.mxu0 %vm645_vm0, %v636_v12  ;;  %s1674_s19 = smov 80  }
  0x18   : > { %672 = vperm.xlu0 %1616, %v669_v16   ;;  %1562 = vmatmul.msk.f32.vlgmr.msra.gmra.mxu1 %vm645_vm0, %v676_v13  ;;  %v748_v17 = vsel %vm718_vm2, 1, %v1666_v6  ;;  %v708_v18 = vld [vmem:[%s622_s6] sm:$0xff]  ;;  %vm1898_vm5 = vcmp.eq.s32.totalorder %v1035_v0, 1  ;;  %s1677_s6 = smov 48  }
  0x19   : > { %v1622_v20 = vld [vmem:[%s2041_s7] ss:$0 sm:$0xff]  ;;  %v749_v34 = vperm.slane %v748_v17, 0 }
  0x1a   : > { %v1623_v21 = vld [vmem:[%s2043_s9] ss:$0 sm:$0xff] }
  0x1b   : > { %vm1867_vm4 = vcmp.eq.s32.totalorder %v749_v34, 1 }
  0x20   : > { %711 = vperm.xlu0 %1616, %v708_v18  }
  0x8a   : > { %v673_v19 = vpop.permute.xlu0 %672 }
  0x92   : > { %v712_v22 = vpop.permute.xlu0 %711 }
  0x94   : > { %v666_v23 = vpop.f32.mrf.mxu0 }
  0x95   : > { %v705_v24 = vpop.f32.mrf.mxu1  ;;  %v667_v25 = vadd.f32 %v1622_v20, %v666_v23 }
  0x96   : > { %v706_v26 = vadd.f32 %v1623_v21, %v705_v24 }
  0x97   : > { %v1843_v27 = vmul.f32 %v673_v19, %v667_v25 }
  0x98   : > { %v1845_v28 = vmul.f32 %v712_v22, %v706_v26 }
  0x99   : > { %720 = vrot.lane.b32.xlu1 %v1843_v27, %s1669_s26 }
  0x9a   : > { %792 = vrot.lane.b32.xlu0 %v1845_v28, %s1667_s22  ;;  %764 = vrot.lane.b32.xlu2 %v1845_v28, %s1668_s23 }
  0x9b   : > { %1563 = vmatpush.xpose.msk.msra.mxu2 %vm722_vm3, %v1845_v28 }
  0xa2   : > { %924 = vrot.lane.b32.xlu2 %v1843_v27, %s1670_s27  ;;  %790 = vrot.lane.b32.xlu0 %v1843_v27, %s1671_s28 }
  0xaa   : > { %859 = vrot.lane.b32.xlu2 %v1845_v28, %s1672_s0  ;;  %926 = vrot.lane.b32.xlu0 %v1845_v28, %s1673_s30 }
  0xb2   : > { %1078 = vrot.lane.b32.xlu0 %v1843_v27, %s1667_s22 }
  0xba   : > { %1076 = vrot.lane.b32.xlu0 %v1845_v28, %s1671_s28 }
  0xc2   : > { %1210 = vrot.lane.b32.xlu0 %v1845_v28, %s1670_s27 }
  0xca   : > { %1145 = vrot.lane.b32.xlu0 %v1843_v27, %s1672_s0  ;;  %s633_s0 = scalar_lea.vmem %s2051_s17, %s1803_s29 }
  0xf4   : > { %v765_v29 = vpop.permute.xlu2 %764 }
  0xf5   : > { %785 = vmatpush.msra.mxu3 %v765_v29  ;;  %v1617_v29 = vpack.i.bf16 %v1843_v27, %v1845_v28 }
  0xfc   : > { %v925_v30 = vpop.permute.xlu2 %924 }
 0x104   : > { %v860_v31 = vpop.permute.xlu2 %859 }
 0x105   : > { %1569 = vmatpush.xpose.msk.msrb.mxu0 %vm722_vm3, %v860_v31 }
 0x109   : > { %1575 = vmatpush.xpose.msk.msra.mxu0 %vm722_vm3, %v1843_v27 }
 0x10b   : > { %v721_v33 = vpop.permute.xlu1 %720 }
 0x10c   : > { %v793_v32 = vpop.permute.xlu0 %792  ;;  %1564 = vmatmul.msk.f32.vlgmr.msra.gmra.mxu2 %vm722_vm3, %v721_v33 }
 0x10d   : > { %1566 = vmatpush.xpose.msk.msrb.mxu3 %vm722_vm3, %v793_v32 }
 0x114   : > { %v791_v45 = vpop.permute.xlu0 %790 }
 0x11c   : > { %v927_v46 = vpop.permute.xlu0 %926 }
 0x124   : > { %v1079_v47 = vpop.permute.xlu0 %1078 }
 0x12c   : > { %v1077_v48 = vpop.permute.xlu0 %1076 }
 0x134   : > { %v1211_v49 = vpop.permute.xlu0 %1210 }
 0x13c   : > { %v1146_v54 = vpop.permute.xlu0 %1145 }
 0x18f   : > { %v745_v36 = vpop.f32.mrf.mxu2 }
 0x190   : > { %v751_v37 = vsel %vm1867_vm4, -1e+09, %v745_v36 }
 0x191   : > { %v752_v38 = vmul.f32 0.35355338, %v751_v37 }
 0x193   : > { %v753_v39 = vsel %vm722_vm3, %v752_v38, -inf }
 0x194   : > { %754 = vmax.xlane.f32.xlu1 %v753_v39 }
 0x1ad   : > { %1212 = vrot.lane.b32.xlu1 %v1843_v27, %s1673_s30 }
 0x207   : > { %v755_v40 = vpop.xlane.xlu1 %754 }
 0x208   : > { %v756_v41 = vsub.f32 %v752_v38, %v755_v40 }
 0x20a   : > { %v757_v42 = vmul.f32 1.442695, %v756_v41 }
 0x20c   : > { %1626 = vpow2.f32 %v757_v42 }
 0x212   : > { %v1627_v43 = vpop.eup %1626 }
 0x213   : > { %v759_v44 = vsel %vm722_vm3, %v1627_v43, 0.0 }
 0x214   : > { %760 = vadd.xlane.f32.xlu2 %v759_v44 }
 0x21f   : > { %v1213_v57 = vpop.permute.xlu1 %1212 }
 0x22c   : > { %857 = vrot.lane.b32.xlu2 %v1843_v27, %s1674_s19 }
 0x234   : > { %1008 = vrot.lane.b32.xlu2 %v1845_v28, %s1669_s26 }
 0x23c   : > { %1143 = vrot.lane.b32.xlu2 %v1845_v28, %s1674_s19 }
 0x287   : > { %v761_v50 = vpop.xlane.xlu2 %760 }
 0x288   : > { %1628 = vrcp.f32 %v761_v50 }
 0x28e   : > { %v1629_v51 = vpop.eup %1628 }
 0x28f   : > { %v858_v52 = vpop.permute.xlu2 %857  ;;  %v763_v53 = vmul.f32 %v1629_v51, %v1627_v43 }
 0x290   : > { %1570 = vmatmul.msk.f32.vlgmr.msrb.gmra.mxu0 %vm722_vm3, %v858_v52 }
 0x291   : > { %1581 = vmatpush.xpose.msk.msrb.mxu0 %vm722_vm3, %v1146_v54  ;;  %1565 = vmatmul.msk.f32.vlgmr.msra.gmra.mxu3 %vm722_vm3, %v763_v53 }
 0x292   : > { %1572 = vmatpush.xpose.msk.msra.mxu3 %vm722_vm3, %v927_v46 }
 0x297   : > { %v1009_v55 = vpop.permute.xlu2 %1008 }
 0x298   : > { %1576 = vmatmul.msk.f32.vlgmr.msra.gmra.mxu0 %vm722_vm3, %v1009_v55 }
 0x299   : > { %1567 = vmatmul.msk.f32.vlgmr.msrb.gmra.mxu3 %vm722_vm3, %v791_v45 }
 0x29a   : > { %1578 = vmatpush.xpose.msk.msrb.mxu3 %vm722_vm3, %v1079_v47 }
 0x29f   : > { %v1144_v56 = vpop.permute.xlu2 %1143 }
 0x2a0   : > { %1582 = vmatmul.msk.f32.vlgmr.msrb.gmra.mxu0 %vm722_vm3, %v1144_v56 }
 0x2a1   : > { %1573 = vmatmul.msk.f32.vlgmr.msra.gmra.mxu3 %vm722_vm3, %v925_v30 }
 0x2a2   : > { %1584 = vmatpush.xpose.msk.msra.mxu3 %vm722_vm3, %v1213_v57 }
 0x2a9   : > { %1579 = vmatmul.msk.f32.vlgmr.msrb.gmra.mxu3 %vm722_vm3, %v1077_v48 }
 0x2b1   : > { %1585 = vmatmul.msk.f32.vlgmr.msra.gmra.mxu3 %vm722_vm3, %v1211_v49 }
 0x30d   : > { %v882_v58 = vpop.f32.mrf.mxu0 }
 0x30e   : > { %v885_v59 = vsel %vm1867_vm4, -1e+09, %v882_v58 }
 0x30f   : > { %v886_v60 = vmul.f32 0.35355338, %v885_v59 }
 0x311   : > { %v887_v61 = vsel %vm722_vm3, %v886_v60, -inf }
 0x312   : > { %888 = vmax.xlane.f32.xlu1 %v887_v61 }
 0x314   : > { %v1895_v62 = vpop.f32.mrf.mxu3 }
 0x315   : > { %v1031_v63 = vpop.f32.mrf.mxu0 }
 0x316   : > { %v1037_v9 = vsel %vm1898_vm5, -1e+09, %v1031_v63 }
 0x317   : > { %v1038_v13 = vmul.f32 0.35355338, %v1037_v9 }
 0x319   : > { %v1039_v17 = vsel %vm722_vm3, %v1038_v13, -inf }
 0x31c   : > { %v815_v1 = vpop.f32.mrf.mxu3 }
 0x31d   : > { %v818_v3 = vsel %vm1867_vm4, -1e+09, %v815_v1  ;;  %v1168_v4 = vpop.f32.mrf.mxu0 }
 0x31e   : > { %v819_v5 = vmul.f32 0.35355338, %v818_v3  ;;  %v1171_v6 = vsel %vm1898_vm5, -1e+09, %v1168_v4 }
 0x31f   : > { %v1906_v7 = vmul.f32 0.35355338, %v1171_v6 }
 0x320   : > { %v820_v8 = vsel %vm722_vm3, %v819_v5, -inf }
 0x321   : > { %821 = vmax.xlane.f32.xlu0 %v820_v8  ;;  %v1173_v12 = vsel %vm722_vm3, %v1906_v7, -inf }
 0x322   : > { %1174 = vmax.xlane.f32.xlu2 %v1173_v12 }
 0x324   : > { %v949_v14 = vpop.f32.mrf.mxu3 }
 0x325   : > { %v952_v15 = vsel %vm1867_vm4, -1e+09, %v949_v14 }
 0x326   : > { %v953_v16 = vmul.f32 0.35355338, %v952_v15 }
 0x328   : > { %v954_v18 = vsel %vm722_vm3, %v953_v16, -inf }
 0x329   : > { %1040 = vmax.xlane.f32.xlu0 %v1039_v17 }
 0x32a   : > { %955 = vmax.xlane.f32.xlu2 %v954_v18 }
 0x32c   : > { %v1101_v19 = vpop.f32.mrf.mxu3 }
 0x32d   : > { %v1104_v20 = vsel %vm1898_vm5, -1e+09, %v1101_v19 }
 0x32e   : > { %v1105_v21 = vmul.f32 0.35355338, %v1104_v20 }
 0x330   : > { %v1106_v22 = vsel %vm722_vm3, %v1105_v21, -inf }
 0x332   : > { %1107 = vmax.xlane.f32.xlu2 %v1106_v22 }
 0x334   : > { %v1235_v23 = vpop.f32.mrf.mxu3 }
 0x335   : > { %v1238_v24 = vsel %vm1898_vm5, -1e+09, %v1235_v23 }
 0x336   : > { %v1239_v25 = vmul.f32 0.35355338, %v1238_v24 }
 0x338   : > { %v1240_v26 = vsel %vm722_vm3, %v1239_v25, -inf }
 0x339   : > { %1241 = vmax.xlane.f32.xlu1 %v1240_v26 }
 0x34a   : > { %1618 = vrot.lane.b32.xlu2 %v1617_v29, %s1675_s25 }
 0x385   : > { %v889_v30 = vpop.xlane.xlu1 %888 }
 0x386   : > { %v890_v31 = vsub.f32 %v886_v60, %v889_v30 }
 0x388   : > { %v891_v32 = vmul.f32 1.442695, %v890_v31 }
 0x38a   : > { %1630 = vpow2.f32 %v891_v32 }
 0x390   : > { %v1925_v33 = vpop.eup %1630 }
 0x391   : > { %v893_v34 = vsel %vm722_vm3, %v1925_v33, 0.0 }
 0x392   : > { %894 = vadd.xlane.f32.xlu0 %v893_v34 }
 0x394   : > { %v822_v35 = vpop.xlane.xlu0 %821 }
 0x395   : > { %v823_v36 = vsub.f32 %v819_v5, %v822_v35  ;;  %v1175_v37 = vpop.xlane.xlu2 %1174 }
 0x396   : > { %v1176_v55 = vsub.f32 %v1906_v7, %v1175_v37 }
 0x397   : > { %v824_v38 = vmul.f32 1.442695, %v823_v36 }
 0x398   : > { %v1177_v56 = vmul.f32 1.442695, %v1176_v55 }
 0x399   : > { %1632 = vpow2.f32 %v824_v38 }
 0x39c   : > { %v1041_v39 = vpop.xlane.xlu0 %1040 }
 0x39d   : > { %v1042_v40 = vsub.f32 %v1038_v13, %v1041_v39  ;;  %v956_v41 = vpop.xlane.xlu2 %955 }
 0x39e   : > { %v957_v57 = vsub.f32 %v953_v16, %v956_v41  ;;  %v1355_v41 = vld [vmem:[%s2047_s13 + $0x18] sm:$0xff] }
 0x39f   : > { %v1633_v42 = vpop.eup %1632  ;;  %v1043_v43 = vmul.f32 1.442695, %v1042_v40  ;;  %v1359_v40 = vld [vmem:[%s2048_s14 + $0x18] sm:$0xff] }
 0x3a0   : > { %v826_v44 = vsel %vm722_vm3, %v1633_v42, 0.0  ;;  %v958_v59 = vmul.f32 1.442695, %v957_v57  ;;  %1375 = vmatpush.msrb.mxu3 %v1359_v40 }
 0x3a1   : > { %1634 = vpow2.f32 %v1043_v43  ;;  %827 = vadd.xlane.f32.xlu0 %v826_v44  ;;  %v1354_v43 = vld [vmem:[%s2047_s13 + $0x10] sm:$0xff]  ;;  %v1357_v44 = vld [vmem:[%s2048_s14 + $0x8] sm:$0xff] }
 0x3a5   : > { %v1108_v45 = vpop.xlane.xlu2 %1107 }
 0x3a6   : > { %v1109_v61 = vsub.f32 %v1105_v21, %v1108_v45  ;;  %v1353_v45 = vld [vmem:[%s2047_s13 + $0x8] sm:$0xff] }
 0x3a7   : > { %v1930_v46 = vpop.eup %1634 }
 0x3a8   : > { %v1045_v47 = vsel %vm722_vm3, %v1930_v46, 0.0  ;;  %v1110_v63 = vmul.f32 1.442695, %v1109_v61 }
 0x3a9   : > { %1046 = vadd.xlane.f32.xlu1 %v1045_v47  ;;  %v1352_v47 = vld [vmem:[%s2047_s13] sm:$0xff] }
 0x3ac   : > { %v1242_v48 = vpop.xlane.xlu1 %1241 }
 0x3ad   : > { %v1243_v49 = vsub.f32 %v1239_v25, %v1242_v48  ;;  %v1619_v50 = vpop.permute.xlu2 %1618  ;;  %v1299_v48 = vld [vmem:[%s2045_s11 + $0x18] sm:$0xff] }
 0x3ae   : > { %v1620_v51 = vunpack.i.l.bf16 %v1619_v50  ;;  %v1621_v7 = vunpack.i.h.bf16 %v1619_v50  ;;  %v1298_v50 = vld [vmem:[%s2045_s11 + $0x10] sm:$0xff]  ;;  %1315 = vmatpush.msra.mxu0 %v1299_v48 }
 0x3af   : > { %v1244_v52 = vmul.f32 1.442695, %v1243_v49  ;;  %v1295_v49 = vld [vmem:[%s2044_s10 + $0x18] sm:$0xff] }
 0x3b0   : > { %852 = vmatpush.msrb.mxu2 %v1620_v51  ;;  %v1294_v51 = vld [vmem:[%s2044_s10 + $0x10] sm:$0xff]  ;;  %1316 = vmatpush.msra.mxu0 %v1298_v50 }
 0x3b1   : > { %1636 = vpow2.f32 %v1244_v52  ;;  %v1293_v52 = vld [vmem:[%s2044_s10 + $0x8] sm:$0xff] }
 0x3b2   : > { %1638 = vpow2.f32 %v1177_v56 }
 0x3b3   : > { %1640 = vpow2.f32 %v958_v59 }
 0x3b4   : > { %1642 = vpow2.f32 %v1110_v63 }
 0x3b5   : > { %965 = vrot.lane.b32.xlu0 %v1845_v28, %s1676_s3 }
 0x3b7   : > { %v1935_v53 = vpop.eup %1636 }
 0x3b8   : > { %v1246_v54 = vsel %vm722_vm3, %v1935_v53, 0.0  ;;  %v1639_v58 = vpop.eup %1638 }
 0x3b9   : > { %1247 = vadd.xlane.f32.xlu2 %v1246_v54  ;;  %v1179_v60 = vsel %vm722_vm3, %v1639_v58, 0.0  ;;  %v1641_v0 = vpop.eup %1640  ;;  %v1292_v54 = vld [vmem:[%s2044_s10] sm:$0xff] }
 0x3ba   : > { %v960_v1 = vsel %vm722_vm3, %v1641_v0, 0.0  ;;  %v1643_v2 = vpop.eup %1642 }
 0x3c2   : > { %898 = vrot.lane.b32.xlu1 %v1845_v28, %s1677_s6  ;;  %v1112_v28 = vsel %vm722_vm3, %v1643_v2, 0.0 }
 0x3df   : > { %1180 = vadd.xlane.f32.xlu0 %v1179_v60 }
 0x3ec   : > { %961 = vadd.xlane.f32.xlu1 %v960_v1 }
 0x3f4   : > { %1113 = vadd.xlane.f32.xlu1 %v1112_v28 }
 0x405   : > { %v895_v3 = vpop.xlane.xlu0 %894 }
 0x40d   : > { %1050 = vrot.lane.b32.xlu1 %v1843_v27, %s1668_s23 }
 0x414   : > { %v828_v4 = vpop.xlane.xlu0 %827 }
 0x415   : > { %1644 = vrcp.f32 %v828_v4  ;;  %1251 = vrot.lane.b32.xlu1 %v1843_v27, %s1676_s3 }
 0x416   : > { %1646 = vrcp.f32 %v895_v3  ;;  %v1624_v3 = vld [vmem:[%s2049_s15] ss:$0 sm:$0xff] }
 0x41b   : > { %v1645_v5 = vpop.eup %1644 }
 0x41c   : > { %v830_v6 = vmul.f32 %v1645_v5, %v1633_v42  ;;  %v1047_v9 = vpop.xlane.xlu1 %1046  ;;  %v1647_v12 = vpop.eup %1646  ;;  %v1358_v42 = vld [vmem:[%s2048_s14 + $0x10] sm:$0xff] }
 0x41d   : > { %1184 = vrot.lane.b32.xlu1 %v1843_v27, %s1677_s6  ;;  %v897_v14 = vmul.f32 %v1647_v12, %v1925_v33  ;;  %1376 = vmatpush.msrb.mxu3 %v1358_v42  ;;  %s629_s6 = scalar_lea.vmem %s2050_s16, %s1803_s29 }
 0x41e   : > { %1568 = vmatmul.msk.f32.vlgmr.msrb.gmra.mxu2 %vm722_vm3, %v830_v6 }
 0x41f   : > { %1377 = vmatpush.msrb.mxu3 %v1357_v44 }
 0x427   : > { %v966_v8 = vpop.permute.xlu0 %965 }
 0x428   : > { %986 = vmatpush.msra.mxu2 %v966_v8 }
 0x42a   : > { %1138 = vmatpush.msrb.mxu2 %v1621_v7  ;;  %v1625_v7 = vld [vmem:[%s2046_s12] ss:$0 sm:$0xff] }
 0x42c   : > { %v1248_v20 = vpop.xlane.xlu2 %1247 }
 0x434   : > { %v899_v13 = vpop.permute.xlu1 %898 }
 0x435   : > { %919 = vmatpush.msrb.mxu1 %v899_v13 }
 0x436   : > { %1571 = vmatmul.msk.f32.vlgmr.msrb.gmra.mxu1 %vm722_vm3, %v897_v14 }
 0x452   : > { %v1181_v24 = vpop.xlane.xlu0 %1180 }
 0x45f   : > { %v962_v15 = vpop.xlane.xlu1 %961 }
 0x460   : > { %1648 = vrcp.f32 %v962_v15 }
 0x466   : > { %v1649_v16 = vpop.eup %1648 }
 0x467   : > { %v964_v17 = vmul.f32 %v1649_v16, %v1641_v0  ;;  %v1114_v27 = vpop.xlane.xlu1 %1113 }
 0x468   : > { %1650 = vrcp.f32 %v1114_v27 }
 0x469   : > { %1574 = vmatmul.msk.f32.vlgmr.msra.gmra.mxu2 %vm722_vm3, %v964_v17  ;;  %1652 = vrcp.f32 %v1047_v9 }
 0x46a   : > { %1654 = vrcp.f32 %v1248_v20 }
 0x46b   : > { %1656 = vrcp.f32 %v1181_v24 }
 0x46e   : > { %v1651_v18 = vpop.eup %1650 }
 0x46f   : > { %v1116_v19 = vmul.f32 %v1651_v18, %v1643_v2  ;;  %v1653_v21 = vpop.eup %1652 }
 0x470   : > { %v1049_v22 = vmul.f32 %v1653_v21, %v1930_v46  ;;  %v1655_v25 = vpop.eup %1654  ;;  %v1356_v46 = vld [vmem:[%s2048_s14] sm:$0xff] }
 0x471   : > { %1580 = vmatmul.msk.f32.vlgmr.msrb.gmra.mxu2 %vm722_vm3, %v1116_v19  ;;  %v1250_v26 = vmul.f32 %v1655_v25, %v1935_v53  ;;  %v1657_v30 = vpop.eup %1656  ;;  %1378 = vmatpush.msrb.mxu3 %v1356_v46  ;;  %v1296_v53 = vld [vmem:[%s2045_s11] sm:$0xff] }
 0x472   : > { %v1183_v31 = vmul.f32 %v1657_v30, %v1639_v58 }
 0x47f   : > { %v1051_v23 = vpop.permute.xlu1 %1050 }
 0x480   : > { %1071 = vmatpush.msra.mxu1 %v1051_v23 }
 0x481   : > { %1577 = vmatmul.msk.f32.vlgmr.msra.gmra.mxu1 %vm722_vm3, %v1049_v22 }
 0x487   : > { %v1252_v29 = vpop.permute.xlu1 %1251 }
 0x488   : > { %1272 = vmatpush.msra.mxu2 %v1252_v29 }
 0x489   : > { %1586 = vmatmul.msk.f32.vlgmr.msra.gmra.mxu2 %vm722_vm3, %v1250_v26 }
 0x48a   : > { %1398 = vmatpush.msrb.mxu2 %v1355_v41 }
 0x48c   : > { %1399 = vmatpush.msrb.mxu2 %v1354_v43 }
 0x48e   : > { %1400 = vmatpush.msrb.mxu2 %v1353_v45 }
 0x48f   : > { %v1185_v32 = vpop.permute.xlu1 %1184 }
 0x490   : > { %1205 = vmatpush.msrb.mxu1 %v1185_v32  ;;  %1401 = vmatpush.msrb.mxu2 %v1352_v47 }
 0x491   : > { %1583 = vmatmul.msk.f32.vlgmr.msrb.gmra.mxu1 %vm722_vm3, %v1183_v31  ;;  %1590 = vmatmul.msk.f32.vlgmr.msrb.gmra.mxu2 %vm645_vm0, %v1818_v11  ;;  %v1297_v11 = vld [vmem:[%s2045_s11 + $0x8] sm:$0xff] }
 0x492   : > { %1338 = vmatpush.msra.mxu1 %v1295_v49  ;;  %1317 = vmatpush.msra.mxu0 %v1297_v11 }
 0x494   : > { %1339 = vmatpush.msra.mxu1 %v1294_v51  ;;  %1318 = vmatpush.msra.mxu0 %v1296_v53 }
 0x496   : > { %1340 = vmatpush.msra.mxu1 %v1293_v52 }
 0x498   : > { %1341 = vmatpush.msra.mxu1 %v1292_v54 }
 0x499   : > { %1588 = vmatmul.msk.f32.vlgmr.msra.gmra.mxu1 %vm645_vm0, %v1816_v10 }
 0x4a1   : > { %v854_v33 = vpop.f32.mrf.mxu2 }
 0x4b3   : > { %v921_v36 = vpop.f32.mrf.mxu1 }
 0x4ec   : > { %v988_v34 = vpop.f32.mrf.mxu2 }
 0x4f4   : > { %v1140_v35 = vpop.f32.mrf.mxu2 }
 0x4f5   : > { %1278 = vrot.lane.b32.xlu2 %v1140_v35, %s1678_s18 }
 0x4fd   : > { %1000 = vrot.lane.b32.xlu2 %v988_v34, %s1679_s1 }
 0x4fe   : > { %v1073_v37 = vpop.f32.mrf.mxu1 }
 0x50c   : > { %v1274_v38 = vpop.f32.mrf.mxu2 }
 0x50d   : > { %1286 = vrot.lane.b32.xlu0 %v1274_v38, %s1679_s1 }
 0x50e   : > { %v1207_v39 = vpop.f32.mrf.mxu1 }
 0x50f   : > { %1282 = vrot.lane.b32.xlu1 %v1207_v39, %s1680_s20 }
 0x514   : > { %v1403_v28 = vpop.f32.mrf.mxu2 }
 0x517   : > { %992 = vrot.lane.b32.xlu1 %v854_v33, %s1678_s18 }
 0x51f   : > { %996 = vrot.lane.b32.xlu1 %v921_v36, %s1680_s20 }
 0x54f   : > { %v1279_v55 = vpop.permute.xlu2 %1278 }
 0x550   : > { %v1289_v56 = vsel %vm722_vm3, %v1073_v37, %v1279_v55 }
 0x557   : > { %v1001_v1 = vpop.permute.xlu2 %1000 }
 0x57f   : > { %v1287_v58 = vpop.permute.xlu0 %1286 }
 0x581   : > { %v1283_v57 = vpop.permute.xlu1 %1282 }
 0x582   : > { %v1290_v59 = vsel %vm1004_vm6, %v1289_v56, %v1283_v57 }
 0x583   : > { %v1291_v60 = vsel %vm1006_vm7, %v1290_v59, %v1287_v58 }
 0x584   : > { %1589 = vmatmul.msk.f32.vlgmr.msrb.gmra.mxu3 %vm645_vm0, %v1291_v60 }
 0x589   : > { %v993_v61 = vpop.permute.xlu1 %992 }
 0x58a   : > { %v1003_v63 = vsel %vm722_vm3, %v1895_v62, %v993_v61  ;;  %v1343_v62 = vpop.f32.mrf.mxu1 }
 0x591   : > { %v997_v0 = vpop.permute.xlu1 %996 }
 0x592   : > { %v1005_v10 = vsel %vm1004_vm6, %v1003_v63, %v997_v0 }
 0x593   : > { %v1007_v2 = vsel %vm1006_vm7, %v1005_v10, %v1001_v1 }
 0x594   : > { %1587 = vmatmul.msk.f32.vlgmr.msra.gmra.mxu0 %vm645_vm0, %v1007_v2 }
 0x607   : > { %v1380_v4 = vpop.f32.mrf.mxu3 }
 0x608   : > { %v1404_v5 = vadd.f32 %v1403_v28, %v1380_v4 }
 0x60a   : > { %v1410_v6 = vadd.f32 %v1624_v3, %v1404_v5 }
 0x60c   : > { %1411 = vst.msk [vmem:[%s633_s0] sm:$0xff] %vm645_vm0, %v1410_v6 }
 0x611   : > { %v1320_v8 = vpop.f32.mrf.mxu0 }
 0x612   : > { %v1344_v9 = vadd.f32 %v1343_v62, %v1320_v8 }
 0x614   : > { %v1350_v12 = vadd.f32 %v1625_v7, %v1344_v9 }
 0x616   : > { %1351 = vst.msk [vmem:[%s629_s6] sm:$0xff] %vm645_vm0, %v1350_v12 }
 0x617 PF: > { %s28_s24 = sadd.s32 1, %s1664_s24  }
 0x618   : > { %p25_p4 = scmp.ge.s32.totalorder %s28_s24, 4  }
 0x61a   :  { %27 = sbr.rel (!%p25_p4) target bundleno = 5 (0x5), region = 141 }

</bundles_post_ra>
